<compile_context>
chip_gen: v5e
topology: v5e:2x2
jax: 0.10.0
libtpu: 0.0.40
codegen_flags: <defaults>
</compile_context>

<pallas_src>
import jax
import jax.numpy as jnp
from jax.experimental import pallas as pl
from jax.experimental.pallas import tpu as pltpu

SEQ_DIM = 9216   # encoder input width (Linear(9216, 32))
HID = 32         # fc / encoder output width
FEAT = 2 * HID   # width fed to SAGEConv (64)

VMEM_LIMIT_K1 = 56 * 1024 * 1024   # fits tn=1024 bf16 seq double-buffers, < v7x 64 MiB/TC
VMEM_LIMIT_K2 = 48 * 1024 * 1024


# ----------------------------- in-kernel math ------------------------------

def _erf(x):
    # Abramowitz & Stegun 7.1.26 polynomial erf (|err| < 1.5e-7), built only
    # from ops that lower cleanly in Mosaic (exp / mul / add / where / abs).
    a1, a2, a3, a4, a5 = (0.254829592, -0.284496736, 1.421413741,
                          -1.453152027, 1.061405429)
    p = 0.3275911
    s = jnp.where(x < 0.0, -1.0, 1.0)
    z = jnp.abs(x)
    t = 1.0 / (1.0 + p * z)
    poly = ((((a5 * t + a4) * t + a3) * t + a2) * t + a1) * t
    return s * (1.0 - poly * jnp.exp(-z * z))


def _gelu(x):
    # exact (erf-based) GELU, matching torch.nn.GELU() / F.gelu defaults
    return 0.5 * x * (1.0 + _erf(x * 0.7071067811865476))


# ------------------------------ tiling helpers ------------------------------

def _round_up(x, m):
    return ((x + m - 1) // m) * m


def _row_tile(n, cap):
    """Row-tile size: multiple of 8 (sublane), capped, cdiv-gridded.

    Chosen so the row grid has >= 2 steps whenever n > 8, so both v7x
    TensorCores get work under dimension_semantics=("parallel", ...)."""
    if n <= 8:
        return n                      # single full block (block dim == array dim)
    t = min(cap, _round_up(n, 8))
    if t >= n:                        # would collapse to one grid step -> split ~in half
        t = max(8, _round_up((n + 1) // 2, 8))
    return t


# ------------------- kernel 1: feature fusion + SAGE projections ------------
# proj[:, 0] = h @ W_l              (message, to be mean-aggregated)
# proj[:, 1] = h @ W_r + b_l        (per-node self term)
# where h = gelu( cat( fc(pause), fc(x) + gelu(seq @ enc_w + enc_b) ) )

def feature_kernel(x_ref, pause_ref, seq_ref, encw_ref, encb_ref,
                   fcw_ref, fcb_ref, w2_ref, b2_ref, proj_ref):
    # encoder: bf16 MXU matmul, f32 accumulation / epilogue
    enc = jnp.dot(seq_ref[...], encw_ref[...],
                  preferred_element_type=jnp.float32) + encb_ref[...]
    enc = _gelu(enc)                                           # [tn, 32]

    fc_x = x_ref[...] * fcw_ref[...] + fcb_ref[...]            # [tn,1]*[1,32]
    fc_p = pause_ref[...] * fcw_ref[...] + fcb_ref[...]        # [tn, 32]

    h_lo = _gelu(fc_p)                                         # h[:, 0:32]
    h_hi = _gelu(fc_x + enc)                                   # h[:, 32:64]

    # [tn,64] @ [64,2] split as two [tn,32]@[32,2] (avoids building wide h):
    # column 0 = h @ W_l (message), column 1 = h @ W_r + b_l (self term)
    proj_ref[...] = (
        jnp.dot(h_lo, w2_ref[0:HID, :], preferred_element_type=jnp.float32)
        + jnp.dot(h_hi, w2_ref[HID:FEAT, :], preferred_element_type=jnp.float32)
        + b2_ref[...])                                         # [tn, 2]


def feature_forward(x2d, pause2d, seq_bf16, enc_w_bf16, enc_b, fc_w, fc_b,
                    w2, b2, *, tn=None):
    n = x2d.shape[0]
    tn = tn or _row_tile(n, cap=1024)
    nt = pl.cdiv(n, tn)
    grid_spec = pltpu.PrefetchScalarGridSpec(
        num_scalar_prefetch=0,
        grid=(nt,),
        in_specs=[
            pl.BlockSpec((tn, 1), lambda i: (i, 0)),           # x
            pl.BlockSpec((tn, 1), lambda i: (i, 0)),           # pause
            pl.BlockSpec((tn, SEQ_DIM), lambda i: (i, 0)),     # seq (bf16 stream)
            pl.BlockSpec((SEQ_DIM, HID), lambda i: (0, 0)),    # enc_w (bf16, resident)
            pl.BlockSpec((1, HID), lambda i: (0, 0)),          # enc_b
            pl.BlockSpec((1, HID), lambda i: (0, 0)),          # fc_w
            pl.BlockSpec((1, HID), lambda i: (0, 0)),          # fc_b
            pl.BlockSpec((FEAT, 2), lambda i: (0, 0)),         # w2 = [W_l | W_r]
            pl.BlockSpec((1, 2), lambda i: (0, 0)),            # b2 = [0 | b_l]
        ],
        out_specs=pl.BlockSpec((tn, 2), lambda i: (i, 0)),     # proj = [msg | self]
    )
    return pl.pallas_call(
        feature_kernel,
        out_shape=jax.ShapeDtypeStruct((n, 2), jnp.float32),
        grid_spec=grid_spec,
        compiler_params=pltpu.CompilerParams(
            dimension_semantics=("parallel",),
            vmem_limit_bytes=VMEM_LIMIT_K1),
        cost_estimate=pl.CostEstimate(
            flops=2 * n * SEQ_DIM * HID + 4 * n * FEAT,
            transcendentals=2 * n * FEAT,
            bytes_accessed=n * SEQ_DIM * 2 + SEQ_DIM * HID * 2 + 24 * n),
    )(x2d, pause2d, seq_bf16, enc_w_bf16, enc_b, fc_w, fc_b, w2, b2)


# -------------------- kernel 2: mean aggregation ----------------------------
# out[rows] = A_mean[rows, :] @ proj[:, 0:1] + proj[rows, 1:2]
# Row-tiled (parallel) x contraction-tiled (arbitrary, innermost) with a VMEM
# accumulator; A streamed in bf16, math in f32.

def aggregate_kernel(a_ref, projk_ref, projm_ref, out_ref, acc_ref):
    k = pl.program_id(1)

    @pl.when(k == 0)
    def _():
        acc_ref[...] = jnp.zeros_like(acc_ref)

    a = a_ref[...].astype(jnp.float32)                 # bf16 HBM stream -> f32 math
    acc_ref[...] += jnp.dot(a, projk_ref[...][:, 0:1],
                            preferred_element_type=jnp.float32)

    @pl.when(k == pl.num_programs(1) - 1)
    def _():
        out_ref[...] = acc_ref[...] + projm_ref[...][:, 1:2]


def sage_aggregate(a_mean, proj, *, tm=None, tk=None):
    n = a_mean.shape[0]
    tm = tm or _row_tile(n, cap=512)
    # contraction tile: multiple of 128 lanes; A's columns / proj's rows are
    # zero-padded to a tk multiple so partial K blocks never pollute valid rows.
    tk = tk or min(4096, _round_up(n, 128))
    n_pad = _round_up(n, tk)
    a_p = jnp.pad(a_mean, ((0, 0), (0, n_pad - n))).astype(jnp.bfloat16)
    proj_p = jnp.pad(proj, ((0, n_pad - n), (0, 0)))
    mt = pl.cdiv(n, tm)
    kt = n_pad // tk

    grid_spec = pltpu.PrefetchScalarGridSpec(
        num_scalar_prefetch=0,
        grid=(mt, kt),
        in_specs=[
            pl.BlockSpec((tm, tk), lambda m, k: (m, k)),   # A block (bf16)
            pl.BlockSpec((tk, 2), lambda m, k: (k, 0)),    # proj, contraction side
            pl.BlockSpec((tm, 2), lambda m, k: (m, 0)),    # proj, row side (self term)
        ],
        out_specs=pl.BlockSpec((tm, 1), lambda m, k: (m, 0)),
        scratch_shapes=[pltpu.VMEM((tm, 1), jnp.float32)],
    )
    return pl.pallas_call(
        aggregate_kernel,
        out_shape=jax.ShapeDtypeStruct((n, 1), jnp.float32),
        grid_spec=grid_spec,
        compiler_params=pltpu.CompilerParams(
            dimension_semantics=("parallel", "arbitrary"),
            vmem_limit_bytes=VMEM_LIMIT_K2),
        cost_estimate=pl.CostEstimate(
            flops=2 * n * n_pad,
            transcendentals=0,
            bytes_accessed=n * n_pad * 2 + n_pad * 8 + n * 12),
    )(a_p, proj_p, proj_p)


# --------------------------------- glue -------------------------------------

def build_mean_adj(edge_index, n):
    # dense normalized adjacency for scatter-mean over incoming edges
    # TODO(synk): for large graphs replace the dense O(N^2) A_mean with a
    # scalar-prefetched (PrefetchScalarGridSpec) edge/degree-table gather +
    # segment-sum kernel; dense A is the HBM-footprint ceiling.
    src = edge_index[0]
    dst = edge_index[1]
    a = jnp.zeros((n, n), jnp.float32).at[dst, src].add(1.0)
    deg = a.sum(axis=1, keepdims=True)
    return jnp.where(deg > 0, a / jnp.maximum(deg, 1.0), 0.0)


def neural_net_forward(params, x, seq, edge_index, pause):
    n = x.shape[0]
    seq_bf = seq.astype(jnp.bfloat16)
    encw_bf = params["enc_w"].astype(jnp.bfloat16)
    # fused projection weights: [W_l | W_r] and [0 | b_l]
    w2 = jnp.concatenate([params["sage_wl"], params["sage_wr"]], axis=1)
    b2 = jnp.concatenate([jnp.zeros((1, 1), jnp.float32),
                          params["sage_bl"]], axis=1)
    proj = feature_forward(x.reshape(n, 1), pause.reshape(n, 1),
                           seq_bf, encw_bf,
                           params["enc_b"], params["fc_w"],
                           params["fc_b"], w2, b2)
    a_mean = build_mean_adj(edge_index, n)
    return sage_aggregate(a_mean, proj)


def ref_forward(params, x, seq, edge_index, pause):
    # pure-JAX reference (exact erf GELU).  seq / enc_w / A_mean are rounded to
    # bf16 to mirror the kernels' bf16 HBM streaming (math stays f32).
    n = x.shape[0]
    gelu = lambda v: jax.nn.gelu(v, approximate=False)
    seq_bf = seq.astype(jnp.bfloat16).astype(jnp.float32)
    encw_bf = params["enc_w"].astype(jnp.bfloat16).astype(jnp.float32)
    fc_x = x.reshape(n, 1) * params["fc_w"] + params["fc_b"]
    fc_p = pause.reshape(n, 1) * params["fc_w"] + params["fc_b"]
    enc = gelu(seq_bf @ encw_bf + params["enc_b"])
    h = gelu(jnp.concatenate([fc_p, fc_x + enc], axis=1))
    a = build_mean_adj(edge_index, n)
    a_bf = a.astype(jnp.bfloat16).astype(jnp.float32)
    return (a_bf @ h) @ params["sage_wl"] + params["sage_bl"] + h @ params["sage_wr"]


def init_params(key):
    ks = jax.random.split(key, 7)
    return {
        "fc_w": (jax.random.normal(ks[0], (1, HID), jnp.float32) * 0.5),
        "fc_b": (jax.random.normal(ks[1], (1, HID), jnp.float32) * 0.1),
        "enc_w": (jax.random.normal(ks[2], (SEQ_DIM, HID), jnp.float32)
                  / jnp.sqrt(jnp.float32(SEQ_DIM))),
        "enc_b": (jax.random.normal(ks[3], (1, HID), jnp.float32) * 0.1),
        "sage_wl": (jax.random.normal(ks[4], (FEAT, 1), jnp.float32) * 0.125),
        "sage_bl": (jax.random.normal(ks[5], (1, 1), jnp.float32) * 0.1),
        "sage_wr": (jax.random.normal(ks[6], (FEAT, 1), jnp.float32) * 0.125),
    }


# TODO(synk): the original script's pandas/scipy/PyG data loading (csv / npy /
# coo_matrix) is outside the nn.Module forward and is replaced by synthetic
# deterministic inputs here.

if __name__ == "__main__":
    N, E = 8, 16
    key = jax.random.PRNGKey(0)
    k_params, kx, ks, kp, ke = jax.random.split(key, 5)

    params = init_params(k_params)
    x = jax.random.normal(kx, (N,), jnp.float32)             # data.x (rNC2)
    seq = jax.random.normal(ks, (N, SEQ_DIM), jnp.float32)   # data.seq
    pause = jax.random.normal(kp, (N,), jnp.float32)         # data.pause
    edge_index = jax.random.randint(ke, (2, E), 0, N, dtype=jnp.int32)

    out = neural_net_forward(params, x, seq, edge_index, pause)
    out = jax.block_until_ready(out)

    ref = ref_forward(params, x, seq, edge_index, pause)
    assert out.shape == (N, 1), out.shape
    assert jnp.allclose(out, ref, atol=2e-3, rtol=2e-3), (out, ref)
    print("KERNEL_OK")
</pallas_src>

<mosaic_0001>
module attributes {stable_mosaic.version = 11 : i64} {
  func.func @feature_kernel(%arg0: i32, %arg1: memref<8x1xf32, #tpu.memory_space<vmem>>, %arg2: memref<8x1xf32, #tpu.memory_space<vmem>>, %arg3: memref<8x9216xbf16, #tpu.memory_space<vmem>>, %arg4: memref<9216x32xbf16, #tpu.memory_space<vmem>>, %arg5: memref<1x32xf32, #tpu.memory_space<vmem>>, %arg6: memref<1x32xf32, #tpu.memory_space<vmem>>, %arg7: memref<1x32xf32, #tpu.memory_space<vmem>>, %arg8: memref<64x2xf32, #tpu.memory_space<vmem>>, %arg9: memref<1x2xf32, #tpu.memory_space<vmem>>, %arg10: memref<8x2xf32, #tpu.memory_space<vmem>>) attributes {dimension_semantics = [#tpu.dimension_semantics<parallel>], iteration_bounds = array<i64: 1>, scalar_prefetch = 0 : i64, scratch_operands = 0 : i64, tpu.core_type = #tpu.core_type<tc>, window_params = [{transform_indices = @transform_0, window_bounds = array<i64: 8, 1>}, {transform_indices = @transform_1, window_bounds = array<i64: 8, 1>}, {transform_indices = @transform_2, window_bounds = array<i64: 8, 9216>}, {pipeline_mode = #tpu.pipeline_mode<synchronous>, transform_indices = @transform_3, window_bounds = array<i64: 9216, 32>}, {pipeline_mode = #tpu.pipeline_mode<synchronous>, transform_indices = @transform_4, window_bounds = array<i64: 1, 32>}, {pipeline_mode = #tpu.pipeline_mode<synchronous>, transform_indices = @transform_5, window_bounds = array<i64: 1, 32>}, {pipeline_mode = #tpu.pipeline_mode<synchronous>, transform_indices = @transform_6, window_bounds = array<i64: 1, 32>}, {pipeline_mode = #tpu.pipeline_mode<synchronous>, transform_indices = @transform_7, window_bounds = array<i64: 64, 2>}, {pipeline_mode = #tpu.pipeline_mode<synchronous>, transform_indices = @transform_8, window_bounds = array<i64: 1, 2>}, {transform_indices = @transform_9, window_bounds = array<i64: 8, 2>}]} {
    %c0 = arith.constant 0 : index
    %c0_0 = arith.constant 0 : index
    %0 = vector.load %arg3[%c0, %c0_0] : memref<8x9216xbf16, #tpu.memory_space<vmem>>, vector<8x9216xbf16>
    %c0_1 = arith.constant 0 : index
    %c0_2 = arith.constant 0 : index
    %1 = vector.load %arg4[%c0_1, %c0_2] : memref<9216x32xbf16, #tpu.memory_space<vmem>>, vector<9216x32xbf16>
    %cst = arith.constant dense<0.000000e+00> : vector<8x32xf32>
    %2 = tpu.matmul %0, %1, %cst {dimension_numbers = #tpu.dot_dimension_numbers<[1], [0], [0], [1], [0, 0, 1, 1], [], []>} : vector<8x9216xbf16>, vector<9216x32xbf16>, vector<8x32xf32> -> vector<8x32xf32>
    %c0_3 = arith.constant 0 : index
    %c0_4 = arith.constant 0 : index
    %3 = vector.load %arg5[%c0_3, %c0_4] : memref<1x32xf32, #tpu.memory_space<vmem>>, vector<1x32xf32>
    %4 = vector.broadcast %3 : vector<1x32xf32> to vector<8x32xf32>
    %5 = arith.addf %2, %4 : vector<8x32xf32>
    %cst_5 = arith.constant 5.000000e-01 : f32
    %6 = vector.broadcast %cst_5 : f32 to vector<8x32xf32>
    %7 = arith.mulf %6, %5 : vector<8x32xf32>
    %cst_6 = arith.constant 0.707106769 : f32
    %8 = vector.broadcast %cst_6 : f32 to vector<8x32xf32>
    %9 = arith.mulf %5, %8 : vector<8x32xf32>
    %cst_7 = arith.constant 0.000000e+00 : f32
    %10 = vector.broadcast %cst_7 : f32 to vector<8x32xf32>
    %11 = arith.cmpf olt, %9, %10 : vector<8x32xf32>
    %cst_8 = arith.constant -1.000000e+00 : f32
    %cst_9 = arith.constant 1.000000e+00 : f32
    %12 = vector.broadcast %cst_8 : f32 to vector<8x32xf32>
    %13 = vector.broadcast %cst_9 : f32 to vector<8x32xf32>
    %14 = arith.select %11, %12, %13 : vector<8x32xi1>, vector<8x32xf32>
    %15 = math.absf %9 : vector<8x32xf32>
    %cst_10 = arith.constant 0.327591091 : f32
    %16 = vector.broadcast %cst_10 : f32 to vector<8x32xf32>
    %17 = arith.mulf %16, %15 : vector<8x32xf32>
    %cst_11 = arith.constant 1.000000e+00 : f32
    %18 = vector.broadcast %cst_11 : f32 to vector<8x32xf32>
    %19 = arith.addf %18, %17 : vector<8x32xf32>
    %cst_12 = arith.constant 1.000000e+00 : f32
    %20 = vector.broadcast %cst_12 : f32 to vector<8x32xf32>
    %21 = arith.divf %20, %19 : vector<8x32xf32>
    %cst_13 = arith.constant 1.06140542 : f32
    %22 = vector.broadcast %cst_13 : f32 to vector<8x32xf32>
    %23 = arith.mulf %22, %21 : vector<8x32xf32>
    %cst_14 = arith.constant -1.45315206 : f32
    %24 = vector.broadcast %cst_14 : f32 to vector<8x32xf32>
    %25 = arith.addf %23, %24 : vector<8x32xf32>
    %26 = arith.mulf %25, %21 : vector<8x32xf32>
    %cst_15 = arith.constant 1.42141378 : f32
    %27 = vector.broadcast %cst_15 : f32 to vector<8x32xf32>
    %28 = arith.addf %26, %27 : vector<8x32xf32>
    %29 = arith.mulf %28, %21 : vector<8x32xf32>
    %cst_16 = arith.constant -0.284496725 : f32
    %30 = vector.broadcast %cst_16 : f32 to vector<8x32xf32>
    %31 = arith.addf %29, %30 : vector<8x32xf32>
    %32 = arith.mulf %31, %21 : vector<8x32xf32>
    %cst_17 = arith.constant 0.254829586 : f32
    %33 = vector.broadcast %cst_17 : f32 to vector<8x32xf32>
    %34 = arith.addf %32, %33 : vector<8x32xf32>
    %35 = arith.mulf %34, %21 : vector<8x32xf32>
    %cst_18 = arith.constant 0.000000e+00 : f32
    %36 = vector.broadcast %cst_18 : f32 to vector<8x32xf32>
    %37 = arith.subf %36, %15 : vector<8x32xf32>
    %38 = arith.mulf %37, %15 : vector<8x32xf32>
    %39 = math.exp %38 : vector<8x32xf32>
    %40 = arith.mulf %35, %39 : vector<8x32xf32>
    %cst_19 = arith.constant 1.000000e+00 : f32
    %41 = vector.broadcast %cst_19 : f32 to vector<8x32xf32>
    %42 = arith.subf %41, %40 : vector<8x32xf32>
    %43 = arith.mulf %14, %42 : vector<8x32xf32>
    %cst_20 = arith.constant 1.000000e+00 : f32
    %44 = vector.broadcast %cst_20 : f32 to vector<8x32xf32>
    %45 = arith.addf %44, %43 : vector<8x32xf32>
    %46 = arith.mulf %7, %45 : vector<8x32xf32>
    %c0_21 = arith.constant 0 : index
    %c0_22 = arith.constant 0 : index
    %47 = vector.load %arg1[%c0_21, %c0_22] : memref<8x1xf32, #tpu.memory_space<vmem>>, vector<8x1xf32>
    %c0_23 = arith.constant 0 : index
    %c0_24 = arith.constant 0 : index
    %48 = vector.load %arg6[%c0_23, %c0_24] : memref<1x32xf32, #tpu.memory_space<vmem>>, vector<1x32xf32>
    %49 = vector.broadcast %47 : vector<8x1xf32> to vector<8x32xf32>
    %50 = vector.broadcast %48 : vector<1x32xf32> to vector<8x32xf32>
    %51 = arith.mulf %49, %50 : vector<8x32xf32>
    %c0_25 = arith.constant 0 : index
    %c0_26 = arith.constant 0 : index
    %52 = vector.load %arg7[%c0_25, %c0_26] : memref<1x32xf32, #tpu.memory_space<vmem>>, vector<1x32xf32>
    %53 = vector.broadcast %52 : vector<1x32xf32> to vector<8x32xf32>
    %54 = arith.addf %51, %53 : vector<8x32xf32>
    %c0_27 = arith.constant 0 : index
    %c0_28 = arith.constant 0 : index
    %55 = vector.load %arg2[%c0_27, %c0_28] : memref<8x1xf32, #tpu.memory_space<vmem>>, vector<8x1xf32>
    %c0_29 = arith.constant 0 : index
    %c0_30 = arith.constant 0 : index
    %56 = vector.load %arg6[%c0_29, %c0_30] : memref<1x32xf32, #tpu.memory_space<vmem>>, vector<1x32xf32>
    %57 = vector.broadcast %55 : vector<8x1xf32> to vector<8x32xf32>
    %58 = vector.broadcast %56 : vector<1x32xf32> to vector<8x32xf32>
    %59 = arith.mulf %57, %58 : vector<8x32xf32>
    %c0_31 = arith.constant 0 : index
    %c0_32 = arith.constant 0 : index
    %60 = vector.load %arg7[%c0_31, %c0_32] : memref<1x32xf32, #tpu.memory_space<vmem>>, vector<1x32xf32>
    %61 = vector.broadcast %60 : vector<1x32xf32> to vector<8x32xf32>
    %62 = arith.addf %59, %61 : vector<8x32xf32>
    %cst_33 = arith.constant 5.000000e-01 : f32
    %63 = vector.broadcast %cst_33 : f32 to vector<8x32xf32>
    %64 = arith.mulf %63, %62 : vector<8x32xf32>
    %cst_34 = arith.constant 0.707106769 : f32
    %65 = vector.broadcast %cst_34 : f32 to vector<8x32xf32>
    %66 = arith.mulf %62, %65 : vector<8x32xf32>
    %cst_35 = arith.constant 0.000000e+00 : f32
    %67 = vector.broadcast %cst_35 : f32 to vector<8x32xf32>
    %68 = arith.cmpf olt, %66, %67 : vector<8x32xf32>
    %cst_36 = arith.constant -1.000000e+00 : f32
    %cst_37 = arith.constant 1.000000e+00 : f32
    %69 = vector.broadcast %cst_36 : f32 to vector<8x32xf32>
    %70 = vector.broadcast %cst_37 : f32 to vector<8x32xf32>
    %71 = arith.select %68, %69, %70 : vector<8x32xi1>, vector<8x32xf32>
    %72 = math.absf %66 : vector<8x32xf32>
    %cst_38 = arith.constant 0.327591091 : f32
    %73 = vector.broadcast %cst_38 : f32 to vector<8x32xf32>
    %74 = arith.mulf %73, %72 : vector<8x32xf32>
    %cst_39 = arith.constant 1.000000e+00 : f32
    %75 = vector.broadcast %cst_39 : f32 to vector<8x32xf32>
    %76 = arith.addf %75, %74 : vector<8x32xf32>
    %cst_40 = arith.constant 1.000000e+00 : f32
    %77 = vector.broadcast %cst_40 : f32 to vector<8x32xf32>
    %78 = arith.divf %77, %76 : vector<8x32xf32>
    %cst_41 = arith.constant 1.06140542 : f32
    %79 = vector.broadcast %cst_41 : f32 to vector<8x32xf32>
    %80 = arith.mulf %79, %78 : vector<8x32xf32>
    %cst_42 = arith.constant -1.45315206 : f32
    %81 = vector.broadcast %cst_42 : f32 to vector<8x32xf32>
    %82 = arith.addf %80, %81 : vector<8x32xf32>
    %83 = arith.mulf %82, %78 : vector<8x32xf32>
    %cst_43 = arith.constant 1.42141378 : f32
    %84 = vector.broadcast %cst_43 : f32 to vector<8x32xf32>
    %85 = arith.addf %83, %84 : vector<8x32xf32>
    %86 = arith.mulf %85, %78 : vector<8x32xf32>
    %cst_44 = arith.constant -0.284496725 : f32
    %87 = vector.broadcast %cst_44 : f32 to vector<8x32xf32>
    %88 = arith.addf %86, %87 : vector<8x32xf32>
    %89 = arith.mulf %88, %78 : vector<8x32xf32>
    %cst_45 = arith.constant 0.254829586 : f32
    %90 = vector.broadcast %cst_45 : f32 to vector<8x32xf32>
    %91 = arith.addf %89, %90 : vector<8x32xf32>
    %92 = arith.mulf %91, %78 : vector<8x32xf32>
    %cst_46 = arith.constant 0.000000e+00 : f32
    %93 = vector.broadcast %cst_46 : f32 to vector<8x32xf32>
    %94 = arith.subf %93, %72 : vector<8x32xf32>
    %95 = arith.mulf %94, %72 : vector<8x32xf32>
    %96 = math.exp %95 : vector<8x32xf32>
    %97 = arith.mulf %92, %96 : vector<8x32xf32>
    %cst_47 = arith.constant 1.000000e+00 : f32
    %98 = vector.broadcast %cst_47 : f32 to vector<8x32xf32>
    %99 = arith.subf %98, %97 : vector<8x32xf32>
    %100 = arith.mulf %71, %99 : vector<8x32xf32>
    %cst_48 = arith.constant 1.000000e+00 : f32
    %101 = vector.broadcast %cst_48 : f32 to vector<8x32xf32>
    %102 = arith.addf %101, %100 : vector<8x32xf32>
    %103 = arith.mulf %64, %102 : vector<8x32xf32>
    %104 = arith.addf %54, %46 : vector<8x32xf32>
    %cst_49 = arith.constant 5.000000e-01 : f32
    %105 = vector.broadcast %cst_49 : f32 to vector<8x32xf32>
    %106 = arith.mulf %105, %104 : vector<8x32xf32>
    %cst_50 = arith.constant 0.707106769 : f32
    %107 = vector.broadcast %cst_50 : f32 to vector<8x32xf32>
    %108 = arith.mulf %104, %107 : vector<8x32xf32>
    %cst_51 = arith.constant 0.000000e+00 : f32
    %109 = vector.broadcast %cst_51 : f32 to vector<8x32xf32>
    %110 = arith.cmpf olt, %108, %109 : vector<8x32xf32>
    %cst_52 = arith.constant -1.000000e+00 : f32
    %cst_53 = arith.constant 1.000000e+00 : f32
    %111 = vector.broadcast %cst_52 : f32 to vector<8x32xf32>
    %112 = vector.broadcast %cst_53 : f32 to vector<8x32xf32>
    %113 = arith.select %110, %111, %112 : vector<8x32xi1>, vector<8x32xf32>
    %114 = math.absf %108 : vector<8x32xf32>
    %cst_54 = arith.constant 0.327591091 : f32
    %115 = vector.broadcast %cst_54 : f32 to vector<8x32xf32>
    %116 = arith.mulf %115, %114 : vector<8x32xf32>
    %cst_55 = arith.constant 1.000000e+00 : f32
    %117 = vector.broadcast %cst_55 : f32 to vector<8x32xf32>
    %118 = arith.addf %117, %116 : vector<8x32xf32>
    %cst_56 = arith.constant 1.000000e+00 : f32
    %119 = vector.broadcast %cst_56 : f32 to vector<8x32xf32>
    %120 = arith.divf %119, %118 : vector<8x32xf32>
    %cst_57 = arith.constant 1.06140542 : f32
    %121 = vector.broadcast %cst_57 : f32 to vector<8x32xf32>
    %122 = arith.mulf %121, %120 : vector<8x32xf32>
    %cst_58 = arith.constant -1.45315206 : f32
    %123 = vector.broadcast %cst_58 : f32 to vector<8x32xf32>
    %124 = arith.addf %122, %123 : vector<8x32xf32>
    %125 = arith.mulf %124, %120 : vector<8x32xf32>
    %cst_59 = arith.constant 1.42141378 : f32
    %126 = vector.broadcast %cst_59 : f32 to vector<8x32xf32>
    %127 = arith.addf %125, %126 : vector<8x32xf32>
    %128 = arith.mulf %127, %120 : vector<8x32xf32>
    %cst_60 = arith.constant -0.284496725 : f32
    %129 = vector.broadcast %cst_60 : f32 to vector<8x32xf32>
    %130 = arith.addf %128, %129 : vector<8x32xf32>
    %131 = arith.mulf %130, %120 : vector<8x32xf32>
    %cst_61 = arith.constant 0.254829586 : f32
    %132 = vector.broadcast %cst_61 : f32 to vector<8x32xf32>
    %133 = arith.addf %131, %132 : vector<8x32xf32>
    %134 = arith.mulf %133, %120 : vector<8x32xf32>
    %cst_62 = arith.constant 0.000000e+00 : f32
    %135 = vector.broadcast %cst_62 : f32 to vector<8x32xf32>
    %136 = arith.subf %135, %114 : vector<8x32xf32>
    %137 = arith.mulf %136, %114 : vector<8x32xf32>
    %138 = math.exp %137 : vector<8x32xf32>
    %139 = arith.mulf %134, %138 : vector<8x32xf32>
    %cst_63 = arith.constant 1.000000e+00 : f32
    %140 = vector.broadcast %cst_63 : f32 to vector<8x32xf32>
    %141 = arith.subf %140, %139 : vector<8x32xf32>
    %142 = arith.mulf %113, %141 : vector<8x32xf32>
    %cst_64 = arith.constant 1.000000e+00 : f32
    %143 = vector.broadcast %cst_64 : f32 to vector<8x32xf32>
    %144 = arith.addf %143, %142 : vector<8x32xf32>
    %145 = arith.mulf %106, %144 : vector<8x32xf32>
    %c0_65 = arith.constant 0 : index
    %c0_66 = arith.constant 0 : index
    %146 = vector.load %arg8[%c0_65, %c0_66] : memref<64x2xf32, #tpu.memory_space<vmem>>, vector<32x2xf32>
    %cst_67 = arith.constant dense<0.000000e+00> : vector<8x2xf32>
    %147 = tpu.matmul %103, %146, %cst_67 {dimension_numbers = #tpu.dot_dimension_numbers<[1], [0], [0], [1], [0, 0, 1, 1], [], []>} : vector<8x32xf32>, vector<32x2xf32>, vector<8x2xf32> -> vector<8x2xf32>
    %c32 = arith.constant 32 : index
    %c0_68 = arith.constant 0 : index
    %148 = vector.load %arg8[%c32, %c0_68] : memref<64x2xf32, #tpu.memory_space<vmem>>, vector<32x2xf32>
    %cst_69 = arith.constant dense<0.000000e+00> : vector<8x2xf32>
    %149 = tpu.matmul %145, %148, %cst_69 {dimension_numbers = #tpu.dot_dimension_numbers<[1], [0], [0], [1], [0, 0, 1, 1], [], []>} : vector<8x32xf32>, vector<32x2xf32>, vector<8x2xf32> -> vector<8x2xf32>
    %150 = arith.addf %147, %149 : vector<8x2xf32>
    %c0_70 = arith.constant 0 : index
    %c0_71 = arith.constant 0 : index
    %151 = vector.load %arg9[%c0_70, %c0_71] : memref<1x2xf32, #tpu.memory_space<vmem>>, vector<1x2xf32>
    %152 = vector.broadcast %151 : vector<1x2xf32> to vector<8x2xf32>
    %153 = arith.addf %150, %152 : vector<8x2xf32>
    %c0_72 = arith.constant 0 : index
    %c0_73 = arith.constant 0 : index
    %154 = vector.load %arg10[%c0_72, %c0_73] : memref<8x2xf32, #tpu.memory_space<vmem>>, vector<8x2xf32>
    tpu.vector_store %arg10[%c0_72, %c0_73], %153 {strides = array<i32>} : memref<8x2xf32, #tpu.memory_space<vmem>>, vector<8x2xf32>,
    return
  }
  func.func @transform_0(%arg0: i32) -> (i32, i32) {
    %c0_i32 = arith.constant 0 : i32
    %c0_i32_0 = arith.constant 0 : i32
    return %arg0, %c0_i32 : i32, i32
  }
  func.func @transform_1(%arg0: i32) -> (i32, i32) {
    %c0_i32 = arith.constant 0 : i32
    %c0_i32_0 = arith.constant 0 : i32
    return %arg0, %c0_i32 : i32, i32
  }
  func.func @transform_2(%arg0: i32) -> (i32, i32) {
    %c0_i32 = arith.constant 0 : i32
    %c0_i32_0 = arith.constant 0 : i32
    return %arg0, %c0_i32 : i32, i32
  }
  func.func @transform_3(%arg0: i32) -> (i32, i32) {
    %c0_i32 = arith.constant 0 : i32
    %c0_i32_0 = arith.constant 0 : i32
    %c0_i32_1 = arith.constant 0 : i32
    return %c0_i32, %c0_i32_0 : i32, i32
  }
  func.func @transform_4(%arg0: i32) -> (i32, i32) {
    %c0_i32 = arith.constant 0 : i32
    %c0_i32_0 = arith.constant 0 : i32
    %c0_i32_1 = arith.constant 0 : i32
    return %c0_i32, %c0_i32_0 : i32, i32
  }
  func.func @transform_5(%arg0: i32) -> (i32, i32) {
    %c0_i32 = arith.constant 0 : i32
    %c0_i32_0 = arith.constant 0 : i32
    %c0_i32_1 = arith.constant 0 : i32
    return %c0_i32, %c0_i32_0 : i32, i32
  }
  func.func @transform_6(%arg0: i32) -> (i32, i32) {
    %c0_i32 = arith.constant 0 : i32
    %c0_i32_0 = arith.constant 0 : i32
    %c0_i32_1 = arith.constant 0 : i32
    return %c0_i32, %c0_i32_0 : i32, i32
  }
  func.func @transform_7(%arg0: i32) -> (i32, i32) {
    %c0_i32 = arith.constant 0 : i32
    %c0_i32_0 = arith.constant 0 : i32
    %c0_i32_1 = arith.constant 0 : i32
    return %c0_i32, %c0_i32_0 : i32, i32
  }
  func.func @transform_8(%arg0: i32) -> (i32, i32) {
    %c0_i32 = arith.constant 0 : i32
    %c0_i32_0 = arith.constant 0 : i32
    %c0_i32_1 = arith.constant 0 : i32
    return %c0_i32, %c0_i32_0 : i32, i32
  }
  func.func @transform_9(%arg0: i32) -> (i32, i32) {
    %c0_i32 = arith.constant 0 : i32
    %c0_i32_0 = arith.constant 0 : i32
    return %arg0, %c0_i32 : i32, i32
  }
}

</mosaic_0001>

<bundles_post_ra>
// kernel: tpu_custom_call.1
= control target key start
LH: loop header
LB: loop body
LE: loop exit
PB: predicated region body
PF: predicated region fallthrough
CT: control target
= control target key end

     0   :  { %vm6021_vm6 = vcmask 261120   ;;  %s10973_s3 = inlined_call_operand.vmem [shape: bf16[9216,32], index: 3, kind: input, shape index: {}]   ;;  %s10974_s2 = inlined_call_operand.vmem [shape: bf16[8,9216], index: 2, kind: input, shape index: {}]   ;;  %s10975_s4 = inlined_call_operand.vmem [shape: f32[1,32], index: 4, kind: input, shape index: {}]   ;;  %s10976_s0 = inlined_call_operand.vmem [shape: f32[8,1], index: 0, kind: input, shape index: {}]   ;;  %s10977_s1 = inlined_call_operand.vmem [shape: f32[8,1], index: 1, kind: input, shape index: {}]   ;;  %s10978_s5 = inlined_call_operand.vmem [shape: f32[1,32], index: 5, kind: input, shape index: {}]   ;;  %s10979_s6 = inlined_call_operand.vmem [shape: f32[1,32], index: 6, kind: input, shape index: {}]   ;;  %s10980_s7 = inlined_call_operand.vmem [shape: f32[64,2], index: 7, kind: input, shape index: {}]   ;;  %s10981_s8 = inlined_call_operand.vmem [shape: f32[1,2], index: 8, kind: input, shape index: {}]   ;;  %s10982_s9 = inlined_call_operand.vmem [shape: f32[8,2], index: 9, kind: output, shape index: {}]  }
   0x1   :  { %v8392_v0 = vld [vmem:[%s10973_s3 + $0x38] sm:$0xff]  ;;  %v8391_v4 = vld [vmem:[%s10973_s3 + $0x30] sm:$0xff]  ;;  %v8390_v8 = vld [vmem:[%s10973_s3 + $0x28] sm:$0xff] }
   0x2   :  { %v8400_v1 = vld [vmem:[%s10973_s3 + $0x78] sm:$0xff]  ;;  %4932 = vmatpush.bf16.msra.mxu0 %v8392_v0  ;;  %v8399_v5 = vld [vmem:[%s10973_s3 + $0x70] sm:$0xff]  ;;  %v8398_v9 = vld [vmem:[%s10973_s3 + $0x68] sm:$0xff] }
   0x3   :  { %v8408_v2 = vld [vmem:[%s10973_s3 + $0xb8] sm:$0xff]  ;;  %4945 = vmatpush.bf16.msra.mxu1 %v8400_v1  ;;  %v8407_v6 = vld [vmem:[%s10973_s3 + $0xb0] sm:$0xff]  ;;  %v8406_v10 = vld [vmem:[%s10973_s3 + $0xa8] sm:$0xff] }
   0x4   :  { %v8416_v3 = vld [vmem:[%s10973_s3 + $0xf8] sm:$0xff]  ;;  %4958 = vmatpush.bf16.msra.mxu2 %v8408_v2  ;;  %v8415_v7 = vld [vmem:[%s10973_s3 + $0xf0] sm:$0xff]  ;;  %v8414_v11 = vld [vmem:[%s10973_s3 + $0xe8] sm:$0xff] }
   0x5   :  { %4971 = vmatpush.bf16.msra.mxu3 %v8416_v3  ;;  %v8389_v12 = vld [vmem:[%s10973_s3 + $0x20] sm:$0xff]  ;;  %v8388_v16 = vld [vmem:[%s10973_s3 + $0x18] sm:$0xff]  ;;  %v8387_v20 = vld [vmem:[%s10973_s3 + $0x10] sm:$0xff] }
   0x6   :  { %4933 = vmatpush.bf16.msra.mxu0 %v8391_v4  ;;  %v8397_v13 = vld [vmem:[%s10973_s3 + $0x60] sm:$0xff]  ;;  %v8396_v17 = vld [vmem:[%s10973_s3 + $0x58] sm:$0xff]  ;;  %v8395_v21 = vld [vmem:[%s10973_s3 + $0x50] sm:$0xff] }
   0x7   :  { %4946 = vmatpush.bf16.msra.mxu1 %v8399_v5  ;;  %v8405_v14 = vld [vmem:[%s10973_s3 + $0xa0] sm:$0xff]  ;;  %v8404_v18 = vld [vmem:[%s10973_s3 + $0x98] sm:$0xff]  ;;  %v8403_v22 = vld [vmem:[%s10973_s3 + $0x90] sm:$0xff] }
   0x8   :  { %4959 = vmatpush.bf16.msra.mxu2 %v8407_v6  ;;  %v8413_v15 = vld [vmem:[%s10973_s3 + $0xe0] sm:$0xff]  ;;  %v8412_v19 = vld [vmem:[%s10973_s3 + $0xd8] sm:$0xff]  ;;  %v8411_v23 = vld [vmem:[%s10973_s3 + $0xd0] sm:$0xff] }
   0x9   :  { %4972 = vmatpush.bf16.msra.mxu3 %v8415_v7  ;;  %v8386_v24 = vld [vmem:[%s10973_s3 + $0x8] sm:$0xff]  ;;  %v32_v29 = vld [vmem:[%s10974_s2] sm:$0xff]  ;;  %v8424_v38 = vld [vmem:[%s10973_s3 + $0x138] sm:$0xff] }
   0xa   :  { %4934 = vmatpush.bf16.msra.mxu0 %v8390_v8  ;;  %v8394_v25 = vld [vmem:[%s10973_s3 + $0x48] sm:$0xff]  ;;  %v8385_v30 = vld [vmem:[%s10973_s3] sm:$0xff]  ;;  %v1260_v33 = vunpack.c.l.b16 %v32_v29  ;;  %v1261_v37 = vunpack.c.h.b16 %v32_v29  ;;  %v8432_v39 = vld [vmem:[%s10973_s3 + $0x178] sm:$0xff] }
   0xb   :  { %4947 = vmatpush.bf16.msra.mxu1 %v8398_v9  ;;  %v8402_v26 = vld [vmem:[%s10973_s3 + $0x88] sm:$0xff]  ;;  %v8393_v31 = vld [vmem:[%s10973_s3 + $0x40] sm:$0xff]  ;;  %v8440_v40 = vld [vmem:[%s10973_s3 + $0x1b8] sm:$0xff] }
   0xc   :  { %4960 = vmatpush.bf16.msra.mxu2 %v8406_v10  ;;  %v8410_v27 = vld [vmem:[%s10973_s3 + $0xc8] sm:$0xff]  ;;  %v8401_v34 = vld [vmem:[%s10973_s3 + $0x80] sm:$0xff]  ;;  %v8448_v41 = vld [vmem:[%s10973_s3 + $0x1f8] sm:$0xff]  ;;  %v1332_v43 = vpack.c.b16 %v1260_v33, %v1260_v33  ;;  %v1333_v45 = vpack.c.b16 %v1261_v37, %v1261_v37 }
   0xd   :  { %4973 = vmatpush.bf16.msra.mxu3 %v8414_v11  ;;  %v33_v28 = vld [vmem:[%s10974_s2 + $0x8] sm:$0xff]  ;;  %v8409_v35 = vld [vmem:[%s10973_s3 + $0xc0] sm:$0xff]  ;;  %v8423_v46 = vld [vmem:[%s10973_s3 + $0x130] sm:$0xff] }
   0xe   :  { %4935 = vmatpush.bf16.msra.mxu0 %v8389_v12  ;;  %v1262_v32 = vunpack.c.l.b16 %v33_v28  ;;  %v1263_v36 = vunpack.c.h.b16 %v33_v28  ;;  %v8431_v47 = vld [vmem:[%s10973_s3 + $0x170] sm:$0xff]  ;;  %v8422_v50 = vld [vmem:[%s10973_s3 + $0x128] sm:$0xff]  ;;  %v8421_v54 = vld [vmem:[%s10973_s3 + $0x120] sm:$0xff] }
   0xf   :  { %4948 = vmatpush.bf16.msra.mxu1 %v8397_v13  ;;  %v8439_v48 = vld [vmem:[%s10973_s3 + $0x1b0] sm:$0xff]  ;;  %v8430_v51 = vld [vmem:[%s10973_s3 + $0x168] sm:$0xff]  ;;  %v8429_v55 = vld [vmem:[%s10973_s3 + $0x160] sm:$0xff] }
  0x10   :  { %4961 = vmatpush.bf16.msra.mxu2 %v8405_v14  ;;  %v1334_v42 = vpack.c.b16 %v1262_v32, %v1262_v32  ;;  %v1335_v44 = vpack.c.b16 %v1263_v36, %v1263_v36  ;;  %v8447_v49 = vld [vmem:[%s10973_s3 + $0x1f0] sm:$0xff]  ;;  %v8438_v52 = vld [vmem:[%s10973_s3 + $0x1a8] sm:$0xff]  ;;  %v8437_v56 = vld [vmem:[%s10973_s3 + $0x1a0] sm:$0xff] }
  0x11   :  { %4974 = vmatpush.bf16.msra.mxu3 %v8413_v15  ;;  %v8446_v53 = vld [vmem:[%s10973_s3 + $0x1e8] sm:$0xff]  ;;  %v8445_v57 = vld [vmem:[%s10973_s3 + $0x1e0] sm:$0xff]  ;;  %v8420_v58 = vld [vmem:[%s10973_s3 + $0x118] sm:$0xff] }
  0x12   :  { %4936 = vmatpush.bf16.msra.mxu0 %v8388_v16  ;;  %v8428_v59 = vld [vmem:[%s10973_s3 + $0x158] sm:$0xff]  ;;  %v8419_v62 = vld [vmem:[%s10973_s3 + $0x110] sm:$0xff]  ;;  %v8418_v2 = vld [vmem:[%s10973_s3 + $0x108] sm:$0xff] }
  0x13   :  { %4949 = vmatpush.bf16.msra.mxu1 %v8396_v17  ;;  %v8436_v60 = vld [vmem:[%s10973_s3 + $0x198] sm:$0xff]  ;;  %v8427_v63 = vld [vmem:[%s10973_s3 + $0x150] sm:$0xff]  ;;  %v8426_v3 = vld [vmem:[%s10973_s3 + $0x148] sm:$0xff] }
  0x14   :  { %4962 = vmatpush.bf16.msra.mxu2 %v8404_v18  ;;  %v8444_v61 = vld [vmem:[%s10973_s3 + $0x1d8] sm:$0xff]  ;;  %v8435_v0 = vld [vmem:[%s10973_s3 + $0x190] sm:$0xff]  ;;  %v8434_v4 = vld [vmem:[%s10973_s3 + $0x188] sm:$0xff] }
  0x15   :  { %4975 = vmatpush.bf16.msra.mxu3 %v8412_v19  ;;  %v8443_v1 = vld [vmem:[%s10973_s3 + $0x1d0] sm:$0xff]  ;;  %v8442_v5 = vld [vmem:[%s10973_s3 + $0x1c8] sm:$0xff]  ;;  %v35_v6 = vld [vmem:[%s10974_s2 + $0x18] sm:$0xff] }
  0x16   :  { %4937 = vmatpush.bf16.msra.mxu0 %v8387_v20  ;;  %v34_v7 = vld [vmem:[%s10974_s2 + $0x10] sm:$0xff]  ;;  %v8417_v8 = vld [vmem:[%s10973_s3 + $0x100] sm:$0xff]  ;;  %v1266_v10 = vunpack.c.l.b16 %v35_v6  ;;  %v1267_v14 = vunpack.c.h.b16 %v35_v6  ;;  %v8456_v16 = vld [vmem:[%s10973_s3 + $0x238] sm:$0xff] }
  0x17   :  { %4950 = vmatpush.bf16.msra.mxu1 %v8395_v21  ;;  %v8425_v9 = vld [vmem:[%s10973_s3 + $0x140] sm:$0xff]  ;;  %v1264_v11 = vunpack.c.l.b16 %v34_v7  ;;  %v1265_v15 = vunpack.c.h.b16 %v34_v7  ;;  %v8464_v17 = vld [vmem:[%s10973_s3 + $0x278] sm:$0xff]  ;;  %v8454_v28 = vld [vmem:[%s10973_s3 + $0x228] sm:$0xff] }
  0x18   :  { %4963 = vmatpush.bf16.msra.mxu2 %v8403_v22  ;;  %v8433_v12 = vld [vmem:[%s10973_s3 + $0x180] sm:$0xff]  ;;  %v8472_v18 = vld [vmem:[%s10973_s3 + $0x2b8] sm:$0xff]  ;;  %v1338_v20 = vpack.c.b16 %v1266_v10, %v1266_v10  ;;  %v1339_v22 = vpack.c.b16 %v1267_v14, %v1267_v14  ;;  %v8462_v29 = vld [vmem:[%s10973_s3 + $0x268] sm:$0xff] }
  0x19   :  { %4976 = vmatpush.bf16.msra.mxu3 %v8411_v23  ;;  %v8441_v13 = vld [vmem:[%s10973_s3 + $0x1c0] sm:$0xff]  ;;  %v8480_v19 = vld [vmem:[%s10973_s3 + $0x2f8] sm:$0xff]  ;;  %v1336_v21 = vpack.c.b16 %v1264_v11, %v1264_v11  ;;  %v1337_v23 = vpack.c.b16 %v1265_v15, %v1265_v15  ;;  %v8486_v6 = vld [vmem:[%s10973_s3 + $0x328] sm:$0xff] }
  0x1a   :  { %4938 = vmatpush.bf16.msra.mxu0 %v8386_v24  ;;  %v8455_v24 = vld [vmem:[%s10973_s3 + $0x230] sm:$0xff]  ;;  %v8453_v32 = vld [vmem:[%s10973_s3 + $0x220] sm:$0xff]  ;;  %v8452_v36 = vld [vmem:[%s10973_s3 + $0x218] sm:$0xff] }
  0x1b   :  { %4951 = vmatpush.bf16.msra.mxu1 %v8394_v25  ;;  %v8463_v25 = vld [vmem:[%s10973_s3 + $0x270] sm:$0xff]  ;;  %v8461_v33 = vld [vmem:[%s10973_s3 + $0x260] sm:$0xff]  ;;  %v8460_v37 = vld [vmem:[%s10973_s3 + $0x258] sm:$0xff] }
  0x1c   :  { %4964 = vmatpush.bf16.msra.mxu2 %v8402_v26  ;;  %v8471_v26 = vld [vmem:[%s10973_s3 + $0x2b0] sm:$0xff]  ;;  %v8494_v7 = vld [vmem:[%s10973_s3 + $0x368] sm:$0xff]  ;;  %v8485_v10 = vld [vmem:[%s10973_s3 + $0x320] sm:$0xff] }
  0x1d   :  { %4977 = vmatpush.bf16.msra.mxu3 %v8410_v27  ;;  %v8479_v27 = vld [vmem:[%s10973_s3 + $0x2f0] sm:$0xff]  ;;  %v8493_v11 = vld [vmem:[%s10973_s3 + $0x360] sm:$0xff]  ;;  %v8484_v14 = vld [vmem:[%s10973_s3 + $0x318] sm:$0xff] }
  0x1e   :  { %4939 = vmatpush.bf16.msra.mxu0 %v8385_v30  ;;  %v8470_v30 = vld [vmem:[%s10973_s3 + $0x2a8] sm:$0xff]  ;;  %v8492_v15 = vld [vmem:[%s10973_s3 + $0x358] sm:$0xff] }
  0x1f   :  { %4952 = vmatpush.bf16.msra.mxu1 %v8393_v31  ;;  %v8478_v31 = vld [vmem:[%s10973_s3 + $0x2e8] sm:$0xff] }
  0x20   :  { %4965 = vmatpush.bf16.msra.mxu2 %v8401_v34  ;;  %v8469_v34 = vld [vmem:[%s10973_s3 + $0x2a0] sm:$0xff] }
  0x21   :  { %4978 = vmatpush.bf16.msra.mxu3 %v8409_v35  ;;  %4940 = vmatmul.bf16.vlgmr.msra.gmra.mxu0 %v1332_v43  ;;  %v8477_v35 = vld [vmem:[%s10973_s3 + $0x2e0] sm:$0xff]  ;;  %v8475_v43 = vld [vmem:[%s10973_s3 + $0x2d0] sm:$0xff] }
  0x22   :  { %4984 = vmatpush.bf16.msrb.mxu0 %v8424_v38  ;;  %4953 = vmatmul.bf16.vlgmr.msra.gmra.mxu1 %v1333_v45  ;;  %v8468_v38 = vld [vmem:[%s10973_s3 + $0x298] sm:$0xff]  ;;  %v8458_v45 = vld [vmem:[%s10973_s3 + $0x248] sm:$0xff] }
  0x23   :  { %4997 = vmatpush.bf16.msrb.mxu1 %v8432_v39  ;;  %4966 = vmatmul.bf16.vlgmr.msra.gmra.mxu2 %v1334_v42  ;;  %v8476_v39 = vld [vmem:[%s10973_s3 + $0x2d8] sm:$0xff]  ;;  %v8467_v42 = vld [vmem:[%s10973_s3 + $0x290] sm:$0xff] }
  0x24   :  { %5010 = vmatpush.bf16.msrb.mxu2 %v8440_v40  ;;  %4979 = vmatmul.bf16.vlgmr.msra.gmra.mxu3 %v1335_v44  ;;  %v8451_v40 = vld [vmem:[%s10973_s3 + $0x210] sm:$0xff]  ;;  %v8450_v44 = vld [vmem:[%s10973_s3 + $0x208] sm:$0xff] }
  0x25   :  { %5023 = vmatpush.bf16.msrb.mxu3 %v8448_v41  ;;  %v8459_v41 = vld [vmem:[%s10973_s3 + $0x250] sm:$0xff] }
  0x26   :  { %4985 = vmatpush.bf16.msrb.mxu0 %v8423_v46  ;;  %v8466_v46 = vld [vmem:[%s10973_s3 + $0x288] sm:$0xff] }
  0x27   :  { %4998 = vmatpush.bf16.msrb.mxu1 %v8431_v47  ;;  %v8474_v47 = vld [vmem:[%s10973_s3 + $0x2c8] sm:$0xff] }
  0x28   :  { %5011 = vmatpush.bf16.msrb.mxu2 %v8439_v48  ;;  %v36_v48 = vld [vmem:[%s10974_s2 + $0x20] sm:$0xff] }
  0x29   :  { %5024 = vmatpush.bf16.msrb.mxu3 %v8447_v49  ;;  %v37_v49 = vld [vmem:[%s10974_s2 + $0x28] sm:$0xff] }
  0x2a   :  { %4986 = vmatpush.bf16.msrb.mxu0 %v8422_v50  ;;  %v8449_v50 = vld [vmem:[%s10973_s3 + $0x200] sm:$0xff] }
  0x2b   :  { %4999 = vmatpush.bf16.msrb.mxu1 %v8430_v51  ;;  %v8457_v51 = vld [vmem:[%s10973_s3 + $0x240] sm:$0xff] }
  0x2c   :  { %5012 = vmatpush.bf16.msrb.mxu2 %v8438_v52  ;;  %v1268_v52 = vunpack.c.l.b16 %v36_v48 }
  0x2d   :  { %5025 = vmatpush.bf16.msrb.mxu3 %v8446_v53  ;;  %v1270_v53 = vunpack.c.l.b16 %v37_v49 }
  0x2e   :  { %4987 = vmatpush.bf16.msrb.mxu0 %v8421_v54  ;;  %v8465_v54 = vld [vmem:[%s10973_s3 + $0x280] sm:$0xff] }
  0x2f   :  { %5000 = vmatpush.bf16.msrb.mxu1 %v8429_v55  ;;  %v8473_v55 = vld [vmem:[%s10973_s3 + $0x2c0] sm:$0xff] }
  0x30   :  { %5013 = vmatpush.bf16.msrb.mxu2 %v8437_v56  ;;  %v1269_v56 = vunpack.c.h.b16 %v36_v48  ;;  %v8518_v48 = vld [vmem:[%s10973_s3 + $0x428] sm:$0xff] }
  0x31   :  { %5026 = vmatpush.bf16.msrb.mxu3 %v8445_v57  ;;  %v1271_v57 = vunpack.c.h.b16 %v37_v49  ;;  %v8526_v49 = vld [vmem:[%s10973_s3 + $0x468] sm:$0xff] }
  0x32   :  { %4988 = vmatpush.bf16.msrb.mxu0 %v8420_v58  ;;  %v8488_v58 = vld [vmem:[%s10973_s3 + $0x338] sm:$0xff] }
  0x33   :  { %5001 = vmatpush.bf16.msrb.mxu1 %v8428_v59  ;;  %v8496_v59 = vld [vmem:[%s10973_s3 + $0x378] sm:$0xff] }
  0x34   :  { %5014 = vmatpush.bf16.msrb.mxu2 %v8436_v60  ;;  %v8504_v60 = vld [vmem:[%s10973_s3 + $0x3b8] sm:$0xff] }
  0x35   :  { %5027 = vmatpush.bf16.msrb.mxu3 %v8444_v61  ;;  %v8512_v61 = vld [vmem:[%s10973_s3 + $0x3f8] sm:$0xff] }
  0x36   :  { %4989 = vmatpush.bf16.msrb.mxu0 %v8419_v62  ;;  %v1340_v62 = vpack.c.b16 %v1268_v52, %v1268_v52  ;;  %v8517_v52 = vld [vmem:[%s10973_s3 + $0x420] sm:$0xff] }
  0x37   :  { %5002 = vmatpush.bf16.msrb.mxu1 %v8427_v63  ;;  %v1342_v63 = vpack.c.b16 %v1270_v53, %v1270_v53  ;;  %v8525_v53 = vld [vmem:[%s10973_s3 + $0x460] sm:$0xff] }
  0x38   :  { %5015 = vmatpush.bf16.msrb.mxu2 %v8435_v0  ;;  %v1341_v0 = vpack.c.b16 %v1269_v56, %v1269_v56  ;;  %v8516_v56 = vld [vmem:[%s10973_s3 + $0x418] sm:$0xff] }
  0x39   :  { %5028 = vmatpush.bf16.msrb.mxu3 %v8443_v1  ;;  %v1343_v1 = vpack.c.b16 %v1271_v57, %v1271_v57  ;;  %v8524_v57 = vld [vmem:[%s10973_s3 + $0x458] sm:$0xff] }
  0x3a   :  { %4990 = vmatpush.bf16.msrb.mxu0 %v8418_v2  ;;  %v8487_v2 = vld [vmem:[%s10973_s3 + $0x330] sm:$0xff] }
  0x3b   :  { %5003 = vmatpush.bf16.msrb.mxu1 %v8426_v3  ;;  %v8495_v3 = vld [vmem:[%s10973_s3 + $0x370] sm:$0xff] }
  0x3c   :  { %5016 = vmatpush.bf16.msrb.mxu2 %v8434_v4  ;;  %v8503_v4 = vld [vmem:[%s10973_s3 + $0x3b0] sm:$0xff] }
  0x3d   :  { %5029 = vmatpush.bf16.msrb.mxu3 %v8442_v5  ;;  %v8511_v5 = vld [vmem:[%s10973_s3 + $0x3f0] sm:$0xff] }
  0x3e   :  { %4991 = vmatpush.bf16.msrb.mxu0 %v8417_v8  ;;  %v8502_v8 = vld [vmem:[%s10973_s3 + $0x3a8] sm:$0xff] }
  0x3f   :  { %5004 = vmatpush.bf16.msrb.mxu1 %v8425_v9  ;;  %v8510_v9 = vld [vmem:[%s10973_s3 + $0x3e8] sm:$0xff] }
  0x40   :  { %5017 = vmatpush.bf16.msrb.mxu2 %v8433_v12  ;;  %v8501_v12 = vld [vmem:[%s10973_s3 + $0x3a0] sm:$0xff] }
  0x41   :  { %5030 = vmatpush.bf16.msrb.mxu3 %v8441_v13  ;;  %4992 = vmatmul.bf16.vlgmr.msrb.gmra.mxu0 %v1336_v21  ;;  %v8509_v13 = vld [vmem:[%s10973_s3 + $0x3e0] sm:$0xff]  ;;  %v8507_v21 = vld [vmem:[%s10973_s3 + $0x3d0] sm:$0xff] }
  0x42   :  { %5036 = vmatpush.bf16.msra.mxu0 %v8456_v16  ;;  %5005 = vmatmul.bf16.vlgmr.msrb.gmra.mxu1 %v1337_v23  ;;  %v8500_v16 = vld [vmem:[%s10973_s3 + $0x398] sm:$0xff]  ;;  %v8490_v23 = vld [vmem:[%s10973_s3 + $0x348] sm:$0xff] }
  0x43   :  { %5049 = vmatpush.bf16.msra.mxu1 %v8464_v17  ;;  %5018 = vmatmul.bf16.vlgmr.msrb.gmra.mxu2 %v1338_v20  ;;  %v8508_v17 = vld [vmem:[%s10973_s3 + $0x3d8] sm:$0xff]  ;;  %v8499_v20 = vld [vmem:[%s10973_s3 + $0x390] sm:$0xff] }
  0x44   :  { %5062 = vmatpush.bf16.msra.mxu2 %v8472_v18  ;;  %5031 = vmatmul.bf16.vlgmr.msrb.gmra.mxu3 %v1339_v22  ;;  %v8483_v18 = vld [vmem:[%s10973_s3 + $0x310] sm:$0xff]  ;;  %v8482_v22 = vld [vmem:[%s10973_s3 + $0x308] sm:$0xff] }
  0x45   :  { %5075 = vmatpush.bf16.msra.mxu3 %v8480_v19  ;;  %v8491_v19 = vld [vmem:[%s10973_s3 + $0x350] sm:$0xff] }
  0x46   :  { %5037 = vmatpush.bf16.msra.mxu0 %v8455_v24  ;;  %v8498_v24 = vld [vmem:[%s10973_s3 + $0x388] sm:$0xff] }
  0x47   :  { %5050 = vmatpush.bf16.msra.mxu1 %v8463_v25  ;;  %v8506_v25 = vld [vmem:[%s10973_s3 + $0x3c8] sm:$0xff] }
  0x48   :  { %5063 = vmatpush.bf16.msra.mxu2 %v8471_v26  ;;  %v38_v26 = vld [vmem:[%s10974_s2 + $0x30] sm:$0xff] }
  0x49   :  { %5076 = vmatpush.bf16.msra.mxu3 %v8479_v27  ;;  %v39_v27 = vld [vmem:[%s10974_s2 + $0x38] sm:$0xff] }
  0x4a   :  { %5038 = vmatpush.bf16.msra.mxu0 %v8454_v28  ;;  %v8481_v28 = vld [vmem:[%s10973_s3 + $0x300] sm:$0xff] }
  0x4b   :  { %5051 = vmatpush.bf16.msra.mxu1 %v8462_v29  ;;  %v8489_v29 = vld [vmem:[%s10973_s3 + $0x340] sm:$0xff] }
  0x4c   :  { %5064 = vmatpush.bf16.msra.mxu2 %v8470_v30  ;;  %v1272_v30 = vunpack.c.l.b16 %v38_v26 }
  0x4d   :  { %5077 = vmatpush.bf16.msra.mxu3 %v8478_v31  ;;  %v1274_v31 = vunpack.c.l.b16 %v39_v27 }
  0x4e   :  { %5039 = vmatpush.bf16.msra.mxu0 %v8453_v32  ;;  %v8497_v32 = vld [vmem:[%s10973_s3 + $0x380] sm:$0xff] }
  0x4f   :  { %5052 = vmatpush.bf16.msra.mxu1 %v8461_v33  ;;  %v8505_v33 = vld [vmem:[%s10973_s3 + $0x3c0] sm:$0xff] }
  0x50   :  { %5065 = vmatpush.bf16.msra.mxu2 %v8469_v34  ;;  %v1273_v34 = vunpack.c.h.b16 %v38_v26  ;;  %v8550_v26 = vld [vmem:[%s10973_s3 + $0x528] sm:$0xff] }
  0x51   :  { %5078 = vmatpush.bf16.msra.mxu3 %v8477_v35  ;;  %v1275_v35 = vunpack.c.h.b16 %v39_v27  ;;  %v8558_v27 = vld [vmem:[%s10973_s3 + $0x568] sm:$0xff] }
  0x52   :  { %5040 = vmatpush.bf16.msra.mxu0 %v8452_v36  ;;  %v8520_v36 = vld [vmem:[%s10973_s3 + $0x438] sm:$0xff] }
  0x53   :  { %5053 = vmatpush.bf16.msra.mxu1 %v8460_v37  ;;  %v8528_v37 = vld [vmem:[%s10973_s3 + $0x478] sm:$0xff] }
  0x54   :  { %5066 = vmatpush.bf16.msra.mxu2 %v8468_v38  ;;  %v8536_v38 = vld [vmem:[%s10973_s3 + $0x4b8] sm:$0xff] }
  0x55   :  { %5079 = vmatpush.bf16.msra.mxu3 %v8476_v39  ;;  %v8544_v39 = vld [vmem:[%s10973_s3 + $0x4f8] sm:$0xff] }
  0x56   :  { %5041 = vmatpush.bf16.msra.mxu0 %v8451_v40  ;;  %v1344_v40 = vpack.c.b16 %v1272_v30, %v1272_v30  ;;  %v8574_v30 = vld [vmem:[%s10973_s3 + $0x5e8] sm:$0xff] }
  0x57   :  { %5054 = vmatpush.bf16.msra.mxu1 %v8459_v41  ;;  %v1346_v41 = vpack.c.b16 %v1274_v31, %v1274_v31 }
  0x58   :  { %5067 = vmatpush.bf16.msra.mxu2 %v8467_v42  ;;  %v1345_v42 = vpack.c.b16 %v1273_v34, %v1273_v34 }
  0x59   :  { %5080 = vmatpush.bf16.msra.mxu3 %v8475_v43  ;;  %v1347_v43 = vpack.c.b16 %v1275_v35, %v1275_v35 }
  0x5a   :  { %5042 = vmatpush.bf16.msra.mxu0 %v8450_v44  ;;  %v8519_v44 = vld [vmem:[%s10973_s3 + $0x430] sm:$0xff] }
  0x5b   :  { %5055 = vmatpush.bf16.msra.mxu1 %v8458_v45  ;;  %v8527_v45 = vld [vmem:[%s10973_s3 + $0x470] sm:$0xff] }
  0x5c   :  { %5068 = vmatpush.bf16.msra.mxu2 %v8466_v46  ;;  %v8535_v46 = vld [vmem:[%s10973_s3 + $0x4b0] sm:$0xff] }
  0x5d   :  { %5081 = vmatpush.bf16.msra.mxu3 %v8474_v47  ;;  %v8543_v47 = vld [vmem:[%s10973_s3 + $0x4f0] sm:$0xff] }
  0x5e   :  { %5043 = vmatpush.bf16.msra.mxu0 %v8449_v50  ;;  %v8534_v50 = vld [vmem:[%s10973_s3 + $0x4a8] sm:$0xff] }
  0x5f   :  { %5056 = vmatpush.bf16.msra.mxu1 %v8457_v51  ;;  %v8542_v51 = vld [vmem:[%s10973_s3 + $0x4e8] sm:$0xff] }
  0x60   :  { %5069 = vmatpush.bf16.msra.mxu2 %v8465_v54  ;;  %v8533_v54 = vld [vmem:[%s10973_s3 + $0x4a0] sm:$0xff] }
  0x61   :  { %5082 = vmatpush.bf16.msra.mxu3 %v8473_v55  ;;  %5044 = vmatmul.bf16.vlgmr.msra.gmra.mxu0 %v1340_v62  ;;  %v8541_v55 = vld [vmem:[%s10973_s3 + $0x4e0] sm:$0xff]  ;;  %v8531_v62 = vld [vmem:[%s10973_s3 + $0x490] sm:$0xff] }
  0x62   :  { %5088 = vmatpush.bf16.msrb.mxu0 %v8488_v58  ;;  %5057 = vmatmul.bf16.vlgmr.msra.gmra.mxu1 %v1341_v0  ;;  %v8532_v58 = vld [vmem:[%s10973_s3 + $0x498] sm:$0xff]  ;;  %v8514_v0 = vld [vmem:[%s10973_s3 + $0x408] sm:$0xff] }
  0x63   :  { %5101 = vmatpush.bf16.msrb.mxu1 %v8496_v59  ;;  %5070 = vmatmul.bf16.vlgmr.msra.gmra.mxu2 %v1342_v63  ;;  %v8540_v59 = vld [vmem:[%s10973_s3 + $0x4d8] sm:$0xff]  ;;  %v8539_v63 = vld [vmem:[%s10973_s3 + $0x4d0] sm:$0xff] }
  0x64   :  { %5114 = vmatpush.bf16.msrb.mxu2 %v8504_v60  ;;  %5083 = vmatmul.bf16.vlgmr.msra.gmra.mxu3 %v1343_v1  ;;  %v8515_v60 = vld [vmem:[%s10973_s3 + $0x410] sm:$0xff]  ;;  %v8522_v1 = vld [vmem:[%s10973_s3 + $0x448] sm:$0xff] }
  0x65   :  { %5127 = vmatpush.bf16.msrb.mxu3 %v8512_v61  ;;  %v8523_v61 = vld [vmem:[%s10973_s3 + $0x450] sm:$0xff] }
  0x66   :  { %5089 = vmatpush.bf16.msrb.mxu0 %v8487_v2  ;;  %v8530_v2 = vld [vmem:[%s10973_s3 + $0x488] sm:$0xff] }
  0x67   :  { %5102 = vmatpush.bf16.msrb.mxu1 %v8495_v3  ;;  %v8538_v3 = vld [vmem:[%s10973_s3 + $0x4c8] sm:$0xff] }
  0x68   :  { %5115 = vmatpush.bf16.msrb.mxu2 %v8503_v4  ;;  %v40_v4 = vld [vmem:[%s10974_s2 + $0x40] sm:$0xff] }
  0x69   :  { %5128 = vmatpush.bf16.msrb.mxu3 %v8511_v5  ;;  %v41_v5 = vld [vmem:[%s10974_s2 + $0x48] sm:$0xff] }
  0x6a   :  { %5090 = vmatpush.bf16.msrb.mxu0 %v8486_v6  ;;  %v8513_v6 = vld [vmem:[%s10973_s3 + $0x400] sm:$0xff] }
  0x6b   :  { %5103 = vmatpush.bf16.msrb.mxu1 %v8494_v7  ;;  %v8521_v7 = vld [vmem:[%s10973_s3 + $0x440] sm:$0xff] }
  0x6c   :  { %5116 = vmatpush.bf16.msrb.mxu2 %v8502_v8  ;;  %v1276_v8 = vunpack.c.l.b16 %v40_v4 }
  0x6d   :  { %5129 = vmatpush.bf16.msrb.mxu3 %v8510_v9  ;;  %v1278_v9 = vunpack.c.l.b16 %v41_v5 }
  0x6e   :  { %5091 = vmatpush.bf16.msrb.mxu0 %v8485_v10  ;;  %v8529_v10 = vld [vmem:[%s10973_s3 + $0x480] sm:$0xff] }
  0x6f   :  { %5104 = vmatpush.bf16.msrb.mxu1 %v8493_v11  ;;  %v8537_v11 = vld [vmem:[%s10973_s3 + $0x4c0] sm:$0xff] }
  0x70   :  { %5117 = vmatpush.bf16.msrb.mxu2 %v8501_v12  ;;  %v1277_v12 = vunpack.c.h.b16 %v40_v4 }
  0x71   :  { %5130 = vmatpush.bf16.msrb.mxu3 %v8509_v13  ;;  %v1279_v13 = vunpack.c.h.b16 %v41_v5  ;;  %v8584_v5 = vld [vmem:[%s10973_s3 + $0x638] sm:$0xff] }
  0x72   :  { %5092 = vmatpush.bf16.msrb.mxu0 %v8484_v14  ;;  %v8552_v14 = vld [vmem:[%s10973_s3 + $0x538] sm:$0xff] }
  0x73   :  { %5105 = vmatpush.bf16.msrb.mxu1 %v8492_v15  ;;  %v8560_v15 = vld [vmem:[%s10973_s3 + $0x578] sm:$0xff] }
  0x74   :  { %5118 = vmatpush.bf16.msrb.mxu2 %v8500_v16  ;;  %v8568_v16 = vld [vmem:[%s10973_s3 + $0x5b8] sm:$0xff] }
  0x75   :  { %5131 = vmatpush.bf16.msrb.mxu3 %v8508_v17  ;;  %v8576_v17 = vld [vmem:[%s10973_s3 + $0x5f8] sm:$0xff] }
  0x76   :  { %5093 = vmatpush.bf16.msrb.mxu0 %v8483_v18  ;;  %v1348_v18 = vpack.c.b16 %v1276_v8, %v1276_v8  ;;  %v8608_v8 = vld [vmem:[%s10973_s3 + $0x6f8] sm:$0xff] }
  0x77   :  { %5106 = vmatpush.bf16.msrb.mxu1 %v8491_v19  ;;  %v1350_v19 = vpack.c.b16 %v1278_v9, %v1278_v9 }
  0x78   :  { %5119 = vmatpush.bf16.msrb.mxu2 %v8499_v20  ;;  %v1349_v20 = vpack.c.b16 %v1277_v12, %v1277_v12 }
  0x79   :  { %5132 = vmatpush.bf16.msrb.mxu3 %v8507_v21  ;;  %v1351_v21 = vpack.c.b16 %v1279_v13, %v1279_v13  ;;  %v8583_v13 = vld [vmem:[%s10973_s3 + $0x630] sm:$0xff] }
  0x7a   :  { %5094 = vmatpush.bf16.msrb.mxu0 %v8482_v22  ;;  %v8551_v22 = vld [vmem:[%s10973_s3 + $0x530] sm:$0xff] }
  0x7b   :  { %5107 = vmatpush.bf16.msrb.mxu1 %v8490_v23  ;;  %v8559_v23 = vld [vmem:[%s10973_s3 + $0x570] sm:$0xff] }
  0x7c   :  { %5120 = vmatpush.bf16.msrb.mxu2 %v8498_v24  ;;  %v8567_v24 = vld [vmem:[%s10973_s3 + $0x5b0] sm:$0xff] }
  0x7d   :  { %5133 = vmatpush.bf16.msrb.mxu3 %v8506_v25  ;;  %v8575_v25 = vld [vmem:[%s10973_s3 + $0x5f0] sm:$0xff] }
  0x7e   :  { %5095 = vmatpush.bf16.msrb.mxu0 %v8481_v28  ;;  %v8964_v28 = vld [vmem:[%s10975_s4] ss:$0 sm:$0xff] }
  0x7f   :  { %5108 = vmatpush.bf16.msrb.mxu1 %v8489_v29  ;;  %v8566_v29 = vld [vmem:[%s10973_s3 + $0x5a8] sm:$0xff] }
  0x80   :  { %5121 = vmatpush.bf16.msrb.mxu2 %v8497_v32  ;;  %v8549_v32 = vld [vmem:[%s10973_s3 + $0x520] sm:$0xff] }
  0x81   :  { %5134 = vmatpush.bf16.msrb.mxu3 %v8505_v33  ;;  %5096 = vmatmul.bf16.vlgmr.msrb.gmra.mxu0 %v1344_v40  ;;  %v8557_v33 = vld [vmem:[%s10973_s3 + $0x560] sm:$0xff]  ;;  %v8556_v40 = vld [vmem:[%s10973_s3 + $0x558] sm:$0xff] }
  0x82   :  { %5140 = vmatpush.bf16.msra.mxu0 %v8520_v36  ;;  %5109 = vmatmul.bf16.vlgmr.msrb.gmra.mxu1 %v1345_v42  ;;  %v8565_v36 = vld [vmem:[%s10973_s3 + $0x5a0] sm:$0xff]  ;;  %v8572_v42 = vld [vmem:[%s10973_s3 + $0x5d8] sm:$0xff] }
  0x83   :  { %5153 = vmatpush.bf16.msra.mxu1 %v8528_v37  ;;  %5122 = vmatmul.bf16.vlgmr.msrb.gmra.mxu2 %v1346_v41  ;;  %v8573_v37 = vld [vmem:[%s10973_s3 + $0x5e0] sm:$0xff]  ;;  %v8564_v41 = vld [vmem:[%s10973_s3 + $0x598] sm:$0xff] }
  0x84   :  { %5166 = vmatpush.bf16.msra.mxu2 %v8536_v38  ;;  %5135 = vmatmul.bf16.vlgmr.msrb.gmra.mxu3 %v1347_v43 }
  0x85   :  { %5179 = vmatpush.bf16.msra.mxu3 %v8544_v39  ;;  %v8548_v39 = vld [vmem:[%s10973_s3 + $0x518] sm:$0xff] }
  0x86   :  { %5141 = vmatpush.bf16.msra.mxu0 %v8519_v44 }
  0x87   :  { %5154 = vmatpush.bf16.msra.mxu1 %v8527_v45 }
  0x88   :  { %5167 = vmatpush.bf16.msra.mxu2 %v8535_v46 }
  0x89   :  { %5180 = vmatpush.bf16.msra.mxu3 %v8543_v47  ;;  %v8547_v47 = vld [vmem:[%s10973_s3 + $0x510] sm:$0xff] }
  0x8a   :  { %5142 = vmatpush.bf16.msra.mxu0 %v8518_v48  ;;  %v8555_v48 = vld [vmem:[%s10973_s3 + $0x550] sm:$0xff] }
  0x8b   :  { %5155 = vmatpush.bf16.msra.mxu1 %v8526_v49 }
  0x8c   :  { %5168 = vmatpush.bf16.msra.mxu2 %v8534_v50 }
  0x8d   :  { %5181 = vmatpush.bf16.msra.mxu3 %v8542_v51  ;;  %v8563_v51 = vld [vmem:[%s10973_s3 + $0x590] sm:$0xff] }
  0x8e   :  { %5143 = vmatpush.bf16.msra.mxu0 %v8517_v52  ;;  %v8571_v52 = vld [vmem:[%s10973_s3 + $0x5d0] sm:$0xff] }
  0x8f   :  { %5156 = vmatpush.bf16.msra.mxu1 %v8525_v53  ;;  %v8546_v53 = vld [vmem:[%s10973_s3 + $0x508] sm:$0xff] }
  0x90   :  { %5169 = vmatpush.bf16.msra.mxu2 %v8533_v54  ;;  %v8554_v54 = vld [vmem:[%s10973_s3 + $0x548] sm:$0xff] }
  0x91   :  { %5182 = vmatpush.bf16.msra.mxu3 %v8541_v55  ;;  %v8562_v55 = vld [vmem:[%s10973_s3 + $0x588] sm:$0xff] }
  0x92   :  { %5144 = vmatpush.bf16.msra.mxu0 %v8516_v56  ;;  %v8570_v56 = vld [vmem:[%s10973_s3 + $0x5c8] sm:$0xff] }
  0x93   :  { %5157 = vmatpush.bf16.msra.mxu1 %v8524_v57  ;;  %v42_v57 = vld [vmem:[%s10974_s2 + $0x50] sm:$0xff] }
  0x94   :  { %5170 = vmatpush.bf16.msra.mxu2 %v8532_v58  ;;  %v43_v58 = vld [vmem:[%s10974_s2 + $0x58] sm:$0xff] }
  0x95   :  { %5183 = vmatpush.bf16.msra.mxu3 %v8540_v59  ;;  %v1283_v4 = vunpack.c.h.b16 %v43_v58 }
  0x96   :  { %5145 = vmatpush.bf16.msra.mxu0 %v8515_v60 }
  0x97   :  { %5158 = vmatpush.bf16.msra.mxu1 %v8523_v61  ;;  %v8545_v61 = vld [vmem:[%s10973_s3 + $0x500] sm:$0xff]  ;;  %v1355_v12 = vpack.c.b16 %v1283_v4, %v1283_v4  ;;  %v8623_v4 = vld [vmem:[%s10973_s3 + $0x770] sm:$0xff] }
  0x98   :  { %5171 = vmatpush.bf16.msra.mxu2 %v8531_v62  ;;  %v8553_v62 = vld [vmem:[%s10973_s3 + $0x540] sm:$0xff] }
  0x99   :  { %5184 = vmatpush.bf16.msra.mxu3 %v8539_v63  ;;  %v1280_v63 = vunpack.c.l.b16 %v42_v57 }
  0x9a   :  { %5146 = vmatpush.bf16.msra.mxu0 %v8514_v0  ;;  %v1282_v0 = vunpack.c.l.b16 %v43_v58 }
  0x9b   :  { %5159 = vmatpush.bf16.msra.mxu1 %v8522_v1  ;;  %v8561_v1 = vld [vmem:[%s10973_s3 + $0x580] sm:$0xff]  ;;  %v1352_v9 = vpack.c.b16 %v1280_v63, %v1280_v63 }
  0x9c   :  { %5172 = vmatpush.bf16.msra.mxu2 %v8530_v2  ;;  %v8569_v2 = vld [vmem:[%s10973_s3 + $0x5c0] sm:$0xff] }
  0x9d   :  { %5185 = vmatpush.bf16.msra.mxu3 %v8538_v3  ;;  %v1281_v3 = vunpack.c.h.b16 %v42_v57 }
  0x9e   :  { %5147 = vmatpush.bf16.msra.mxu0 %v8513_v6  ;;  %v4941_v31 = vpop.f32.mrf.mxu0  ;;  %v8592_v6 = vld [vmem:[%s10973_s3 + $0x678] sm:$0xff] }
  0x9f   :  { %5160 = vmatpush.bf16.msra.mxu1 %v8521_v7  ;;  %v4942_v34 = vadd.f32 %v8964_v28, %v4941_v31  ;;  %v4954_v35 = vpop.f32.mrf.mxu1  ;;  %v8600_v7 = vld [vmem:[%s10973_s3 + $0x6b8] sm:$0xff] }
  0xa0   :  { %5173 = vmatpush.bf16.msra.mxu2 %v8529_v10  ;;  %v1354_v10 = vpack.c.b16 %v1282_v0, %v1282_v0  ;;  %v8596_v31 = vld [vmem:[%s10973_s3 + $0x698] sm:$0xff] }
  0xa1   :  { %5186 = vmatpush.bf16.msra.mxu3 %v8537_v11  ;;  %5148 = vmatmul.bf16.vlgmr.msra.gmra.mxu0 %v1348_v18  ;;  %v4955_v38 = vadd.f32 %v4954_v35, %v4942_v34  ;;  %v1353_v11 = vpack.c.b16 %v1281_v3, %v1281_v3  ;;  %v8590_v18 = vld [vmem:[%s10973_s3 + $0x668] sm:$0xff]  ;;  %v8615_v3 = vld [vmem:[%s10973_s3 + $0x730] sm:$0xff] }
  0xa2   :  { %5192 = vmatpush.bf16.msrb.mxu0 %v8552_v14  ;;  %5161 = vmatmul.bf16.vlgmr.msra.gmra.mxu1 %v1349_v20  ;;  %v8591_v14 = vld [vmem:[%s10973_s3 + $0x670] sm:$0xff]  ;;  %v8606_v20 = vld [vmem:[%s10973_s3 + $0x6e8] sm:$0xff] }
  0xa3   :  { %5205 = vmatpush.bf16.msrb.mxu1 %v8560_v15  ;;  %5174 = vmatmul.bf16.vlgmr.msra.gmra.mxu2 %v1350_v19  ;;  %v8599_v15 = vld [vmem:[%s10973_s3 + $0x6b0] sm:$0xff]  ;;  %v8598_v19 = vld [vmem:[%s10973_s3 + $0x6a8] sm:$0xff] }
  0xa4   :  { %5218 = vmatpush.bf16.msrb.mxu2 %v8568_v16  ;;  %5187 = vmatmul.bf16.vlgmr.msra.gmra.mxu3 %v1351_v21  ;;  %v8607_v16 = vld [vmem:[%s10973_s3 + $0x6f0] sm:$0xff] }
  0xa5   :  { %5231 = vmatpush.bf16.msrb.mxu3 %v8576_v17  ;;  %v8582_v17 = vld [vmem:[%s10973_s3 + $0x628] sm:$0xff] }
  0xa6   :  { %5193 = vmatpush.bf16.msrb.mxu0 %v8551_v22  ;;  %v4967_v43 = vpop.f32.mrf.mxu2  ;;  %v4943_v46 = vpop.f32.mrf.mxu0  ;;  %v8581_v22 = vld [vmem:[%s10973_s3 + $0x620] sm:$0xff] }
  0xa7   :  { %5206 = vmatpush.bf16.msrb.mxu1 %v8559_v23  ;;  %v4968_v44 = vadd.f32 %v4967_v43, %v4955_v38  ;;  %v4980_v45 = vpop.f32.mrf.mxu3  ;;  %v4956_v50 = vpop.f32.mrf.mxu1  ;;  %v8589_v23 = vld [vmem:[%s10973_s3 + $0x660] sm:$0xff]  ;;  %v8587_v38 = vld [vmem:[%s10973_s3 + $0x650] sm:$0xff]  ;;  %v8578_v43 = vld [vmem:[%s10973_s3 + $0x608] sm:$0xff] }
  0xa8   :  { %5219 = vmatpush.bf16.msrb.mxu2 %v8567_v24  ;;  %v8602_v46 = vld [vmem:[%s10973_s3 + $0x6c8] sm:$0xff] }
  0xa9   :  { %5232 = vmatpush.bf16.msrb.mxu3 %v8575_v25  ;;  %v9611_v49 = vadd.f32 %v4980_v45, %v4968_v44  ;;  %v8586_v44 = vld [vmem:[%s10973_s3 + $0x648] sm:$0xff] }
  0xaa   :  { %5194 = vmatpush.bf16.msrb.mxu0 %v8550_v26  ;;  %v8597_v26 = vld [vmem:[%s10973_s3 + $0x6a0] sm:$0xff]  ;;  %v8594_v45 = vld [vmem:[%s10973_s3 + $0x688] sm:$0xff] }
  0xab   :  { %5207 = vmatpush.bf16.msrb.mxu1 %v8558_v27  ;;  %v8605_v27 = vld [vmem:[%s10973_s3 + $0x6e0] sm:$0xff] }
  0xac   :  { %5220 = vmatpush.bf16.msrb.mxu2 %v8566_v29  ;;  %v8580_v29 = vld [vmem:[%s10973_s3 + $0x618] sm:$0xff] }
  0xad   :  { %5233 = vmatpush.bf16.msrb.mxu3 %v8574_v30  ;;  %v8588_v30 = vld [vmem:[%s10973_s3 + $0x658] sm:$0xff] }
  0xae   :  { %5195 = vmatpush.bf16.msrb.mxu0 %v8549_v32  ;;  %v4969_v59 = vpop.f32.mrf.mxu2  ;;  %v8604_v32 = vld [vmem:[%s10973_s3 + $0x6d8] sm:$0xff] }
  0xaf   :  { %5208 = vmatpush.bf16.msrb.mxu1 %v8557_v33  ;;  %v4982_v60 = vpop.f32.mrf.mxu3  ;;  %v8616_v59 = vld [vmem:[%s10973_s3 + $0x738] sm:$0xff] }
  0xb0   :  { %5221 = vmatpush.bf16.msrb.mxu2 %v8565_v36  ;;  %v8624_v60 = vld [vmem:[%s10973_s3 + $0x778] sm:$0xff] }
  0xb1   :  { %5234 = vmatpush.bf16.msrb.mxu3 %v8573_v37  ;;  %v8579_v37 = vld [vmem:[%s10973_s3 + $0x610] sm:$0xff] }
  0xb2   :  { %5196 = vmatpush.bf16.msrb.mxu0 %v8548_v39 }
  0xb3   :  { %5209 = vmatpush.bf16.msrb.mxu1 %v8556_v40 }
  0xb4   :  { %5222 = vmatpush.bf16.msrb.mxu2 %v8564_v41  ;;  %v8595_v41 = vld [vmem:[%s10973_s3 + $0x690] sm:$0xff] }
  0xb5   :  { %5235 = vmatpush.bf16.msrb.mxu3 %v8572_v42  ;;  %v8603_v42 = vld [vmem:[%s10973_s3 + $0x6d0] sm:$0xff] }
  0xb6   :  { %5197 = vmatpush.bf16.msrb.mxu0 %v8547_v47  ;;  %v44_v47 = vld [vmem:[%s10974_s2 + $0x60] sm:$0xff] }
  0xb7   :  { %5210 = vmatpush.bf16.msrb.mxu1 %v8555_v48  ;;  %v45_v48 = vld [vmem:[%s10974_s2 + $0x68] sm:$0xff]  ;;  %v1285_v57 = vunpack.c.h.b16 %v44_v47 }
  0xb8   :  { %5223 = vmatpush.bf16.msrb.mxu2 %v8563_v51  ;;  %v8577_v51 = vld [vmem:[%s10973_s3 + $0x600] sm:$0xff]  ;;  %v1287_v58 = vunpack.c.h.b16 %v45_v48 }
  0xb9   :  { %5236 = vmatpush.bf16.msrb.mxu3 %v8571_v52  ;;  %v8585_v52 = vld [vmem:[%s10973_s3 + $0x640] sm:$0xff] }
  0xba   :  { %5198 = vmatpush.bf16.msrb.mxu0 %v8546_v53  ;;  %v1284_v53 = vunpack.c.l.b16 %v44_v47 }
  0xbb   :  { %5211 = vmatpush.bf16.msrb.mxu1 %v8554_v54  ;;  %v1286_v54 = vunpack.c.l.b16 %v45_v48 }
  0xbc   :  { %5224 = vmatpush.bf16.msrb.mxu2 %v8562_v55  ;;  %v8593_v55 = vld [vmem:[%s10973_s3 + $0x680] sm:$0xff]  ;;  %v1356_v63 = vpack.c.b16 %v1284_v53, %v1284_v53 }
  0xbd   :  { %5237 = vmatpush.bf16.msrb.mxu3 %v8570_v56  ;;  %v8601_v56 = vld [vmem:[%s10973_s3 + $0x6c0] sm:$0xff]  ;;  %v1358_v0 = vpack.c.b16 %v1286_v54, %v1286_v54 }
  0xbe   :  { %5199 = vmatpush.bf16.msrb.mxu0 %v8545_v61  ;;  %v4993_v21 = vpop.f32.mrf.mxu0  ;;  %v8632_v61 = vld [vmem:[%s10973_s3 + $0x7b8] sm:$0xff] }
  0xbf   :  { %5212 = vmatpush.bf16.msrb.mxu1 %v8553_v62  ;;  %v4994_v24 = vadd.f32 %v4993_v21, %v9611_v49  ;;  %v5006_v25 = vpop.f32.mrf.mxu1  ;;  %v8640_v62 = vld [vmem:[%s10973_s3 + $0x7f8] sm:$0xff] }
  0xc0   :  { %5225 = vmatpush.bf16.msrb.mxu2 %v8561_v1  ;;  %v1357_v1 = vpack.c.b16 %v1285_v57, %v1285_v57  ;;  %v8628_v21 = vld [vmem:[%s10973_s3 + $0x798] sm:$0xff]  ;;  %v8647_v57 = vld [vmem:[%s10973_s3 + $0x830] sm:$0xff] }
  0xc1   :  { %5238 = vmatpush.bf16.msrb.mxu3 %v8569_v2  ;;  %5200 = vmatmul.bf16.vlgmr.msrb.gmra.mxu0 %v1352_v9  ;;  %v5007_v28 = vadd.f32 %v5006_v25, %v4994_v24  ;;  %v1359_v2 = vpack.c.b16 %v1287_v58, %v1287_v58  ;;  %v8630_v9 = vld [vmem:[%s10973_s3 + $0x7a8] sm:$0xff]  ;;  %v8655_v58 = vld [vmem:[%s10973_s3 + $0x870] sm:$0xff] }
  0xc2   :  { %5244 = vmatpush.bf16.msra.mxu0 %v8584_v5  ;;  %5213 = vmatmul.bf16.vlgmr.msrb.gmra.mxu1 %v1353_v11  ;;  %v8631_v5 = vld [vmem:[%s10973_s3 + $0x7b0] sm:$0xff] }
  0xc3   :  { %5257 = vmatpush.bf16.msra.mxu1 %v8592_v6  ;;  %5226 = vmatmul.bf16.vlgmr.msrb.gmra.mxu2 %v1354_v10  ;;  %v8639_v6 = vld [vmem:[%s10973_s3 + $0x7f0] sm:$0xff]  ;;  %v8638_v10 = vld [vmem:[%s10973_s3 + $0x7e8] sm:$0xff] }
  0xc4   :  { %5270 = vmatpush.bf16.msra.mxu2 %v8600_v7  ;;  %5239 = vmatmul.bf16.vlgmr.msrb.gmra.mxu3 %v1355_v12  ;;  %v8614_v7 = vld [vmem:[%s10973_s3 + $0x728] sm:$0xff] }
  0xc5   :  { %5283 = vmatpush.bf16.msra.mxu3 %v8608_v8  ;;  %v8622_v8 = vld [vmem:[%s10973_s3 + $0x768] sm:$0xff] }
  0xc6   :  { %5245 = vmatpush.bf16.msra.mxu0 %v8583_v13  ;;  %v5019_v33 = vpop.f32.mrf.mxu2  ;;  %v4995_v36 = vpop.f32.mrf.mxu0  ;;  %v8613_v13 = vld [vmem:[%s10973_s3 + $0x720] sm:$0xff] }
  0xc7   :  { %5258 = vmatpush.bf16.msra.mxu1 %v8591_v14  ;;  %v5020_v34 = vadd.f32 %v5019_v33, %v5007_v28  ;;  %v5032_v35 = vpop.f32.mrf.mxu3  ;;  %v5008_v40 = vpop.f32.mrf.mxu1  ;;  %v8621_v14 = vld [vmem:[%s10973_s3 + $0x760] sm:$0xff]  ;;  %v8611_v28 = vld [vmem:[%s10973_s3 + $0x710] sm:$0xff]  ;;  %v8610_v33 = vld [vmem:[%s10973_s3 + $0x708] sm:$0xff] }
  0xc8   :  { %5271 = vmatpush.bf16.msra.mxu2 %v8599_v15  ;;  %v8634_v36 = vld [vmem:[%s10973_s3 + $0x7c8] sm:$0xff] }
  0xc9   :  { %5284 = vmatpush.bf16.msra.mxu3 %v8607_v16  ;;  %v9716_v39 = vadd.f32 %v5032_v35, %v5020_v34  ;;  %v8629_v16 = vld [vmem:[%s10973_s3 + $0x7a0] sm:$0xff]  ;;  %v8618_v34 = vld [vmem:[%s10973_s3 + $0x748] sm:$0xff] }
  0xca   :  { %5246 = vmatpush.bf16.msra.mxu0 %v8582_v17  ;;  %v8637_v17 = vld [vmem:[%s10973_s3 + $0x7e0] sm:$0xff]  ;;  %v8626_v35 = vld [vmem:[%s10973_s3 + $0x788] sm:$0xff] }
  0xcb   :  { %5259 = vmatpush.bf16.msra.mxu1 %v8590_v18 }
  0xcc   :  { %5272 = vmatpush.bf16.msra.mxu2 %v8598_v19  ;;  %v8612_v19 = vld [vmem:[%s10973_s3 + $0x718] sm:$0xff] }
  0xcd   :  { %5285 = vmatpush.bf16.msra.mxu3 %v8606_v20  ;;  %v8620_v20 = vld [vmem:[%s10973_s3 + $0x758] sm:$0xff] }
  0xce   :  { %5247 = vmatpush.bf16.msra.mxu0 %v8581_v22  ;;  %v5021_v49 = vpop.f32.mrf.mxu2  ;;  %v8636_v22 = vld [vmem:[%s10973_s3 + $0x7d8] sm:$0xff] }
  0xcf   :  { %5260 = vmatpush.bf16.msra.mxu1 %v8589_v23  ;;  %v5034_v50 = vpop.f32.mrf.mxu3  ;;  %v8648_v49 = vld [vmem:[%s10973_s3 + $0x838] sm:$0xff] }
  0xd0   :  { %5273 = vmatpush.bf16.msra.mxu2 %v8597_v26  ;;  %v8656_v50 = vld [vmem:[%s10973_s3 + $0x878] sm:$0xff] }
  0xd1   :  { %5286 = vmatpush.bf16.msra.mxu3 %v8605_v27 }
  0xd2   :  { %5248 = vmatpush.bf16.msra.mxu0 %v8580_v29  ;;  %v8619_v29 = vld [vmem:[%s10973_s3 + $0x750] sm:$0xff] }
  0xd3   :  { %5261 = vmatpush.bf16.msra.mxu1 %v8588_v30 }
  0xd4   :  { %5274 = vmatpush.bf16.msra.mxu2 %v8596_v31  ;;  %v8627_v31 = vld [vmem:[%s10973_s3 + $0x790] sm:$0xff] }
  0xd5   :  { %5287 = vmatpush.bf16.msra.mxu3 %v8604_v32  ;;  %v8635_v32 = vld [vmem:[%s10973_s3 + $0x7d0] sm:$0xff] }
  0xd6   :  { %5249 = vmatpush.bf16.msra.mxu0 %v8579_v37  ;;  %v46_v37 = vld [vmem:[%s10974_s2 + $0x70] sm:$0xff] }
  0xd7   :  { %5262 = vmatpush.bf16.msra.mxu1 %v8587_v38  ;;  %v47_v38 = vld [vmem:[%s10974_s2 + $0x78] sm:$0xff]  ;;  %v1289_v47 = vunpack.c.h.b16 %v46_v37 }
  0xd8   :  { %5275 = vmatpush.bf16.msra.mxu2 %v8595_v41  ;;  %v8609_v41 = vld [vmem:[%s10973_s3 + $0x700] sm:$0xff]  ;;  %v1291_v48 = vunpack.c.h.b16 %v47_v38 }
  0xd9   :  { %5288 = vmatpush.bf16.msra.mxu3 %v8603_v42  ;;  %v8617_v42 = vld [vmem:[%s10973_s3 + $0x740] sm:$0xff] }
  0xda   :  { %5250 = vmatpush.bf16.msra.mxu0 %v8578_v43  ;;  %v1288_v43 = vunpack.c.l.b16 %v46_v37 }
  0xdb   :  { %5263 = vmatpush.bf16.msra.mxu1 %v8586_v44  ;;  %v1290_v44 = vunpack.c.l.b16 %v47_v38 }
  0xdc   :  { %5276 = vmatpush.bf16.msra.mxu2 %v8594_v45  ;;  %v8625_v45 = vld [vmem:[%s10973_s3 + $0x780] sm:$0xff]  ;;  %v1360_v53 = vpack.c.b16 %v1288_v43, %v1288_v43 }
  0xdd   :  { %5289 = vmatpush.bf16.msra.mxu3 %v8602_v46  ;;  %v8633_v46 = vld [vmem:[%s10973_s3 + $0x7c0] sm:$0xff]  ;;  %v1362_v54 = vpack.c.b16 %v1290_v44, %v1290_v44 }
  0xde   :  { %5251 = vmatpush.bf16.msra.mxu0 %v8577_v51  ;;  %v5045_v11 = vpop.f32.mrf.mxu0  ;;  %v8664_v51 = vld [vmem:[%s10973_s3 + $0x8b8] sm:$0xff] }
  0xdf   :  { %5264 = vmatpush.bf16.msra.mxu1 %v8585_v52  ;;  %v5046_v12 = vadd.f32 %v5045_v11, %v9716_v39  ;;  %v5058_v15 = vpop.f32.mrf.mxu1  ;;  %v8672_v52 = vld [vmem:[%s10973_s3 + $0x8f8] sm:$0xff] }
  0xe0   :  { %5277 = vmatpush.bf16.msra.mxu2 %v8593_v55  ;;  %v1361_v55 = vpack.c.b16 %v1289_v47, %v1289_v47  ;;  %v8660_v11 = vld [vmem:[%s10973_s3 + $0x898] sm:$0xff]  ;;  %v8679_v47 = vld [vmem:[%s10973_s3 + $0x930] sm:$0xff] }
  0xe1   :  { %5290 = vmatpush.bf16.msra.mxu3 %v8601_v56  ;;  %5252 = vmatmul.bf16.vlgmr.msra.gmra.mxu0 %v1356_v63  ;;  %v5059_v18 = vadd.f32 %v5058_v15, %v5046_v12  ;;  %v1363_v56 = vpack.c.b16 %v1291_v48, %v1291_v48  ;;  %v8662_v63 = vld [vmem:[%s10973_s3 + $0x8a8] sm:$0xff]  ;;  %v8668_v12 = vld [vmem:[%s10973_s3 + $0x8d8] sm:$0xff]  ;;  %v8687_v48 = vld [vmem:[%s10973_s3 + $0x970] sm:$0xff] }
  0xe2   :  { %5296 = vmatpush.bf16.msrb.mxu0 %v8616_v59  ;;  %5265 = vmatmul.bf16.vlgmr.msra.gmra.mxu1 %v1357_v1  ;;  %v8663_v59 = vld [vmem:[%s10973_s3 + $0x8b0] sm:$0xff] }
  0xe3   :  { %5309 = vmatpush.bf16.msrb.mxu1 %v8624_v60  ;;  %5278 = vmatmul.bf16.vlgmr.msra.gmra.mxu2 %v1358_v0  ;;  %v8671_v60 = vld [vmem:[%s10973_s3 + $0x8f0] sm:$0xff]  ;;  %v8670_v0 = vld [vmem:[%s10973_s3 + $0x8e8] sm:$0xff] }
  0xe4   :  { %5322 = vmatpush.bf16.msrb.mxu2 %v8632_v61  ;;  %5291 = vmatmul.bf16.vlgmr.msra.gmra.mxu3 %v1359_v2  ;;  %v8646_v61 = vld [vmem:[%s10973_s3 + $0x828] sm:$0xff] }
  0xe5   :  { %5335 = vmatpush.bf16.msrb.mxu3 %v8640_v62  ;;  %v8654_v62 = vld [vmem:[%s10973_s3 + $0x868] sm:$0xff] }
  0xe6   :  { %5297 = vmatpush.bf16.msrb.mxu0 %v8615_v3  ;;  %v5071_v23 = vpop.f32.mrf.mxu2  ;;  %v5047_v26 = vpop.f32.mrf.mxu0  ;;  %v8645_v3 = vld [vmem:[%s10973_s3 + $0x820] sm:$0xff] }
  0xe7   :  { %5310 = vmatpush.bf16.msrb.mxu1 %v8623_v4  ;;  %v5072_v24 = vadd.f32 %v5071_v23, %v5059_v18  ;;  %v5084_v25 = vpop.f32.mrf.mxu3  ;;  %v5060_v30 = vpop.f32.mrf.mxu1  ;;  %v8653_v4 = vld [vmem:[%s10973_s3 + $0x860] sm:$0xff]  ;;  %v8643_v18 = vld [vmem:[%s10973_s3 + $0x810] sm:$0xff]  ;;  %v8642_v23 = vld [vmem:[%s10973_s3 + $0x808] sm:$0xff] }
  0xe8   :  { %5323 = vmatpush.bf16.msrb.mxu2 %v8631_v5  ;;  %v8666_v26 = vld [vmem:[%s10973_s3 + $0x8c8] sm:$0xff] }
  0xe9   :  { %5336 = vmatpush.bf16.msrb.mxu3 %v8639_v6  ;;  %v9815_v27 = vadd.f32 %v5084_v25, %v5072_v24  ;;  %v8661_v6 = vld [vmem:[%s10973_s3 + $0x8a0] sm:$0xff]  ;;  %v8650_v24 = vld [vmem:[%s10973_s3 + $0x848] sm:$0xff] }
  0xea   :  { %5298 = vmatpush.bf16.msrb.mxu0 %v8614_v7  ;;  %v8669_v7 = vld [vmem:[%s10973_s3 + $0x8e0] sm:$0xff]  ;;  %v8658_v25 = vld [vmem:[%s10973_s3 + $0x888] sm:$0xff] }
  0xeb   :  { %5311 = vmatpush.bf16.msrb.mxu1 %v8622_v8 }
  0xec   :  { %5324 = vmatpush.bf16.msrb.mxu2 %v8630_v9  ;;  %v8644_v9 = vld [vmem:[%s10973_s3 + $0x818] sm:$0xff] }
  0xed   :  { %5337 = vmatpush.bf16.msrb.mxu3 %v8638_v10  ;;  %v8652_v10 = vld [vmem:[%s10973_s3 + $0x858] sm:$0xff] }
  0xee   :  { %5299 = vmatpush.bf16.msrb.mxu0 %v8613_v13  ;;  %v5073_v39 = vpop.f32.mrf.mxu2 }
  0xef   :  { %5312 = vmatpush.bf16.msrb.mxu1 %v8621_v14  ;;  %v5086_v40 = vpop.f32.mrf.mxu3  ;;  %v8680_v39 = vld [vmem:[%s10973_s3 + $0x938] sm:$0xff] }
  0xf0   :  { %5325 = vmatpush.bf16.msrb.mxu2 %v8629_v16  ;;  %v8688_v40 = vld [vmem:[%s10973_s3 + $0x978] sm:$0xff] }
  0xf1   :  { %5338 = vmatpush.bf16.msrb.mxu3 %v8637_v17 }
  0xf2   :  { %5300 = vmatpush.bf16.msrb.mxu0 %v8612_v19  ;;  %v8651_v19 = vld [vmem:[%s10973_s3 + $0x850] sm:$0xff] }
  0xf3   :  { %5313 = vmatpush.bf16.msrb.mxu1 %v8620_v20 }
  0xf4   :  { %5326 = vmatpush.bf16.msrb.mxu2 %v8628_v21  ;;  %v8659_v21 = vld [vmem:[%s10973_s3 + $0x890] sm:$0xff] }
  0xf5   :  { %5339 = vmatpush.bf16.msrb.mxu3 %v8636_v22  ;;  %v8667_v22 = vld [vmem:[%s10973_s3 + $0x8d0] sm:$0xff] }
  0xf6   :  { %5301 = vmatpush.bf16.msrb.mxu0 %v8611_v28  ;;  %v49_v28 = vld [vmem:[%s10974_s2 + $0x88] sm:$0xff] }
  0xf7   :  { %5314 = vmatpush.bf16.msrb.mxu1 %v8619_v29  ;;  %v1295_v38 = vunpack.c.h.b16 %v49_v28 }
  0xf8   :  { %5327 = vmatpush.bf16.msrb.mxu2 %v8627_v31  ;;  %v8641_v31 = vld [vmem:[%s10973_s3 + $0x800] sm:$0xff] }
  0xf9   :  { %5340 = vmatpush.bf16.msrb.mxu3 %v8635_v32  ;;  %v8649_v32 = vld [vmem:[%s10973_s3 + $0x840] sm:$0xff] }
  0xfa   :  { %5302 = vmatpush.bf16.msrb.mxu0 %v8610_v33 }
  0xfb   :  { %5315 = vmatpush.bf16.msrb.mxu1 %v8618_v34  ;;  %v1294_v34 = vunpack.c.l.b16 %v49_v28 }
  0xfc   :  { %5328 = vmatpush.bf16.msrb.mxu2 %v8626_v35  ;;  %v8657_v35 = vld [vmem:[%s10973_s3 + $0x880] sm:$0xff] }
  0xfd   :  { %5341 = vmatpush.bf16.msrb.mxu3 %v8634_v36  ;;  %v8665_v36 = vld [vmem:[%s10973_s3 + $0x8c0] sm:$0xff]  ;;  %v1366_v44 = vpack.c.b16 %v1294_v34, %v1294_v34 }
  0xfe   :  { %5303 = vmatpush.bf16.msrb.mxu0 %v8609_v41  ;;  %v5097_v1 = vpop.f32.mrf.mxu0  ;;  %v8696_v41 = vld [vmem:[%s10973_s3 + $0x9b8] sm:$0xff] }
  0xff   :  { %5316 = vmatpush.bf16.msrb.mxu1 %v8617_v42  ;;  %v5098_v2 = vadd.f32 %v5097_v1, %v9815_v27  ;;  %v5110_v5 = vpop.f32.mrf.mxu1  ;;  %v48_v27 = vld [vmem:[%s10974_s2 + $0x80] sm:$0xff]  ;;  %v8704_v42 = vld [vmem:[%s10973_s3 + $0x9f8] sm:$0xff] }
 0x100   :  { %5329 = vmatpush.bf16.msrb.mxu2 %v8625_v45  ;;  %v1292_v33 = vunpack.c.l.b16 %v48_v27  ;;  %v1293_v37 = vunpack.c.h.b16 %v48_v27  ;;  %v8692_v1 = vld [vmem:[%s10973_s3 + $0x998] sm:$0xff] }
 0x101   :  { %5342 = vmatpush.bf16.msrb.mxu3 %v8633_v46  ;;  %5304 = vmatmul.bf16.vlgmr.msrb.gmra.mxu0 %v1360_v53  ;;  %v5111_v8 = vadd.f32 %v5110_v5, %v5098_v2  ;;  %v1367_v46 = vpack.c.b16 %v1295_v38, %v1295_v38  ;;  %v8694_v53 = vld [vmem:[%s10973_s3 + $0x9a8] sm:$0xff]  ;;  %v8700_v2 = vld [vmem:[%s10973_s3 + $0x9d8] sm:$0xff]  ;;  %v8719_v38 = vld [vmem:[%s10973_s3 + $0xa70] sm:$0xff] }
 0x102   :  { %5348 = vmatpush.bf16.msra.mxu0 %v8648_v49  ;;  %5317 = vmatmul.bf16.vlgmr.msrb.gmra.mxu1 %v1361_v55  ;;  %v1364_v43 = vpack.c.b16 %v1292_v33, %v1292_v33  ;;  %v1365_v45 = vpack.c.b16 %v1293_v37, %v1293_v37  ;;  %v8695_v49 = vld [vmem:[%s10973_s3 + $0x9b0] sm:$0xff] }
 0x103   :  { %5361 = vmatpush.bf16.msra.mxu1 %v8656_v50  ;;  %5330 = vmatmul.bf16.vlgmr.msrb.gmra.mxu2 %v1362_v54  ;;  %v8703_v50 = vld [vmem:[%s10973_s3 + $0x9f0] sm:$0xff]  ;;  %v8702_v54 = vld [vmem:[%s10973_s3 + $0x9e8] sm:$0xff] }
 0x104   :  { %5374 = vmatpush.bf16.msra.mxu2 %v8664_v51  ;;  %5343 = vmatmul.bf16.vlgmr.msrb.gmra.mxu3 %v1363_v56  ;;  %v8678_v51 = vld [vmem:[%s10973_s3 + $0x928] sm:$0xff]  ;;  %v8711_v37 = vld [vmem:[%s10973_s3 + $0xa30] sm:$0xff] }
 0x105   :  { %5387 = vmatpush.bf16.msra.mxu3 %v8672_v52  ;;  %v8686_v52 = vld [vmem:[%s10973_s3 + $0x968] sm:$0xff] }
 0x106   :  { %5349 = vmatpush.bf16.msra.mxu0 %v8647_v57  ;;  %v5123_v13 = vpop.f32.mrf.mxu2  ;;  %v5099_v16 = vpop.f32.mrf.mxu0  ;;  %v8677_v57 = vld [vmem:[%s10973_s3 + $0x920] sm:$0xff] }
 0x107   :  { %5362 = vmatpush.bf16.msra.mxu1 %v8655_v58  ;;  %v5124_v14 = vadd.f32 %v5123_v13, %v5111_v8  ;;  %v5136_v15 = vpop.f32.mrf.mxu3  ;;  %v5112_v20 = vpop.f32.mrf.mxu1  ;;  %v8685_v58 = vld [vmem:[%s10973_s3 + $0x960] sm:$0xff]  ;;  %v8675_v8 = vld [vmem:[%s10973_s3 + $0x910] sm:$0xff]  ;;  %v8674_v13 = vld [vmem:[%s10973_s3 + $0x908] sm:$0xff] }
 0x108   :  { %5375 = vmatpush.bf16.msra.mxu2 %v8663_v59  ;;  %v8698_v16 = vld [vmem:[%s10973_s3 + $0x9c8] sm:$0xff] }
 0x109   :  { %5388 = vmatpush.bf16.msra.mxu3 %v8671_v60  ;;  %v9920_v17 = vadd.f32 %v5136_v15, %v5124_v14  ;;  %v8693_v60 = vld [vmem:[%s10973_s3 + $0x9a0] sm:$0xff]  ;;  %v8682_v14 = vld [vmem:[%s10973_s3 + $0x948] sm:$0xff] }
 0x10a   :  { %5350 = vmatpush.bf16.msra.mxu0 %v8646_v61  ;;  %v8701_v61 = vld [vmem:[%s10973_s3 + $0x9e0] sm:$0xff]  ;;  %v8690_v15 = vld [vmem:[%s10973_s3 + $0x988] sm:$0xff] }
 0x10b   :  { %5363 = vmatpush.bf16.msra.mxu1 %v8654_v62 }
 0x10c   :  { %5376 = vmatpush.bf16.msra.mxu2 %v8662_v63  ;;  %v8676_v63 = vld [vmem:[%s10973_s3 + $0x918] sm:$0xff] }
 0x10d   :  { %5389 = vmatpush.bf16.msra.mxu3 %v8670_v0  ;;  %v8684_v0 = vld [vmem:[%s10973_s3 + $0x958] sm:$0xff] }
 0x10e   :  { %5351 = vmatpush.bf16.msra.mxu0 %v8645_v3  ;;  %v5125_v29 = vpop.f32.mrf.mxu2 }
 0x10f   :  { %5364 = vmatpush.bf16.msra.mxu1 %v8653_v4  ;;  %v5138_v30 = vpop.f32.mrf.mxu3  ;;  %v8712_v29 = vld [vmem:[%s10973_s3 + $0xa38] sm:$0xff] }
 0x110   :  { %5377 = vmatpush.bf16.msra.mxu2 %v8661_v6  ;;  %v8720_v30 = vld [vmem:[%s10973_s3 + $0xa78] sm:$0xff] }
 0x111   :  { %5390 = vmatpush.bf16.msra.mxu3 %v8669_v7 }
 0x112   :  { %5352 = vmatpush.bf16.msra.mxu0 %v8644_v9  ;;  %v8683_v9 = vld [vmem:[%s10973_s3 + $0x950] sm:$0xff] }
 0x113   :  { %5365 = vmatpush.bf16.msra.mxu1 %v8652_v10 }
 0x114   :  { %5378 = vmatpush.bf16.msra.mxu2 %v8660_v11  ;;  %v8691_v11 = vld [vmem:[%s10973_s3 + $0x990] sm:$0xff] }
 0x115   :  { %5391 = vmatpush.bf16.msra.mxu3 %v8668_v12  ;;  %v8699_v12 = vld [vmem:[%s10973_s3 + $0x9d0] sm:$0xff] }
 0x116   :  { %5353 = vmatpush.bf16.msra.mxu0 %v8643_v18  ;;  %v51_v18 = vld [vmem:[%s10974_s2 + $0x98] sm:$0xff] }
 0x117   :  { %5366 = vmatpush.bf16.msra.mxu1 %v8651_v19  ;;  %v1299_v28 = vunpack.c.h.b16 %v51_v18 }
 0x118   :  { %5379 = vmatpush.bf16.msra.mxu2 %v8659_v21  ;;  %v8673_v21 = vld [vmem:[%s10973_s3 + $0x900] sm:$0xff] }
 0x119   :  { %5392 = vmatpush.bf16.msra.mxu3 %v8667_v22  ;;  %v8681_v22 = vld [vmem:[%s10973_s3 + $0x940] sm:$0xff] }
 0x11a   :  { %5354 = vmatpush.bf16.msra.mxu0 %v8642_v23 }
 0x11b   :  { %5367 = vmatpush.bf16.msra.mxu1 %v8650_v24  ;;  %v1298_v24 = vunpack.c.l.b16 %v51_v18 }
 0x11c   :  { %5380 = vmatpush.bf16.msra.mxu2 %v8658_v25  ;;  %v8689_v25 = vld [vmem:[%s10973_s3 + $0x980] sm:$0xff] }
 0x11d   :  { %5393 = vmatpush.bf16.msra.mxu3 %v8666_v26  ;;  %v8697_v26 = vld [vmem:[%s10973_s3 + $0x9c0] sm:$0xff]  ;;  %v1370_v34 = vpack.c.b16 %v1298_v24, %v1298_v24 }
 0x11e   :  { %5355 = vmatpush.bf16.msra.mxu0 %v8641_v31  ;;  %v5149_v55 = vpop.f32.mrf.mxu0  ;;  %v8728_v31 = vld [vmem:[%s10973_s3 + $0xab8] sm:$0xff] }
 0x11f   :  { %5368 = vmatpush.bf16.msra.mxu1 %v8649_v32  ;;  %v5150_v56 = vadd.f32 %v5149_v55, %v9920_v17  ;;  %v5162_v59 = vpop.f32.mrf.mxu1  ;;  %v50_v17 = vld [vmem:[%s10974_s2 + $0x90] sm:$0xff]  ;;  %v8736_v32 = vld [vmem:[%s10973_s3 + $0xaf8] sm:$0xff] }
 0x120   :  { %5381 = vmatpush.bf16.msra.mxu2 %v8657_v35  ;;  %v1296_v23 = vunpack.c.l.b16 %v50_v17  ;;  %v1297_v27 = vunpack.c.h.b16 %v50_v17  ;;  %v8724_v55 = vld [vmem:[%s10973_s3 + $0xa98] sm:$0xff] }
 0x121   :  { %5394 = vmatpush.bf16.msra.mxu3 %v8665_v36  ;;  %5356 = vmatmul.bf16.vlgmr.msra.gmra.mxu0 %v1364_v43  ;;  %v5163_v62 = vadd.f32 %v5162_v59, %v5150_v56  ;;  %v1371_v36 = vpack.c.b16 %v1299_v28, %v1299_v28  ;;  %v8726_v43 = vld [vmem:[%s10973_s3 + $0xaa8] sm:$0xff]  ;;  %v8732_v56 = vld [vmem:[%s10973_s3 + $0xad8] sm:$0xff]  ;;  %v8751_v28 = vld [vmem:[%s10973_s3 + $0xb70] sm:$0xff] }
 0x122   :  { %5400 = vmatpush.bf16.msrb.mxu0 %v8680_v39  ;;  %5369 = vmatmul.bf16.vlgmr.msra.gmra.mxu1 %v1365_v45  ;;  %v1368_v33 = vpack.c.b16 %v1296_v23, %v1296_v23  ;;  %v1369_v35 = vpack.c.b16 %v1297_v27, %v1297_v27  ;;  %v8727_v39 = vld [vmem:[%s10973_s3 + $0xab0] sm:$0xff] }
 0x123   :  { %5413 = vmatpush.bf16.msrb.mxu1 %v8688_v40  ;;  %5382 = vmatmul.bf16.vlgmr.msra.gmra.mxu2 %v1366_v44  ;;  %v8735_v40 = vld [vmem:[%s10973_s3 + $0xaf0] sm:$0xff]  ;;  %v8734_v44 = vld [vmem:[%s10973_s3 + $0xae8] sm:$0xff] }
 0x124   :  { %5426 = vmatpush.bf16.msrb.mxu2 %v8696_v41  ;;  %5395 = vmatmul.bf16.vlgmr.msra.gmra.mxu3 %v1367_v46  ;;  %v8710_v41 = vld [vmem:[%s10973_s3 + $0xa28] sm:$0xff]  ;;  %v8743_v27 = vld [vmem:[%s10973_s3 + $0xb30] sm:$0xff] }
 0x125   :  { %5439 = vmatpush.bf16.msrb.mxu3 %v8704_v42  ;;  %v8718_v42 = vld [vmem:[%s10973_s3 + $0xa68] sm:$0xff] }
 0x126   :  { %5401 = vmatpush.bf16.msrb.mxu0 %v8679_v47  ;;  %v5175_v3 = vpop.f32.mrf.mxu2  ;;  %v5151_v6 = vpop.f32.mrf.mxu0  ;;  %v8709_v47 = vld [vmem:[%s10973_s3 + $0xa20] sm:$0xff] }
 0x127   :  { %5414 = vmatpush.bf16.msrb.mxu1 %v8687_v48  ;;  %v5176_v4 = vadd.f32 %v5175_v3, %v5163_v62  ;;  %v5188_v5 = vpop.f32.mrf.mxu3  ;;  %v5164_v10 = vpop.f32.mrf.mxu1  ;;  %v8717_v48 = vld [vmem:[%s10973_s3 + $0xa60] sm:$0xff]  ;;  %v8707_v62 = vld [vmem:[%s10973_s3 + $0xa10] sm:$0xff]  ;;  %v8706_v3 = vld [vmem:[%s10973_s3 + $0xa08] sm:$0xff] }
 0x128   :  { %5427 = vmatpush.bf16.msrb.mxu2 %v8695_v49  ;;  %v8730_v6 = vld [vmem:[%s10973_s3 + $0xac8] sm:$0xff] }
 0x129   :  { %5440 = vmatpush.bf16.msrb.mxu3 %v8703_v50  ;;  %v10025_v7 = vadd.f32 %v5188_v5, %v5176_v4  ;;  %v8725_v50 = vld [vmem:[%s10973_s3 + $0xaa0] sm:$0xff]  ;;  %v8714_v4 = vld [vmem:[%s10973_s3 + $0xa48] sm:$0xff] }
 0x12a   :  { %5402 = vmatpush.bf16.msrb.mxu0 %v8678_v51  ;;  %v8733_v51 = vld [vmem:[%s10973_s3 + $0xae0] sm:$0xff]  ;;  %v8722_v5 = vld [vmem:[%s10973_s3 + $0xa88] sm:$0xff] }
 0x12b   :  { %5415 = vmatpush.bf16.msrb.mxu1 %v8686_v52 }
 0x12c   :  { %5428 = vmatpush.bf16.msrb.mxu2 %v8694_v53  ;;  %v8708_v53 = vld [vmem:[%s10973_s3 + $0xa18] sm:$0xff] }
 0x12d   :  { %5441 = vmatpush.bf16.msrb.mxu3 %v8702_v54  ;;  %v8716_v54 = vld [vmem:[%s10973_s3 + $0xa58] sm:$0xff] }
 0x12e   :  { %5403 = vmatpush.bf16.msrb.mxu0 %v8677_v57  ;;  %v5177_v19 = vpop.f32.mrf.mxu2 }
 0x12f   :  { %5416 = vmatpush.bf16.msrb.mxu1 %v8685_v58  ;;  %v5190_v20 = vpop.f32.mrf.mxu3  ;;  %v8744_v19 = vld [vmem:[%s10973_s3 + $0xb38] sm:$0xff] }
 0x130   :  { %5429 = vmatpush.bf16.msrb.mxu2 %v8693_v60  ;;  %v8752_v20 = vld [vmem:[%s10973_s3 + $0xb78] sm:$0xff] }
 0x131   :  { %5442 = vmatpush.bf16.msrb.mxu3 %v8701_v61 }
 0x132   :  { %5404 = vmatpush.bf16.msrb.mxu0 %v8676_v63  ;;  %v8715_v63 = vld [vmem:[%s10973_s3 + $0xa50] sm:$0xff] }
 0x133   :  { %5417 = vmatpush.bf16.msrb.mxu1 %v8684_v0 }
 0x134   :  { %5430 = vmatpush.bf16.msrb.mxu2 %v8692_v1  ;;  %v8723_v1 = vld [vmem:[%s10973_s3 + $0xa90] sm:$0xff] }
 0x135   :  { %5443 = vmatpush.bf16.msrb.mxu3 %v8700_v2  ;;  %v8731_v2 = vld [vmem:[%s10973_s3 + $0xad0] sm:$0xff] }
 0x136   :  { %5405 = vmatpush.bf16.msrb.mxu0 %v8675_v8  ;;  %v53_v8 = vld [vmem:[%s10974_s2 + $0xa8] sm:$0xff] }
 0x137   :  { %5418 = vmatpush.bf16.msrb.mxu1 %v8683_v9  ;;  %v1303_v18 = vunpack.c.h.b16 %v53_v8 }
 0x138   :  { %5431 = vmatpush.bf16.msrb.mxu2 %v8691_v11  ;;  %v8705_v11 = vld [vmem:[%s10973_s3 + $0xa00] sm:$0xff] }
 0x139   :  { %5444 = vmatpush.bf16.msrb.mxu3 %v8699_v12  ;;  %v8713_v12 = vld [vmem:[%s10973_s3 + $0xa40] sm:$0xff] }
 0x13a   :  { %5406 = vmatpush.bf16.msrb.mxu0 %v8674_v13 }
 0x13b   :  { %5419 = vmatpush.bf16.msrb.mxu1 %v8682_v14  ;;  %v1302_v14 = vunpack.c.l.b16 %v53_v8 }
 0x13c   :  { %5432 = vmatpush.bf16.msrb.mxu2 %v8690_v15  ;;  %v8721_v15 = vld [vmem:[%s10973_s3 + $0xa80] sm:$0xff] }
 0x13d   :  { %5445 = vmatpush.bf16.msrb.mxu3 %v8698_v16  ;;  %v8729_v16 = vld [vmem:[%s10973_s3 + $0xac0] sm:$0xff]  ;;  %v1374_v24 = vpack.c.b16 %v1302_v14, %v1302_v14 }
 0x13e   :  { %5407 = vmatpush.bf16.msrb.mxu0 %v8673_v21  ;;  %v5201_v45 = vpop.f32.mrf.mxu0  ;;  %v8760_v21 = vld [vmem:[%s10973_s3 + $0xbb8] sm:$0xff] }
 0x13f   :  { %5420 = vmatpush.bf16.msrb.mxu1 %v8681_v22  ;;  %v5202_v46 = vadd.f32 %v5201_v45, %v10025_v7  ;;  %v5214_v49 = vpop.f32.mrf.mxu1  ;;  %v52_v7 = vld [vmem:[%s10974_s2 + $0xa0] sm:$0xff]  ;;  %v8768_v22 = vld [vmem:[%s10973_s3 + $0xbf8] sm:$0xff] }
 0x140   :  { %5433 = vmatpush.bf16.msrb.mxu2 %v8689_v25  ;;  %v1300_v13 = vunpack.c.l.b16 %v52_v7  ;;  %v1301_v17 = vunpack.c.h.b16 %v52_v7  ;;  %v8756_v45 = vld [vmem:[%s10973_s3 + $0xb98] sm:$0xff] }
 0x141   :  { %5446 = vmatpush.bf16.msrb.mxu3 %v8697_v26  ;;  %5408 = vmatmul.bf16.vlgmr.msrb.gmra.mxu0 %v1368_v33  ;;  %v5215_v52 = vadd.f32 %v5214_v49, %v5202_v46  ;;  %v1375_v26 = vpack.c.b16 %v1303_v18, %v1303_v18  ;;  %v8758_v33 = vld [vmem:[%s10973_s3 + $0xba8] sm:$0xff]  ;;  %v8764_v46 = vld [vmem:[%s10973_s3 + $0xbd8] sm:$0xff]  ;;  %v8783_v18 = vld [vmem:[%s10973_s3 + $0xc70] sm:$0xff] }
 0x142   :  { %5452 = vmatpush.bf16.msra.mxu0 %v8712_v29  ;;  %5421 = vmatmul.bf16.vlgmr.msrb.gmra.mxu1 %v1369_v35  ;;  %v1372_v23 = vpack.c.b16 %v1300_v13, %v1300_v13  ;;  %v1373_v25 = vpack.c.b16 %v1301_v17, %v1301_v17  ;;  %v8759_v29 = vld [vmem:[%s10973_s3 + $0xbb0] sm:$0xff] }
 0x143   :  { %5465 = vmatpush.bf16.msra.mxu1 %v8720_v30  ;;  %5434 = vmatmul.bf16.vlgmr.msrb.gmra.mxu2 %v1370_v34  ;;  %v8767_v30 = vld [vmem:[%s10973_s3 + $0xbf0] sm:$0xff]  ;;  %v8766_v34 = vld [vmem:[%s10973_s3 + $0xbe8] sm:$0xff] }
 0x144   :  { %5478 = vmatpush.bf16.msra.mxu2 %v8728_v31  ;;  %5447 = vmatmul.bf16.vlgmr.msrb.gmra.mxu3 %v1371_v36  ;;  %v8742_v31 = vld [vmem:[%s10973_s3 + $0xb28] sm:$0xff]  ;;  %v8775_v17 = vld [vmem:[%s10973_s3 + $0xc30] sm:$0xff] }
 0x145   :  { %5491 = vmatpush.bf16.msra.mxu3 %v8736_v32  ;;  %v8750_v32 = vld [vmem:[%s10973_s3 + $0xb68] sm:$0xff] }
 0x146   :  { %5453 = vmatpush.bf16.msra.mxu0 %v8711_v37  ;;  %v5227_v57 = vpop.f32.mrf.mxu2  ;;  %v5203_v60 = vpop.f32.mrf.mxu0  ;;  %v8741_v37 = vld [vmem:[%s10973_s3 + $0xb20] sm:$0xff] }
 0x147   :  { %5466 = vmatpush.bf16.msra.mxu1 %v8719_v38  ;;  %v5228_v58 = vadd.f32 %v5227_v57, %v5215_v52  ;;  %v5240_v59 = vpop.f32.mrf.mxu3  ;;  %v5216_v0 = vpop.f32.mrf.mxu1  ;;  %v8749_v38 = vld [vmem:[%s10973_s3 + $0xb60] sm:$0xff]  ;;  %v8739_v52 = vld [vmem:[%s10973_s3 + $0xb10] sm:$0xff]  ;;  %v8738_v57 = vld [vmem:[%s10973_s3 + $0xb08] sm:$0xff] }
 0x148   :  { %5479 = vmatpush.bf16.msra.mxu2 %v8727_v39  ;;  %v8762_v60 = vld [vmem:[%s10973_s3 + $0xbc8] sm:$0xff] }
 0x149   :  { %5492 = vmatpush.bf16.msra.mxu3 %v8735_v40  ;;  %v10130_v61 = vadd.f32 %v5240_v59, %v5228_v58  ;;  %v8757_v40 = vld [vmem:[%s10973_s3 + $0xba0] sm:$0xff]  ;;  %v8746_v58 = vld [vmem:[%s10973_s3 + $0xb48] sm:$0xff] }
 0x14a   :  { %5454 = vmatpush.bf16.msra.mxu0 %v8710_v41  ;;  %v8765_v41 = vld [vmem:[%s10973_s3 + $0xbe0] sm:$0xff]  ;;  %v8754_v59 = vld [vmem:[%s10973_s3 + $0xb88] sm:$0xff] }
 0x14b   :  { %5467 = vmatpush.bf16.msra.mxu1 %v8718_v42 }
 0x14c   :  { %5480 = vmatpush.bf16.msra.mxu2 %v8726_v43  ;;  %v8740_v43 = vld [vmem:[%s10973_s3 + $0xb18] sm:$0xff] }
 0x14d   :  { %5493 = vmatpush.bf16.msra.mxu3 %v8734_v44  ;;  %v8748_v44 = vld [vmem:[%s10973_s3 + $0xb58] sm:$0xff] }
 0x14e   :  { %5455 = vmatpush.bf16.msra.mxu0 %v8709_v47  ;;  %v5229_v9 = vpop.f32.mrf.mxu2 }
 0x14f   :  { %5468 = vmatpush.bf16.msra.mxu1 %v8717_v48  ;;  %v5242_v10 = vpop.f32.mrf.mxu3  ;;  %v8776_v9 = vld [vmem:[%s10973_s3 + $0xc38] sm:$0xff] }
 0x150   :  { %5481 = vmatpush.bf16.msra.mxu2 %v8725_v50  ;;  %v8784_v10 = vld [vmem:[%s10973_s3 + $0xc78] sm:$0xff] }
 0x151   :  { %5494 = vmatpush.bf16.msra.mxu3 %v8733_v51 }
 0x152   :  { %5456 = vmatpush.bf16.msra.mxu0 %v8708_v53  ;;  %v8747_v53 = vld [vmem:[%s10973_s3 + $0xb50] sm:$0xff] }
 0x153   :  { %5469 = vmatpush.bf16.msra.mxu1 %v8716_v54 }
 0x154   :  { %5482 = vmatpush.bf16.msra.mxu2 %v8724_v55  ;;  %v8755_v55 = vld [vmem:[%s10973_s3 + $0xb90] sm:$0xff] }
 0x155   :  { %5495 = vmatpush.bf16.msra.mxu3 %v8732_v56  ;;  %v8763_v56 = vld [vmem:[%s10973_s3 + $0xbd0] sm:$0xff] }
 0x156   :  { %5457 = vmatpush.bf16.msra.mxu0 %v8707_v62  ;;  %v55_v62 = vld [vmem:[%s10974_s2 + $0xb8] sm:$0xff] }
 0x157   :  { %5470 = vmatpush.bf16.msra.mxu1 %v8715_v63  ;;  %v1307_v8 = vunpack.c.h.b16 %v55_v62 }
 0x158   :  { %5483 = vmatpush.bf16.msra.mxu2 %v8723_v1  ;;  %v8737_v1 = vld [vmem:[%s10973_s3 + $0xb00] sm:$0xff] }
 0x159   :  { %5496 = vmatpush.bf16.msra.mxu3 %v8731_v2  ;;  %v8745_v2 = vld [vmem:[%s10973_s3 + $0xb40] sm:$0xff] }
 0x15a   :  { %5458 = vmatpush.bf16.msra.mxu0 %v8706_v3 }
 0x15b   :  { %5471 = vmatpush.bf16.msra.mxu1 %v8714_v4  ;;  %v1306_v4 = vunpack.c.l.b16 %v55_v62 }
 0x15c   :  { %5484 = vmatpush.bf16.msra.mxu2 %v8722_v5  ;;  %v8753_v5 = vld [vmem:[%s10973_s3 + $0xb80] sm:$0xff] }
 0x15d   :  { %5497 = vmatpush.bf16.msra.mxu3 %v8730_v6  ;;  %v8761_v6 = vld [vmem:[%s10973_s3 + $0xbc0] sm:$0xff]  ;;  %v1378_v14 = vpack.c.b16 %v1306_v4, %v1306_v4 }
 0x15e   :  { %5459 = vmatpush.bf16.msra.mxu0 %v8705_v11  ;;  %v5253_v35 = vpop.f32.mrf.mxu0  ;;  %v8792_v11 = vld [vmem:[%s10973_s3 + $0xcb8] sm:$0xff] }
 0x15f   :  { %5472 = vmatpush.bf16.msra.mxu1 %v8713_v12  ;;  %v5254_v36 = vadd.f32 %v5253_v35, %v10130_v61  ;;  %v5266_v39 = vpop.f32.mrf.mxu1  ;;  %v54_v61 = vld [vmem:[%s10974_s2 + $0xb0] sm:$0xff]  ;;  %v8800_v12 = vld [vmem:[%s10973_s3 + $0xcf8] sm:$0xff] }
 0x160   :  { %5485 = vmatpush.bf16.msra.mxu2 %v8721_v15  ;;  %v1304_v3 = vunpack.c.l.b16 %v54_v61  ;;  %v1305_v7 = vunpack.c.h.b16 %v54_v61  ;;  %v8788_v35 = vld [vmem:[%s10973_s3 + $0xc98] sm:$0xff] }
 0x161   :  { %5498 = vmatpush.bf16.msra.mxu3 %v8729_v16  ;;  %5460 = vmatmul.bf16.vlgmr.msra.gmra.mxu0 %v1372_v23  ;;  %v5267_v42 = vadd.f32 %v5266_v39, %v5254_v36  ;;  %v1379_v16 = vpack.c.b16 %v1307_v8, %v1307_v8  ;;  %v8790_v23 = vld [vmem:[%s10973_s3 + $0xca8] sm:$0xff]  ;;  %v8796_v36 = vld [vmem:[%s10973_s3 + $0xcd8] sm:$0xff]  ;;  %v8815_v8 = vld [vmem:[%s10973_s3 + $0xd70] sm:$0xff] }
 0x162   :  { %5504 = vmatpush.bf16.msrb.mxu0 %v8744_v19  ;;  %5473 = vmatmul.bf16.vlgmr.msra.gmra.mxu1 %v1373_v25  ;;  %v1376_v13 = vpack.c.b16 %v1304_v3, %v1304_v3  ;;  %v1377_v15 = vpack.c.b16 %v1305_v7, %v1305_v7  ;;  %v8791_v19 = vld [vmem:[%s10973_s3 + $0xcb0] sm:$0xff] }
 0x163   :  { %5517 = vmatpush.bf16.msrb.mxu1 %v8752_v20  ;;  %5486 = vmatmul.bf16.vlgmr.msra.gmra.mxu2 %v1374_v24  ;;  %v8799_v20 = vld [vmem:[%s10973_s3 + $0xcf0] sm:$0xff]  ;;  %v8798_v24 = vld [vmem:[%s10973_s3 + $0xce8] sm:$0xff] }
 0x164   :  { %5530 = vmatpush.bf16.msrb.mxu2 %v8760_v21  ;;  %5499 = vmatmul.bf16.vlgmr.msra.gmra.mxu3 %v1375_v26  ;;  %v8774_v21 = vld [vmem:[%s10973_s3 + $0xc28] sm:$0xff]  ;;  %v8807_v7 = vld [vmem:[%s10973_s3 + $0xd30] sm:$0xff] }
 0x165   :  { %5543 = vmatpush.bf16.msrb.mxu3 %v8768_v22  ;;  %v8782_v22 = vld [vmem:[%s10973_s3 + $0xc68] sm:$0xff] }
 0x166   :  { %5505 = vmatpush.bf16.msrb.mxu0 %v8743_v27  ;;  %v5279_v47 = vpop.f32.mrf.mxu2  ;;  %v5255_v50 = vpop.f32.mrf.mxu0  ;;  %v8773_v27 = vld [vmem:[%s10973_s3 + $0xc20] sm:$0xff] }
 0x167   :  { %5518 = vmatpush.bf16.msrb.mxu1 %v8751_v28  ;;  %v5280_v48 = vadd.f32 %v5279_v47, %v5267_v42  ;;  %v5292_v49 = vpop.f32.mrf.mxu3  ;;  %v5268_v54 = vpop.f32.mrf.mxu1  ;;  %v8781_v28 = vld [vmem:[%s10973_s3 + $0xc60] sm:$0xff]  ;;  %v8771_v42 = vld [vmem:[%s10973_s3 + $0xc10] sm:$0xff]  ;;  %v8770_v47 = vld [vmem:[%s10973_s3 + $0xc08] sm:$0xff] }
 0x168   :  { %5531 = vmatpush.bf16.msrb.mxu2 %v8759_v29  ;;  %v8794_v50 = vld [vmem:[%s10973_s3 + $0xcc8] sm:$0xff] }
 0x169   :  { %5544 = vmatpush.bf16.msrb.mxu3 %v8767_v30  ;;  %v10235_v51 = vadd.f32 %v5292_v49, %v5280_v48  ;;  %v8789_v30 = vld [vmem:[%s10973_s3 + $0xca0] sm:$0xff]  ;;  %v8778_v48 = vld [vmem:[%s10973_s3 + $0xc48] sm:$0xff] }
 0x16a   :  { %5506 = vmatpush.bf16.msrb.mxu0 %v8742_v31  ;;  %v8797_v31 = vld [vmem:[%s10973_s3 + $0xce0] sm:$0xff]  ;;  %v8786_v49 = vld [vmem:[%s10973_s3 + $0xc88] sm:$0xff] }
 0x16b   :  { %5519 = vmatpush.bf16.msrb.mxu1 %v8750_v32 }
 0x16c   :  { %5532 = vmatpush.bf16.msrb.mxu2 %v8758_v33  ;;  %v8772_v33 = vld [vmem:[%s10973_s3 + $0xc18] sm:$0xff] }
 0x16d   :  { %5545 = vmatpush.bf16.msrb.mxu3 %v8766_v34  ;;  %v8780_v34 = vld [vmem:[%s10973_s3 + $0xc58] sm:$0xff] }
 0x16e   :  { %5507 = vmatpush.bf16.msrb.mxu0 %v8741_v37  ;;  %v5281_v63 = vpop.f32.mrf.mxu2 }
 0x16f   :  { %5520 = vmatpush.bf16.msrb.mxu1 %v8749_v38  ;;  %v5294_v0 = vpop.f32.mrf.mxu3  ;;  %v8808_v63 = vld [vmem:[%s10973_s3 + $0xd38] sm:$0xff] }
 0x170   :  { %5533 = vmatpush.bf16.msrb.mxu2 %v8757_v40  ;;  %v8816_v0 = vld [vmem:[%s10973_s3 + $0xd78] sm:$0xff] }
 0x171   :  { %5546 = vmatpush.bf16.msrb.mxu3 %v8765_v41 }
 0x172   :  { %5508 = vmatpush.bf16.msrb.mxu0 %v8740_v43  ;;  %v8779_v43 = vld [vmem:[%s10973_s3 + $0xc50] sm:$0xff] }
 0x173   :  { %5521 = vmatpush.bf16.msrb.mxu1 %v8748_v44 }
 0x174   :  { %5534 = vmatpush.bf16.msrb.mxu2 %v8756_v45  ;;  %v8787_v45 = vld [vmem:[%s10973_s3 + $0xc90] sm:$0xff] }
 0x175   :  { %5547 = vmatpush.bf16.msrb.mxu3 %v8764_v46  ;;  %v8795_v46 = vld [vmem:[%s10973_s3 + $0xcd0] sm:$0xff] }
 0x176   :  { %5509 = vmatpush.bf16.msrb.mxu0 %v8739_v52  ;;  %v57_v52 = vld [vmem:[%s10974_s2 + $0xc8] sm:$0xff] }
 0x177   :  { %5522 = vmatpush.bf16.msrb.mxu1 %v8747_v53  ;;  %v1311_v62 = vunpack.c.h.b16 %v57_v52 }
 0x178   :  { %5535 = vmatpush.bf16.msrb.mxu2 %v8755_v55  ;;  %v8769_v55 = vld [vmem:[%s10973_s3 + $0xc00] sm:$0xff] }
 0x179   :  { %5548 = vmatpush.bf16.msrb.mxu3 %v8763_v56  ;;  %v8777_v56 = vld [vmem:[%s10973_s3 + $0xc40] sm:$0xff] }
 0x17a   :  { %5510 = vmatpush.bf16.msrb.mxu0 %v8738_v57 }
 0x17b   :  { %5523 = vmatpush.bf16.msrb.mxu1 %v8746_v58  ;;  %v1310_v58 = vunpack.c.l.b16 %v57_v52 }
 0x17c   :  { %5536 = vmatpush.bf16.msrb.mxu2 %v8754_v59  ;;  %v8785_v59 = vld [vmem:[%s10973_s3 + $0xc80] sm:$0xff] }
 0x17d   :  { %5549 = vmatpush.bf16.msrb.mxu3 %v8762_v60  ;;  %v8793_v60 = vld [vmem:[%s10973_s3 + $0xcc0] sm:$0xff]  ;;  %v1382_v4 = vpack.c.b16 %v1310_v58, %v1310_v58 }
 0x17e   :  { %5511 = vmatpush.bf16.msrb.mxu0 %v8737_v1  ;;  %v5305_v25 = vpop.f32.mrf.mxu0  ;;  %v8824_v1 = vld [vmem:[%s10973_s3 + $0xdb8] sm:$0xff] }
 0x17f   :  { %5524 = vmatpush.bf16.msrb.mxu1 %v8745_v2  ;;  %v5306_v26 = vadd.f32 %v5305_v25, %v10235_v51  ;;  %v5318_v29 = vpop.f32.mrf.mxu1  ;;  %v56_v51 = vld [vmem:[%s10974_s2 + $0xc0] sm:$0xff]  ;;  %v8832_v2 = vld [vmem:[%s10973_s3 + $0xdf8] sm:$0xff] }
 0x180   :  { %5537 = vmatpush.bf16.msrb.mxu2 %v8753_v5  ;;  %v1308_v57 = vunpack.c.l.b16 %v56_v51  ;;  %v1309_v61 = vunpack.c.h.b16 %v56_v51  ;;  %v8820_v25 = vld [vmem:[%s10973_s3 + $0xd98] sm:$0xff] }
 0x181   :  { %5550 = vmatpush.bf16.msrb.mxu3 %v8761_v6  ;;  %5512 = vmatmul.bf16.vlgmr.msrb.gmra.mxu0 %v1376_v13  ;;  %v5319_v32 = vadd.f32 %v5318_v29, %v5306_v26  ;;  %v1383_v6 = vpack.c.b16 %v1311_v62, %v1311_v62  ;;  %v8822_v13 = vld [vmem:[%s10973_s3 + $0xda8] sm:$0xff]  ;;  %v8828_v26 = vld [vmem:[%s10973_s3 + $0xdd8] sm:$0xff]  ;;  %v8847_v62 = vld [vmem:[%s10973_s3 + $0xe70] sm:$0xff] }
 0x182   :  { %5556 = vmatpush.bf16.msra.mxu0 %v8776_v9  ;;  %5525 = vmatmul.bf16.vlgmr.msrb.gmra.mxu1 %v1377_v15  ;;  %v1380_v3 = vpack.c.b16 %v1308_v57, %v1308_v57  ;;  %v1381_v5 = vpack.c.b16 %v1309_v61, %v1309_v61  ;;  %v8823_v9 = vld [vmem:[%s10973_s3 + $0xdb0] sm:$0xff] }
 0x183   :  { %5569 = vmatpush.bf16.msra.mxu1 %v8784_v10  ;;  %5538 = vmatmul.bf16.vlgmr.msrb.gmra.mxu2 %v1378_v14  ;;  %v8831_v10 = vld [vmem:[%s10973_s3 + $0xdf0] sm:$0xff]  ;;  %v8830_v14 = vld [vmem:[%s10973_s3 + $0xde8] sm:$0xff] }
 0x184   :  { %5582 = vmatpush.bf16.msra.mxu2 %v8792_v11  ;;  %5551 = vmatmul.bf16.vlgmr.msrb.gmra.mxu3 %v1379_v16  ;;  %v8806_v11 = vld [vmem:[%s10973_s3 + $0xd28] sm:$0xff]  ;;  %v8839_v61 = vld [vmem:[%s10973_s3 + $0xe30] sm:$0xff] }
 0x185   :  { %5595 = vmatpush.bf16.msra.mxu3 %v8800_v12  ;;  %v8814_v12 = vld [vmem:[%s10973_s3 + $0xd68] sm:$0xff] }
 0x186   :  { %5557 = vmatpush.bf16.msra.mxu0 %v8775_v17  ;;  %v5331_v37 = vpop.f32.mrf.mxu2  ;;  %v5307_v40 = vpop.f32.mrf.mxu0  ;;  %v8805_v17 = vld [vmem:[%s10973_s3 + $0xd20] sm:$0xff] }
 0x187   :  { %5570 = vmatpush.bf16.msra.mxu1 %v8783_v18  ;;  %v5332_v38 = vadd.f32 %v5331_v37, %v5319_v32  ;;  %v5344_v39 = vpop.f32.mrf.mxu3  ;;  %v5320_v44 = vpop.f32.mrf.mxu1  ;;  %v8813_v18 = vld [vmem:[%s10973_s3 + $0xd60] sm:$0xff]  ;;  %v8803_v32 = vld [vmem:[%s10973_s3 + $0xd10] sm:$0xff]  ;;  %v8802_v37 = vld [vmem:[%s10973_s3 + $0xd08] sm:$0xff] }
 0x188   :  { %5583 = vmatpush.bf16.msra.mxu2 %v8791_v19  ;;  %v8826_v40 = vld [vmem:[%s10973_s3 + $0xdc8] sm:$0xff] }
 0x189   :  { %5596 = vmatpush.bf16.msra.mxu3 %v8799_v20  ;;  %v10340_v41 = vadd.f32 %v5344_v39, %v5332_v38  ;;  %v8821_v20 = vld [vmem:[%s10973_s3 + $0xda0] sm:$0xff]  ;;  %v8810_v38 = vld [vmem:[%s10973_s3 + $0xd48] sm:$0xff] }
 0x18a   :  { %5558 = vmatpush.bf16.msra.mxu0 %v8774_v21  ;;  %v8829_v21 = vld [vmem:[%s10973_s3 + $0xde0] sm:$0xff]  ;;  %v8818_v39 = vld [vmem:[%s10973_s3 + $0xd88] sm:$0xff] }
 0x18b   :  { %5571 = vmatpush.bf16.msra.mxu1 %v8782_v22 }
 0x18c   :  { %5584 = vmatpush.bf16.msra.mxu2 %v8790_v23  ;;  %v8804_v23 = vld [vmem:[%s10973_s3 + $0xd18] sm:$0xff] }
 0x18d   :  { %5597 = vmatpush.bf16.msra.mxu3 %v8798_v24  ;;  %v8812_v24 = vld [vmem:[%s10973_s3 + $0xd58] sm:$0xff] }
 0x18e   :  { %5559 = vmatpush.bf16.msra.mxu0 %v8773_v27  ;;  %v5333_v53 = vpop.f32.mrf.mxu2 }
 0x18f   :  { %5572 = vmatpush.bf16.msra.mxu1 %v8781_v28  ;;  %v5346_v54 = vpop.f32.mrf.mxu3  ;;  %v8840_v53 = vld [vmem:[%s10973_s3 + $0xe38] sm:$0xff] }
 0x190   :  { %5585 = vmatpush.bf16.msra.mxu2 %v8789_v30  ;;  %v8848_v54 = vld [vmem:[%s10973_s3 + $0xe78] sm:$0xff] }
 0x191   :  { %5598 = vmatpush.bf16.msra.mxu3 %v8797_v31 }
 0x192   :  { %5560 = vmatpush.bf16.msra.mxu0 %v8772_v33  ;;  %v8811_v33 = vld [vmem:[%s10973_s3 + $0xd50] sm:$0xff] }
 0x193   :  { %5573 = vmatpush.bf16.msra.mxu1 %v8780_v34 }
 0x194   :  { %5586 = vmatpush.bf16.msra.mxu2 %v8788_v35  ;;  %v8819_v35 = vld [vmem:[%s10973_s3 + $0xd90] sm:$0xff] }
 0x195   :  { %5599 = vmatpush.bf16.msra.mxu3 %v8796_v36  ;;  %v8827_v36 = vld [vmem:[%s10973_s3 + $0xdd0] sm:$0xff] }
 0x196   :  { %5561 = vmatpush.bf16.msra.mxu0 %v8771_v42  ;;  %v59_v42 = vld [vmem:[%s10974_s2 + $0xd8] sm:$0xff] }
 0x197   :  { %5574 = vmatpush.bf16.msra.mxu1 %v8779_v43  ;;  %v1315_v52 = vunpack.c.h.b16 %v59_v42 }
 0x198   :  { %5587 = vmatpush.bf16.msra.mxu2 %v8787_v45  ;;  %v8801_v45 = vld [vmem:[%s10973_s3 + $0xd00] sm:$0xff] }
 0x199   :  { %5600 = vmatpush.bf16.msra.mxu3 %v8795_v46  ;;  %v8809_v46 = vld [vmem:[%s10973_s3 + $0xd40] sm:$0xff] }
 0x19a   :  { %5562 = vmatpush.bf16.msra.mxu0 %v8770_v47 }
 0x19b   :  { %5575 = vmatpush.bf16.msra.mxu1 %v8778_v48  ;;  %v1314_v48 = vunpack.c.l.b16 %v59_v42 }
 0x19c   :  { %5588 = vmatpush.bf16.msra.mxu2 %v8786_v49  ;;  %v8817_v49 = vld [vmem:[%s10973_s3 + $0xd80] sm:$0xff] }
 0x19d   :  { %5601 = vmatpush.bf16.msra.mxu3 %v8794_v50  ;;  %v8825_v50 = vld [vmem:[%s10973_s3 + $0xdc0] sm:$0xff]  ;;  %v1386_v58 = vpack.c.b16 %v1314_v48, %v1314_v48 }
 0x19e   :  { %5563 = vmatpush.bf16.msra.mxu0 %v8769_v55  ;;  %v5357_v15 = vpop.f32.mrf.mxu0  ;;  %v8856_v55 = vld [vmem:[%s10973_s3 + $0xeb8] sm:$0xff] }
 0x19f   :  { %5576 = vmatpush.bf16.msra.mxu1 %v8777_v56  ;;  %v5358_v16 = vadd.f32 %v5357_v15, %v10340_v41  ;;  %v5370_v19 = vpop.f32.mrf.mxu1  ;;  %v58_v41 = vld [vmem:[%s10974_s2 + $0xd0] sm:$0xff]  ;;  %v8864_v56 = vld [vmem:[%s10973_s3 + $0xef8] sm:$0xff] }
 0x1a0   :  { %5589 = vmatpush.bf16.msra.mxu2 %v8785_v59  ;;  %v1312_v47 = vunpack.c.l.b16 %v58_v41  ;;  %v1313_v51 = vunpack.c.h.b16 %v58_v41  ;;  %v8852_v15 = vld [vmem:[%s10973_s3 + $0xe98] sm:$0xff] }
 0x1a1   :  { %5602 = vmatpush.bf16.msra.mxu3 %v8793_v60  ;;  %5564 = vmatmul.bf16.vlgmr.msra.gmra.mxu0 %v1380_v3  ;;  %v5371_v22 = vadd.f32 %v5370_v19, %v5358_v16  ;;  %v1387_v60 = vpack.c.b16 %v1315_v52, %v1315_v52  ;;  %v8854_v3 = vld [vmem:[%s10973_s3 + $0xea8] sm:$0xff]  ;;  %v8860_v16 = vld [vmem:[%s10973_s3 + $0xed8] sm:$0xff]  ;;  %v8879_v52 = vld [vmem:[%s10973_s3 + $0xf70] sm:$0xff] }
 0x1a2   :  { %5608 = vmatpush.bf16.msrb.mxu0 %v8808_v63  ;;  %5577 = vmatmul.bf16.vlgmr.msra.gmra.mxu1 %v1381_v5  ;;  %v1384_v57 = vpack.c.b16 %v1312_v47, %v1312_v47  ;;  %v1385_v59 = vpack.c.b16 %v1313_v51, %v1313_v51  ;;  %v8855_v63 = vld [vmem:[%s10973_s3 + $0xeb0] sm:$0xff] }
 0x1a3   :  { %5621 = vmatpush.bf16.msrb.mxu1 %v8816_v0  ;;  %5590 = vmatmul.bf16.vlgmr.msra.gmra.mxu2 %v1382_v4  ;;  %v8863_v0 = vld [vmem:[%s10973_s3 + $0xef0] sm:$0xff]  ;;  %v8862_v4 = vld [vmem:[%s10973_s3 + $0xee8] sm:$0xff] }
 0x1a4   :  { %5634 = vmatpush.bf16.msrb.mxu2 %v8824_v1  ;;  %5603 = vmatmul.bf16.vlgmr.msra.gmra.mxu3 %v1383_v6  ;;  %v8838_v1 = vld [vmem:[%s10973_s3 + $0xe28] sm:$0xff]  ;;  %v8871_v51 = vld [vmem:[%s10973_s3 + $0xf30] sm:$0xff] }
 0x1a5   :  { %5647 = vmatpush.bf16.msrb.mxu3 %v8832_v2  ;;  %v8846_v2 = vld [vmem:[%s10973_s3 + $0xe68] sm:$0xff] }
 0x1a6   :  { %5609 = vmatpush.bf16.msrb.mxu0 %v8807_v7  ;;  %v5383_v27 = vpop.f32.mrf.mxu2  ;;  %v5359_v30 = vpop.f32.mrf.mxu0  ;;  %v8837_v7 = vld [vmem:[%s10973_s3 + $0xe20] sm:$0xff] }
 0x1a7   :  { %5622 = vmatpush.bf16.msrb.mxu1 %v8815_v8  ;;  %v5384_v28 = vadd.f32 %v5383_v27, %v5371_v22  ;;  %v5396_v29 = vpop.f32.mrf.mxu3  ;;  %v5372_v34 = vpop.f32.mrf.mxu1  ;;  %v8845_v8 = vld [vmem:[%s10973_s3 + $0xe60] sm:$0xff]  ;;  %v8835_v22 = vld [vmem:[%s10973_s3 + $0xe10] sm:$0xff]  ;;  %v8834_v27 = vld [vmem:[%s10973_s3 + $0xe08] sm:$0xff] }
 0x1a8   :  { %5635 = vmatpush.bf16.msrb.mxu2 %v8823_v9  ;;  %v8858_v30 = vld [vmem:[%s10973_s3 + $0xec8] sm:$0xff] }
 0x1a9   :  { %5648 = vmatpush.bf16.msrb.mxu3 %v8831_v10  ;;  %v10445_v31 = vadd.f32 %v5396_v29, %v5384_v28  ;;  %v8853_v10 = vld [vmem:[%s10973_s3 + $0xea0] sm:$0xff]  ;;  %v8842_v28 = vld [vmem:[%s10973_s3 + $0xe48] sm:$0xff] }
 0x1aa   :  { %5610 = vmatpush.bf16.msrb.mxu0 %v8806_v11  ;;  %v8861_v11 = vld [vmem:[%s10973_s3 + $0xee0] sm:$0xff]  ;;  %v8850_v29 = vld [vmem:[%s10973_s3 + $0xe88] sm:$0xff] }
 0x1ab   :  { %5623 = vmatpush.bf16.msrb.mxu1 %v8814_v12 }
 0x1ac   :  { %5636 = vmatpush.bf16.msrb.mxu2 %v8822_v13  ;;  %v8836_v13 = vld [vmem:[%s10973_s3 + $0xe18] sm:$0xff] }
 0x1ad   :  { %5649 = vmatpush.bf16.msrb.mxu3 %v8830_v14  ;;  %v8844_v14 = vld [vmem:[%s10973_s3 + $0xe58] sm:$0xff] }
 0x1ae   :  { %5611 = vmatpush.bf16.msrb.mxu0 %v8805_v17  ;;  %v5385_v43 = vpop.f32.mrf.mxu2 }
 0x1af   :  { %5624 = vmatpush.bf16.msrb.mxu1 %v8813_v18  ;;  %v5398_v44 = vpop.f32.mrf.mxu3  ;;  %v8872_v43 = vld [vmem:[%s10973_s3 + $0xf38] sm:$0xff] }
 0x1b0   :  { %5637 = vmatpush.bf16.msrb.mxu2 %v8821_v20  ;;  %v8880_v44 = vld [vmem:[%s10973_s3 + $0xf78] sm:$0xff] }
 0x1b1   :  { %5650 = vmatpush.bf16.msrb.mxu3 %v8829_v21 }
 0x1b2   :  { %5612 = vmatpush.bf16.msrb.mxu0 %v8804_v23  ;;  %v8843_v23 = vld [vmem:[%s10973_s3 + $0xe50] sm:$0xff] }
 0x1b3   :  { %5625 = vmatpush.bf16.msrb.mxu1 %v8812_v24 }
 0x1b4   :  { %5638 = vmatpush.bf16.msrb.mxu2 %v8820_v25  ;;  %v8851_v25 = vld [vmem:[%s10973_s3 + $0xe90] sm:$0xff] }
 0x1b5   :  { %5651 = vmatpush.bf16.msrb.mxu3 %v8828_v26  ;;  %v8859_v26 = vld [vmem:[%s10973_s3 + $0xed0] sm:$0xff] }
 0x1b6   :  { %5613 = vmatpush.bf16.msrb.mxu0 %v8803_v32  ;;  %v61_v32 = vld [vmem:[%s10974_s2 + $0xe8] sm:$0xff] }
 0x1b7   :  { %5626 = vmatpush.bf16.msrb.mxu1 %v8811_v33  ;;  %v1319_v42 = vunpack.c.h.b16 %v61_v32 }
 0x1b8   :  { %5639 = vmatpush.bf16.msrb.mxu2 %v8819_v35  ;;  %v8833_v35 = vld [vmem:[%s10973_s3 + $0xe00] sm:$0xff] }
 0x1b9   :  { %5652 = vmatpush.bf16.msrb.mxu3 %v8827_v36  ;;  %v8841_v36 = vld [vmem:[%s10973_s3 + $0xe40] sm:$0xff] }
 0x1ba   :  { %5614 = vmatpush.bf16.msrb.mxu0 %v8802_v37 }
 0x1bb   :  { %5627 = vmatpush.bf16.msrb.mxu1 %v8810_v38  ;;  %v1318_v38 = vunpack.c.l.b16 %v61_v32 }
 0x1bc   :  { %5640 = vmatpush.bf16.msrb.mxu2 %v8818_v39  ;;  %v8849_v39 = vld [vmem:[%s10973_s3 + $0xe80] sm:$0xff] }
 0x1bd   :  { %5653 = vmatpush.bf16.msrb.mxu3 %v8826_v40  ;;  %v8857_v40 = vld [vmem:[%s10973_s3 + $0xec0] sm:$0xff]  ;;  %v1390_v48 = vpack.c.b16 %v1318_v38, %v1318_v38 }
 0x1be   :  { %5615 = vmatpush.bf16.msrb.mxu0 %v8801_v45  ;;  %v5409_v5 = vpop.f32.mrf.mxu0  ;;  %v8888_v45 = vld [vmem:[%s10973_s3 + $0xfb8] sm:$0xff] }
 0x1bf   :  { %5628 = vmatpush.bf16.msrb.mxu1 %v8809_v46  ;;  %v5410_v6 = vadd.f32 %v5409_v5, %v10445_v31  ;;  %v5422_v9 = vpop.f32.mrf.mxu1  ;;  %v60_v31 = vld [vmem:[%s10974_s2 + $0xe0] sm:$0xff]  ;;  %v8896_v46 = vld [vmem:[%s10973_s3 + $0xff8] sm:$0xff] }
 0x1c0   :  { %5641 = vmatpush.bf16.msrb.mxu2 %v8817_v49  ;;  %v1316_v37 = vunpack.c.l.b16 %v60_v31  ;;  %v1317_v41 = vunpack.c.h.b16 %v60_v31  ;;  %v8884_v5 = vld [vmem:[%s10973_s3 + $0xf98] sm:$0xff] }
 0x1c1   :  { %5654 = vmatpush.bf16.msrb.mxu3 %v8825_v50  ;;  %5616 = vmatmul.bf16.vlgmr.msrb.gmra.mxu0 %v1384_v57  ;;  %v5423_v12 = vadd.f32 %v5422_v9, %v5410_v6  ;;  %v1391_v50 = vpack.c.b16 %v1319_v42, %v1319_v42  ;;  %v8886_v57 = vld [vmem:[%s10973_s3 + $0xfa8] sm:$0xff]  ;;  %v8892_v6 = vld [vmem:[%s10973_s3 + $0xfd8] sm:$0xff]  ;;  %v8911_v42 = vld [vmem:[%s10973_s3 + $0x1070] sm:$0xff] }
 0x1c2   :  { %5660 = vmatpush.bf16.msra.mxu0 %v8840_v53  ;;  %5629 = vmatmul.bf16.vlgmr.msrb.gmra.mxu1 %v1385_v59  ;;  %v1388_v47 = vpack.c.b16 %v1316_v37, %v1316_v37  ;;  %v1389_v49 = vpack.c.b16 %v1317_v41, %v1317_v41  ;;  %v8887_v53 = vld [vmem:[%s10973_s3 + $0xfb0] sm:$0xff] }
 0x1c3   :  { %5673 = vmatpush.bf16.msra.mxu1 %v8848_v54  ;;  %5642 = vmatmul.bf16.vlgmr.msrb.gmra.mxu2 %v1386_v58  ;;  %v8895_v54 = vld [vmem:[%s10973_s3 + $0xff0] sm:$0xff]  ;;  %v8894_v58 = vld [vmem:[%s10973_s3 + $0xfe8] sm:$0xff] }
 0x1c4   :  { %5686 = vmatpush.bf16.msra.mxu2 %v8856_v55  ;;  %5655 = vmatmul.bf16.vlgmr.msrb.gmra.mxu3 %v1387_v60  ;;  %v8870_v55 = vld [vmem:[%s10973_s3 + $0xf28] sm:$0xff]  ;;  %v8903_v41 = vld [vmem:[%s10973_s3 + $0x1030] sm:$0xff] }
 0x1c5   :  { %5699 = vmatpush.bf16.msra.mxu3 %v8864_v56  ;;  %v8878_v56 = vld [vmem:[%s10973_s3 + $0xf68] sm:$0xff] }
 0x1c6   :  { %5661 = vmatpush.bf16.msra.mxu0 %v8839_v61  ;;  %v5435_v17 = vpop.f32.mrf.mxu2  ;;  %v5411_v20 = vpop.f32.mrf.mxu0  ;;  %v8869_v61 = vld [vmem:[%s10973_s3 + $0xf20] sm:$0xff] }
 0x1c7   :  { %5674 = vmatpush.bf16.msra.mxu1 %v8847_v62  ;;  %v5436_v18 = vadd.f32 %v5435_v17, %v5423_v12  ;;  %v5448_v19 = vpop.f32.mrf.mxu3  ;;  %v5424_v24 = vpop.f32.mrf.mxu1  ;;  %v8877_v62 = vld [vmem:[%s10973_s3 + $0xf60] sm:$0xff]  ;;  %v8867_v12 = vld [vmem:[%s10973_s3 + $0xf10] sm:$0xff]  ;;  %v8866_v17 = vld [vmem:[%s10973_s3 + $0xf08] sm:$0xff] }
 0x1c8   :  { %5687 = vmatpush.bf16.msra.mxu2 %v8855_v63  ;;  %v8890_v20 = vld [vmem:[%s10973_s3 + $0xfc8] sm:$0xff] }
 0x1c9   :  { %5700 = vmatpush.bf16.msra.mxu3 %v8863_v0  ;;  %v10550_v21 = vadd.f32 %v5448_v19, %v5436_v18  ;;  %v8885_v0 = vld [vmem:[%s10973_s3 + $0xfa0] sm:$0xff]  ;;  %v8874_v18 = vld [vmem:[%s10973_s3 + $0xf48] sm:$0xff] }
 0x1ca   :  { %5662 = vmatpush.bf16.msra.mxu0 %v8838_v1  ;;  %v8893_v1 = vld [vmem:[%s10973_s3 + $0xfe0] sm:$0xff]  ;;  %v8882_v19 = vld [vmem:[%s10973_s3 + $0xf88] sm:$0xff] }
 0x1cb   :  { %5675 = vmatpush.bf16.msra.mxu1 %v8846_v2 }
 0x1cc   :  { %5688 = vmatpush.bf16.msra.mxu2 %v8854_v3  ;;  %v8868_v3 = vld [vmem:[%s10973_s3 + $0xf18] sm:$0xff] }
 0x1cd   :  { %5701 = vmatpush.bf16.msra.mxu3 %v8862_v4  ;;  %v8876_v4 = vld [vmem:[%s10973_s3 + $0xf58] sm:$0xff] }
 0x1ce   :  { %5663 = vmatpush.bf16.msra.mxu0 %v8837_v7  ;;  %v5437_v33 = vpop.f32.mrf.mxu2 }
 0x1cf   :  { %5676 = vmatpush.bf16.msra.mxu1 %v8845_v8  ;;  %v5450_v34 = vpop.f32.mrf.mxu3  ;;  %v8904_v33 = vld [vmem:[%s10973_s3 + $0x1038] sm:$0xff] }
 0x1d0   :  { %5689 = vmatpush.bf16.msra.mxu2 %v8853_v10  ;;  %v8912_v34 = vld [vmem:[%s10973_s3 + $0x1078] sm:$0xff] }
 0x1d1   :  { %5702 = vmatpush.bf16.msra.mxu3 %v8861_v11 }
 0x1d2   :  { %5664 = vmatpush.bf16.msra.mxu0 %v8836_v13  ;;  %v8875_v13 = vld [vmem:[%s10973_s3 + $0xf50] sm:$0xff] }
 0x1d3   :  { %5677 = vmatpush.bf16.msra.mxu1 %v8844_v14 }
 0x1d4   :  { %5690 = vmatpush.bf16.msra.mxu2 %v8852_v15  ;;  %v8883_v15 = vld [vmem:[%s10973_s3 + $0xf90] sm:$0xff] }
 0x1d5   :  { %5703 = vmatpush.bf16.msra.mxu3 %v8860_v16  ;;  %v8891_v16 = vld [vmem:[%s10973_s3 + $0xfd0] sm:$0xff] }
 0x1d6   :  { %5665 = vmatpush.bf16.msra.mxu0 %v8835_v22  ;;  %v63_v22 = vld [vmem:[%s10974_s2 + $0xf8] sm:$0xff] }
 0x1d7   :  { %5678 = vmatpush.bf16.msra.mxu1 %v8843_v23  ;;  %v1323_v32 = vunpack.c.h.b16 %v63_v22 }
 0x1d8   :  { %5691 = vmatpush.bf16.msra.mxu2 %v8851_v25  ;;  %v8865_v25 = vld [vmem:[%s10973_s3 + $0xf00] sm:$0xff] }
 0x1d9   :  { %5704 = vmatpush.bf16.msra.mxu3 %v8859_v26  ;;  %v8873_v26 = vld [vmem:[%s10973_s3 + $0xf40] sm:$0xff] }
 0x1da   :  { %5666 = vmatpush.bf16.msra.mxu0 %v8834_v27 }
 0x1db   :  { %5679 = vmatpush.bf16.msra.mxu1 %v8842_v28  ;;  %v1322_v28 = vunpack.c.l.b16 %v63_v22 }
 0x1dc   :  { %5692 = vmatpush.bf16.msra.mxu2 %v8850_v29  ;;  %v8881_v29 = vld [vmem:[%s10973_s3 + $0xf80] sm:$0xff] }
 0x1dd   :  { %5705 = vmatpush.bf16.msra.mxu3 %v8858_v30  ;;  %v8889_v30 = vld [vmem:[%s10973_s3 + $0xfc0] sm:$0xff]  ;;  %v1394_v38 = vpack.c.b16 %v1322_v28, %v1322_v28 }
 0x1de   :  { %5667 = vmatpush.bf16.msra.mxu0 %v8833_v35  ;;  %v5461_v59 = vpop.f32.mrf.mxu0  ;;  %v8920_v35 = vld [vmem:[%s10973_s3 + $0x10b8] sm:$0xff] }
 0x1df   :  { %5680 = vmatpush.bf16.msra.mxu1 %v8841_v36  ;;  %v5462_v60 = vadd.f32 %v5461_v59, %v10550_v21  ;;  %v5474_v63 = vpop.f32.mrf.mxu1  ;;  %v62_v21 = vld [vmem:[%s10974_s2 + $0xf0] sm:$0xff]  ;;  %v8928_v36 = vld [vmem:[%s10973_s3 + $0x10f8] sm:$0xff] }
 0x1e0   :  { %5693 = vmatpush.bf16.msra.mxu2 %v8849_v39  ;;  %v1320_v27 = vunpack.c.l.b16 %v62_v21  ;;  %v1321_v31 = vunpack.c.h.b16 %v62_v21  ;;  %v8916_v59 = vld [vmem:[%s10973_s3 + $0x1098] sm:$0xff] }
 0x1e1   :  { %5706 = vmatpush.bf16.msra.mxu3 %v8857_v40  ;;  %5668 = vmatmul.bf16.vlgmr.msra.gmra.mxu0 %v1388_v47  ;;  %v5475_v2 = vadd.f32 %v5474_v63, %v5462_v60  ;;  %v1395_v40 = vpack.c.b16 %v1323_v32, %v1323_v32  ;;  %v8918_v47 = vld [vmem:[%s10973_s3 + $0x10a8] sm:$0xff]  ;;  %v8924_v60 = vld [vmem:[%s10973_s3 + $0x10d8] sm:$0xff]  ;;  %v8943_v32 = vld [vmem:[%s10973_s3 + $0x1170] sm:$0xff] }
 0x1e2   :  { %5712 = vmatpush.bf16.msrb.mxu0 %v8872_v43  ;;  %5681 = vmatmul.bf16.vlgmr.msra.gmra.mxu1 %v1389_v49  ;;  %v1392_v37 = vpack.c.b16 %v1320_v27, %v1320_v27  ;;  %v1393_v39 = vpack.c.b16 %v1321_v31, %v1321_v31  ;;  %v8919_v43 = vld [vmem:[%s10973_s3 + $0x10b0] sm:$0xff] }
 0x1e3   :  { %5725 = vmatpush.bf16.msrb.mxu1 %v8880_v44  ;;  %5694 = vmatmul.bf16.vlgmr.msra.gmra.mxu2 %v1390_v48  ;;  %v8927_v44 = vld [vmem:[%s10973_s3 + $0x10f0] sm:$0xff]  ;;  %v8926_v48 = vld [vmem:[%s10973_s3 + $0x10e8] sm:$0xff] }
 0x1e4   :  { %5738 = vmatpush.bf16.msrb.mxu2 %v8888_v45  ;;  %5707 = vmatmul.bf16.vlgmr.msra.gmra.mxu3 %v1391_v50  ;;  %v8902_v45 = vld [vmem:[%s10973_s3 + $0x1028] sm:$0xff]  ;;  %v8935_v31 = vld [vmem:[%s10973_s3 + $0x1130] sm:$0xff] }
 0x1e5   :  { %5751 = vmatpush.bf16.msrb.mxu3 %v8896_v46  ;;  %v8910_v46 = vld [vmem:[%s10973_s3 + $0x1068] sm:$0xff] }
 0x1e6   :  { %5713 = vmatpush.bf16.msrb.mxu0 %v8871_v51  ;;  %v5487_v7 = vpop.f32.mrf.mxu2  ;;  %v5463_v10 = vpop.f32.mrf.mxu0  ;;  %v8901_v51 = vld [vmem:[%s10973_s3 + $0x1020] sm:$0xff] }
 0x1e7   :  { %5726 = vmatpush.bf16.msrb.mxu1 %v8879_v52  ;;  %v5488_v8 = vadd.f32 %v5487_v7, %v5475_v2  ;;  %v5500_v9 = vpop.f32.mrf.mxu3  ;;  %v5476_v14 = vpop.f32.mrf.mxu1  ;;  %v8909_v52 = vld [vmem:[%s10973_s3 + $0x1060] sm:$0xff]  ;;  %v8899_v2 = vld [vmem:[%s10973_s3 + $0x1010] sm:$0xff]  ;;  %v8898_v7 = vld [vmem:[%s10973_s3 + $0x1008] sm:$0xff] }
 0x1e8   :  { %5739 = vmatpush.bf16.msrb.mxu2 %v8887_v53  ;;  %v8922_v10 = vld [vmem:[%s10973_s3 + $0x10c8] sm:$0xff] }
 0x1e9   :  { %5752 = vmatpush.bf16.msrb.mxu3 %v8895_v54  ;;  %v10655_v11 = vadd.f32 %v5500_v9, %v5488_v8  ;;  %v8917_v54 = vld [vmem:[%s10973_s3 + $0x10a0] sm:$0xff]  ;;  %v8906_v8 = vld [vmem:[%s10973_s3 + $0x1048] sm:$0xff] }
 0x1ea   :  { %5714 = vmatpush.bf16.msrb.mxu0 %v8870_v55  ;;  %v8925_v55 = vld [vmem:[%s10973_s3 + $0x10e0] sm:$0xff]  ;;  %v8914_v9 = vld [vmem:[%s10973_s3 + $0x1088] sm:$0xff] }
 0x1eb   :  { %5727 = vmatpush.bf16.msrb.mxu1 %v8878_v56 }
 0x1ec   :  { %5740 = vmatpush.bf16.msrb.mxu2 %v8886_v57  ;;  %v8900_v57 = vld [vmem:[%s10973_s3 + $0x1018] sm:$0xff] }
 0x1ed   :  { %5753 = vmatpush.bf16.msrb.mxu3 %v8894_v58  ;;  %v8908_v58 = vld [vmem:[%s10973_s3 + $0x1058] sm:$0xff] }
 0x1ee   :  { %5715 = vmatpush.bf16.msrb.mxu0 %v8869_v61  ;;  %v5489_v23 = vpop.f32.mrf.mxu2 }
 0x1ef   :  { %5728 = vmatpush.bf16.msrb.mxu1 %v8877_v62  ;;  %v5502_v24 = vpop.f32.mrf.mxu3  ;;  %v8936_v23 = vld [vmem:[%s10973_s3 + $0x1138] sm:$0xff] }
 0x1f0   :  { %5741 = vmatpush.bf16.msrb.mxu2 %v8885_v0  ;;  %v8944_v24 = vld [vmem:[%s10973_s3 + $0x1178] sm:$0xff] }
 0x1f1   :  { %5754 = vmatpush.bf16.msrb.mxu3 %v8893_v1 }
 0x1f2   :  { %5716 = vmatpush.bf16.msrb.mxu0 %v8868_v3  ;;  %v8907_v3 = vld [vmem:[%s10973_s3 + $0x1050] sm:$0xff] }
 0x1f3   :  { %5729 = vmatpush.bf16.msrb.mxu1 %v8876_v4 }
 0x1f4   :  { %5742 = vmatpush.bf16.msrb.mxu2 %v8884_v5  ;;  %v8915_v5 = vld [vmem:[%s10973_s3 + $0x1090] sm:$0xff] }
 0x1f5   :  { %5755 = vmatpush.bf16.msrb.mxu3 %v8892_v6  ;;  %v8923_v6 = vld [vmem:[%s10973_s3 + $0x10d0] sm:$0xff] }
 0x1f6   :  { %5717 = vmatpush.bf16.msrb.mxu0 %v8867_v12  ;;  %v65_v12 = vld [vmem:[%s10974_s2 + $0x108] sm:$0xff] }
 0x1f7   :  { %5730 = vmatpush.bf16.msrb.mxu1 %v8875_v13  ;;  %v1327_v22 = vunpack.c.h.b16 %v65_v12 }
 0x1f8   :  { %5743 = vmatpush.bf16.msrb.mxu2 %v8883_v15  ;;  %v8897_v15 = vld [vmem:[%s10973_s3 + $0x1000] sm:$0xff] }
 0x1f9   :  { %5756 = vmatpush.bf16.msrb.mxu3 %v8891_v16  ;;  %v8905_v16 = vld [vmem:[%s10973_s3 + $0x1040] sm:$0xff] }
 0x1fa   :  { %5718 = vmatpush.bf16.msrb.mxu0 %v8866_v17 }
 0x1fb   :  { %5731 = vmatpush.bf16.msrb.mxu1 %v8874_v18  ;;  %v1326_v18 = vunpack.c.l.b16 %v65_v12 }
 0x1fc   :  { %5744 = vmatpush.bf16.msrb.mxu2 %v8882_v19  ;;  %v8913_v19 = vld [vmem:[%s10973_s3 + $0x1080] sm:$0xff] }
 0x1fd   :  { %5757 = vmatpush.bf16.msrb.mxu3 %v8890_v20  ;;  %v8921_v20 = vld [vmem:[%s10973_s3 + $0x10c0] sm:$0xff]  ;;  %v1398_v28 = vpack.c.b16 %v1326_v18, %v1326_v18 }
 0x1fe   :  { %5719 = vmatpush.bf16.msrb.mxu0 %v8865_v25  ;;  %v5513_v49 = vpop.f32.mrf.mxu0  ;;  %v8952_v25 = vld [vmem:[%s10973_s3 + $0x11b8] sm:$0xff] }
 0x1ff   :  { %5732 = vmatpush.bf16.msrb.mxu1 %v8873_v26  ;;  %v5514_v50 = vadd.f32 %v5513_v49, %v10655_v11  ;;  %v5526_v53 = vpop.f32.mrf.mxu1  ;;  %v64_v11 = vld [vmem:[%s10974_s2 + $0x100] sm:$0xff]  ;;  %v8960_v26 = vld [vmem:[%s10973_s3 + $0x11f8] sm:$0xff] }
 0x200   :  { %5745 = vmatpush.bf16.msrb.mxu2 %v8881_v29  ;;  %v1324_v17 = vunpack.c.l.b16 %v64_v11  ;;  %v1325_v21 = vunpack.c.h.b16 %v64_v11  ;;  %v8932_v49 = vld [vmem:[%s10973_s3 + $0x1118] sm:$0xff]  ;;  %v8937_v11 = vld [vmem:[%s10973_s3 + $0x1140] sm:$0xff] }
 0x201   :  { %5758 = vmatpush.bf16.msrb.mxu3 %v8889_v30  ;;  %5720 = vmatmul.bf16.vlgmr.msrb.gmra.mxu0 %v1392_v37  ;;  %v5527_v56 = vadd.f32 %v5526_v53, %v5514_v50  ;;  %v1399_v30 = vpack.c.b16 %v1327_v22, %v1327_v22  ;;  %v5908_v37 = vld [vmem:[%s10976_s0] sm:$0xff]  ;;  %v8940_v50 = vld [vmem:[%s10973_s3 + $0x1158] sm:$0xff] }
 0x202   :  { %5764 = vmatpush.bf16.msra.mxu0 %v8904_v33  ;;  %5733 = vmatmul.bf16.vlgmr.msrb.gmra.mxu1 %v1393_v39  ;;  %v1396_v27 = vpack.c.b16 %v1324_v17, %v1324_v17  ;;  %v1397_v29 = vpack.c.b16 %v1325_v21, %v1325_v21  ;;  %v8951_v33 = vld [vmem:[%s10973_s3 + $0x11b0] sm:$0xff]  ;;  %v8958_v39 = vld [vmem:[%s10973_s3 + $0x11e8] sm:$0xff]  ;;  %v8956_v53 = vld [vmem:[%s10973_s3 + $0x11d8] sm:$0xff] }
 0x203   :  { %5777 = vmatpush.bf16.msra.mxu1 %v8912_v34  ;;  %5746 = vmatmul.bf16.vlgmr.msrb.gmra.mxu2 %v1394_v38  ;;  %v8959_v34 = vld [vmem:[%s10973_s3 + $0x11f0] sm:$0xff]  ;;  %v8950_v38 = vld [vmem:[%s10973_s3 + $0x11a8] sm:$0xff] }
 0x204   :  { %5790 = vmatpush.bf16.msra.mxu2 %v8920_v35  ;;  %5759 = vmatmul.bf16.vlgmr.msrb.gmra.mxu3 %v1395_v40  ;;  %v8934_v35 = vld [vmem:[%s10973_s3 + $0x1128] sm:$0xff]  ;;  %v8980_v40 = vmov 0  }
 0x205   :  { %5803 = vmatpush.bf16.msra.mxu3 %v8928_v36  ;;  %v8942_v36 = vld [vmem:[%s10973_s3 + $0x1168] sm:$0xff]  ;;  %8963 = vset.pattern.permute.xlu0 %v8980_v40 }
 0x206   :  { %5765 = vmatpush.bf16.msra.mxu0 %v8903_v41  ;;  %v5539_v61 = vpop.f32.mrf.mxu2  ;;  %v5515_v0 = vpop.f32.mrf.mxu0  ;;  %5912 = vperm.xlu0 %8963, %v5908_v37  }
 0x207   :  { %5778 = vmatpush.bf16.msra.mxu1 %v8911_v42  ;;  %v5540_v62 = vadd.f32 %v5539_v61, %v5527_v56  ;;  %v5552_v63 = vpop.f32.mrf.mxu3  ;;  %v5528_v4 = vpop.f32.mrf.mxu1  ;;  %v8930_v0 = vld [vmem:[%s10973_s3 + $0x1108] sm:$0xff] }
 0x208   :  { %5791 = vmatpush.bf16.msra.mxu2 %v8919_v43  ;;  %v8933_v43 = vld [vmem:[%s10973_s3 + $0x1120] sm:$0xff]  ;;  %v8954_v4 = vld [vmem:[%s10973_s3 + $0x11c8] sm:$0xff] }
 0x209   :  { %5804 = vmatpush.bf16.msra.mxu3 %v8927_v44  ;;  %v10760_v1 = vadd.f32 %v5552_v63, %v5540_v62  ;;  %v8941_v44 = vld [vmem:[%s10973_s3 + $0x1160] sm:$0xff]  ;;  %v8947_v62 = vld [vmem:[%s10973_s3 + $0x1190] sm:$0xff] }
 0x20a   :  { %5766 = vmatpush.bf16.msra.mxu0 %v8902_v45  ;;  %v8955_v63 = vld [vmem:[%s10973_s3 + $0x11d0] sm:$0xff] }
 0x20b   :  { %5779 = vmatpush.bf16.msra.mxu1 %v8910_v46  ;;  %v8949_v46 = vld [vmem:[%s10973_s3 + $0x11a0] sm:$0xff] }
 0x20c   :  { %5792 = vmatpush.bf16.msra.mxu2 %v8918_v47  ;;  %v8957_v47 = vld [vmem:[%s10973_s3 + $0x11e0] sm:$0xff] }
 0x20d   :  { %5805 = vmatpush.bf16.msra.mxu3 %v8926_v48 }
 0x20e   :  { %5767 = vmatpush.bf16.msra.mxu0 %v8901_v51  ;;  %v5541_v13 = vpop.f32.mrf.mxu2  ;;  %v5924_v51 = vld [vmem:[%s10977_s1] sm:$0xff] }
 0x20f   :  { %5780 = vmatpush.bf16.msra.mxu1 %v8909_v52  ;;  %v5554_v14 = vpop.f32.mrf.mxu3  ;;  %v8948_v52 = vld [vmem:[%s10973_s3 + $0x1198] sm:$0xff]  ;;  %5927 = vperm.xlu0 %8963, %v5924_v51  }
 0x210   :  { %5793 = vmatpush.bf16.msra.mxu2 %v8917_v54  ;;  %v8945_v14 = vld [vmem:[%s10973_s3 + $0x1180] sm:$0xff] }
 0x211   :  { %5806 = vmatpush.bf16.msra.mxu3 %v8925_v55 }
 0x212   :  { %5768 = vmatpush.bf16.msra.mxu0 %v8900_v57 }
 0x213   :  { %5781 = vmatpush.bf16.msra.mxu1 %v8908_v58 }
 0x214   :  { %5794 = vmatpush.bf16.msra.mxu2 %v8916_v59  ;;  %v8931_v59 = vld [vmem:[%s10973_s3 + $0x1110] sm:$0xff] }
 0x215   :  { %5807 = vmatpush.bf16.msra.mxu3 %v8924_v60  ;;  %v8939_v60 = vld [vmem:[%s10973_s3 + $0x1150] sm:$0xff] }
 0x216   :  { %5769 = vmatpush.bf16.msra.mxu0 %v8899_v2  ;;  %v66_v2 = vld [vmem:[%s10974_s2 + $0x110] sm:$0xff] }
 0x217   :  { %5782 = vmatpush.bf16.msra.mxu1 %v8907_v3  ;;  %v8946_v3 = vld [vmem:[%s10973_s3 + $0x1188] sm:$0xff] }
 0x218   :  { %5795 = vmatpush.bf16.msra.mxu2 %v8915_v5  ;;  %v67_v5 = vld [vmem:[%s10974_s2 + $0x118] sm:$0xff] }
 0x219   :  { %5808 = vmatpush.bf16.msra.mxu3 %v8923_v6  ;;  %v1330_v12 = vunpack.c.l.b16 %v67_v5  ;;  %v1331_v13 = vunpack.c.h.b16 %v67_v5 }
 0x21a   :  { %5770 = vmatpush.bf16.msra.mxu0 %v8898_v7 }
 0x21b   :  { %5783 = vmatpush.bf16.msra.mxu1 %v8906_v8  ;;  %v1328_v8 = vunpack.c.l.b16 %v66_v2  ;;  %v1402_v18 = vpack.c.b16 %v1330_v12, %v1330_v12 }
 0x21c   :  { %5796 = vmatpush.bf16.msra.mxu2 %v8914_v9  ;;  %v1329_v9 = vunpack.c.h.b16 %v66_v2 }
 0x21d   :  { %5809 = vmatpush.bf16.msra.mxu3 %v8922_v10  ;;  %v8929_v10 = vld [vmem:[%s10973_s3 + $0x1100] sm:$0xff] }
 0x21e   :  { %5771 = vmatpush.bf16.msra.mxu0 %v8897_v15  ;;  %v5565_v41 = vpop.f32.mrf.mxu0  ;;  %v8953_v15 = vld [vmem:[%s10973_s3 + $0x11c0] sm:$0xff]  ;;  %v1401_v17 = vpack.c.b16 %v1329_v9, %v1329_v9 }
 0x21f   :  { %5784 = vmatpush.bf16.msra.mxu1 %v8905_v16  ;;  %v5566_v42 = vadd.f32 %v5565_v41, %v10760_v1  ;;  %v5578_v45 = vpop.f32.mrf.mxu1  ;;  %v8938_v1 = vld [vmem:[%s10973_s3 + $0x1148] sm:$0xff]  ;;  %v1400_v16 = vpack.c.b16 %v1328_v8, %v1328_v8 }
 0x220   :  { %5797 = vmatpush.bf16.msra.mxu2 %v8913_v19  ;;  %v1403_v19 = vpack.c.b16 %v1331_v13, %v1331_v13 }
 0x221   :  { %5810 = vmatpush.bf16.msra.mxu3 %v8921_v20  ;;  %5772 = vmatmul.bf16.vlgmr.msra.gmra.mxu0 %v1396_v27  ;;  %v5579_v48 = vadd.f32 %v5578_v45, %v5566_v42 }
 0x222   :  { %5816 = vmatpush.bf16.msrb.mxu0 %v8936_v23  ;;  %5785 = vmatmul.bf16.vlgmr.msra.gmra.mxu1 %v1397_v29 }
 0x223   :  { %5829 = vmatpush.bf16.msrb.mxu1 %v8944_v24  ;;  %5798 = vmatmul.bf16.vlgmr.msra.gmra.mxu2 %v1398_v28 }
 0x224   :  { %5842 = vmatpush.bf16.msrb.mxu2 %v8952_v25  ;;  %5811 = vmatmul.bf16.vlgmr.msra.gmra.mxu3 %v1399_v30 }
 0x225   :  { %5855 = vmatpush.bf16.msrb.mxu3 %v8960_v26 }
 0x226   :  { %5817 = vmatpush.bf16.msrb.mxu0 %v8935_v31  ;;  %v5591_v54 = vpop.f32.mrf.mxu2  ;;  %v5567_v57 = vpop.f32.mrf.mxu0 }
 0x227   :  { %5830 = vmatpush.bf16.msrb.mxu1 %v8943_v32  ;;  %v5592_v55 = vadd.f32 %v5591_v54, %v5579_v48  ;;  %v5604_v56 = vpop.f32.mrf.mxu3  ;;  %v5580_v61 = vpop.f32.mrf.mxu1  ;;  %v8966_v54 = vld [vmem:[%s10979_s6] ss:$0 sm:$0xff] }
 0x228   :  { %5843 = vmatpush.bf16.msrb.mxu2 %v8951_v33 }
 0x229   :  { %5856 = vmatpush.bf16.msrb.mxu3 %v8959_v34  ;;  %v5605_v58 = vadd.f32 %v5604_v56, %v5592_v55 }
 0x22a   :  { %5818 = vmatpush.bf16.msrb.mxu0 %v8934_v35 }
 0x22b   :  { %5831 = vmatpush.bf16.msrb.mxu1 %v8942_v36 }
 0x22c   :  { %5844 = vmatpush.bf16.msrb.mxu2 %v8950_v38 }
 0x22d   :  { %5857 = vmatpush.bf16.msrb.mxu3 %v8958_v39 }
 0x22e   :  { %5819 = vmatpush.bf16.msrb.mxu0 %v8933_v43  ;;  %v5593_v6 = vpop.f32.mrf.mxu2 }
 0x22f   :  { %5832 = vmatpush.bf16.msrb.mxu1 %v8941_v44  ;;  %v5606_v7 = vpop.f32.mrf.mxu3 }
 0x230   :  { %5845 = vmatpush.bf16.msrb.mxu2 %v8949_v46 }
 0x231   :  { %5858 = vmatpush.bf16.msrb.mxu3 %v8957_v47 }
 0x232   :  { %5820 = vmatpush.bf16.msrb.mxu0 %v8932_v49 }
 0x233   :  { %5833 = vmatpush.bf16.msrb.mxu1 %v8940_v50 }
 0x234   :  { %5846 = vmatpush.bf16.msrb.mxu2 %v8948_v52  ;;  %v8965_v52 = vld [vmem:[%s10978_s5] ss:$0 sm:$0xff] }
 0x235   :  { %5859 = vmatpush.bf16.msrb.mxu3 %v8956_v53 }
 0x236   :  { %5821 = vmatpush.bf16.msrb.mxu0 %v8931_v59 }
 0x237   :  { %5834 = vmatpush.bf16.msrb.mxu1 %v8939_v60 }
 0x238   :  { %5847 = vmatpush.bf16.msrb.mxu2 %v8947_v62 }
 0x239   :  { %5860 = vmatpush.bf16.msrb.mxu3 %v8955_v63 }
 0x23a   :  { %5822 = vmatpush.bf16.msrb.mxu0 %v8930_v0 }
 0x23b   :  { %5835 = vmatpush.bf16.msrb.mxu1 %v8938_v1 }
 0x23c   :  { %5848 = vmatpush.bf16.msrb.mxu2 %v8946_v3 }
 0x23d   :  { %5861 = vmatpush.bf16.msrb.mxu3 %v8954_v4 }
 0x23e   :  { %5823 = vmatpush.bf16.msrb.mxu0 %v8929_v10  ;;  %v5617_v20 = vpop.f32.mrf.mxu0 }
 0x23f   :  { %5836 = vmatpush.bf16.msrb.mxu1 %v8937_v11  ;;  %v5618_v21 = vadd.f32 %v5617_v20, %v5605_v58  ;;  %v5630_v22 = vpop.f32.mrf.mxu1 }
 0x240   :  { %5849 = vmatpush.bf16.msrb.mxu2 %v8945_v14 }
 0x241   :  { %5862 = vmatpush.bf16.msrb.mxu3 %v8953_v15  ;;  %5824 = vmatmul.bf16.vlgmr.msrb.gmra.mxu0 %v1400_v16  ;;  %v5631_v23 = vadd.f32 %v5630_v22, %v5618_v21 }
 0x242   :  { %5837 = vmatmul.bf16.vlgmr.msrb.gmra.mxu1 %v1401_v17 }
 0x243   :  { %5850 = vmatmul.bf16.vlgmr.msrb.gmra.mxu2 %v1402_v18 }
 0x244   :  { %5863 = vmatmul.bf16.vlgmr.msrb.gmra.mxu3 %v1403_v19 }
 0x246   :  { %v5643_v24 = vpop.f32.mrf.mxu2  ;;  %v5619_v27 = vpop.f32.mrf.mxu0 }
 0x247   :  { %v5644_v25 = vadd.f32 %v5643_v24, %v5631_v23  ;;  %v5656_v26 = vpop.f32.mrf.mxu3  ;;  %v5632_v29 = vpop.f32.mrf.mxu1 }
 0x249   :  { %v5657_v28 = vadd.f32 %v5656_v26, %v5644_v25 }
 0x24e   :  { %v5645_v30 = vpop.f32.mrf.mxu2 }
 0x24f   :  { %v5658_v31 = vpop.f32.mrf.mxu3 }
 0x25e   :  { %v5669_v32 = vpop.f32.mrf.mxu0 }
 0x25f   :  { %v5670_v33 = vadd.f32 %v5669_v32, %v5657_v28  ;;  %v5682_v34 = vpop.f32.mrf.mxu1 }
 0x261   :  { %v5683_v35 = vadd.f32 %v5682_v34, %v5670_v33 }
 0x266   :  { %v5695_v36 = vpop.f32.mrf.mxu2  ;;  %v5671_v39 = vpop.f32.mrf.mxu0 }
 0x267   :  { %v5696_v37 = vadd.f32 %v5695_v36, %v5683_v35  ;;  %v5708_v38 = vpop.f32.mrf.mxu3  ;;  %v5684_v41 = vpop.f32.mrf.mxu1 }
 0x269   :  { %v5709_v40 = vadd.f32 %v5708_v38, %v5696_v37 }
 0x26e   :  { %v5697_v42 = vpop.f32.mrf.mxu2 }
 0x26f   :  { %v5710_v43 = vpop.f32.mrf.mxu3 }
 0x278   :  { %v5913_v53 = vpop.permute.xlu0 %5912 }
 0x279   :  { %v5918_v55 = vmul.f32 %v8965_v52, %v5913_v53 }
 0x27b   :  { %v10919_v56 = vadd.f32 %v8966_v54, %v5918_v55 }
 0x27e   :  { %v5721_v44 = vpop.f32.mrf.mxu0 }
 0x27f   :  { %v5734_v45 = vpop.f32.mrf.mxu1  ;;  %v5722_v63 = vadd.f32 %v5721_v44, %v5709_v40 }
 0x281   :  { %v5928_v59 = vpop.permute.xlu0 %5927  ;;  %v5735_v5 = vadd.f32 %v5734_v45, %v5722_v63 }
 0x282   :  { %v5930_v60 = vmul.f32 %v8965_v52, %v5928_v59 }
 0x284   :  { %v10921_v61 = vadd.f32 %v8966_v54, %v5930_v60  ;;  %v6016_v60 = vld [vmem:[%s10980_s7 + $0x18] sm:$0xff] }
 0x285   :  { %6060 = vmatpush.msra.mxu1 %v6016_v60 }
 0x286   :  { %v5747_v46 = vpop.f32.mrf.mxu2  ;;  %v5723_v48 = vpop.f32.mrf.mxu0  ;;  %v10924_v1 = vmul.f32 0.70710677, %v10921_v61 }
 0x287   :  { %v5760_v47 = vpop.f32.mrf.mxu3  ;;  %v5736_v49 = vpop.f32.mrf.mxu1  ;;  %v5748_v7 = vadd.f32 %v5747_v46, %v5735_v5 }
 0x288   :  { %v5936_v4 = vand.u32 2147483647, %v10924_v1  ;;  %vm5934_vm4 = vcmp.lt.f32.partialorder %v10924_v1, 0.0  ;;  %v6015_v1 = vld [vmem:[%s10980_s7 + $0x10] sm:$0xff] }
 0x289   :  { %v5761_v11 = vadd.f32 %v5760_v47, %v5748_v7  ;;  %6061 = vmatpush.msra.mxu1 %v6015_v1 }
 0x28a   :  { %v5937_v6 = vmul.f32 0.3275911, %v5936_v4  ;;  %v5963_v26 = vsub.f32 0.0, %v5936_v4 }
 0x28c   :  { %v5938_v8 = vadd.f32 1.0, %v5937_v6  ;;  %v5964_v31 = vmul.f32 %v5963_v26, %v5936_v4  ;;  %v6014_v4 = vld [vmem:[%s10980_s7 + $0x8] sm:$0xff] }
 0x28d   :  { %6062 = vmatpush.msra.mxu1 %v6014_v4 }
 0x28e   :  { %v5749_v50 = vpop.f32.mrf.mxu2  ;;  %8968 = vrcp.f32 %v5938_v8  ;;  %v5950_v16 = vand.u32 2147483648, %v5938_v8  ;;  %vm5944_vm0 = vweird.f32 %v5938_v8  ;;  %v5948_v18 = vand.u32 2147483647, %v5938_v8 }
 0x28f   :  { %v5762_v51 = vpop.f32.mrf.mxu3  ;;  %v5965_v37 = vmul.f32 1.442695, %v5964_v31 }
 0x290   :  { %v5951_v21 = vor.u32 1.1754944e-38, %v5950_v16  ;;  %vm5949_vm3 = vcmp.eq.f32.partialorder %v5948_v18, 8.507059e+37 }
 0x291   :  { %8970 = vpow2.f32 %v5965_v37 }
 0x294   :  { %v8969_v13 = vpop.eup %8968 }
 0x295   :  { %v5940_v14 = vmul.f32 %v8969_v13, %v5938_v8  ;;  %vm5945_vm1 = vweird.f32 %v8969_v13 }
 0x296   :  { %vm5946_vm2 = vmor %vm5944_vm0, %vm5945_vm1  ;;  %vm6073_vm0 = vcmask 15360  }
 0x297   :  { %v5941_v17 = vsub.f32 1.0, %v5940_v14  ;;  %v8971_v52 = vpop.eup %8970 }
 0x299   :  { %v5942_v20 = vmul.f32 %v8969_v13, %v5941_v17 }
 0x29b   :  { %v5943_v22 = vadd.f32 %v8969_v13, %v5942_v20 }
 0x29d   :  { %v5947_v27 = vsel %vm5946_vm2, %v8969_v13, %v5943_v22 }
 0x29e   :  { %v5773_v57 = vpop.f32.mrf.mxu0  ;;  %v5952_v29 = vsel %vm5949_vm3, %v5951_v21, %v5947_v27 }
 0x29f   :  { %v5786_v58 = vpop.f32.mrf.mxu1  ;;  %v5774_v12 = vadd.f32 %v5773_v57, %v5761_v11  ;;  %v5954_v30 = vmul.f32 1.0614054, %v5952_v29  ;;  %v8981_v57 = vmov 1.0  }
 0x2a1   :  { %v5787_v15 = vadd.f32 %v5786_v58, %v5774_v12  ;;  %v5955_v32 = vadd.f32 -1.4531521, %v5954_v30  ;;  %v5935_v58 = vsel %vm5934_vm4, -1.0, %v8981_v57 }
 0x2a3   :  { %v5956_v34 = vmul.f32 %v5955_v32, %v5952_v29 }
 0x2a5   :  { %v5957_v41 = vadd.f32 1.4214138, %v5956_v34 }
 0x2a6   :  { %v5799_v62 = vpop.f32.mrf.mxu2  ;;  %v5775_v2 = vpop.f32.mrf.mxu0 }
 0x2a7   :  { %v5812_v0 = vpop.f32.mrf.mxu3  ;;  %v5788_v3 = vpop.f32.mrf.mxu1  ;;  %v5800_v19 = vadd.f32 %v5799_v62, %v5787_v15  ;;  %v5958_v43 = vmul.f32 %v5957_v41, %v5952_v29  ;;  %v5932_v62 = vmul.f32 0.5, %v10921_v61  ;;  %v6013_v61 = vld [vmem:[%s10980_s7] sm:$0xff] }
 0x2a8   :  { %6063 = vmatpush.msra.mxu1 %v6013_v61 }
 0x2a9   :  { %v5813_v23 = vadd.f32 %v5812_v0, %v5800_v19  ;;  %v5959_v45 = vadd.f32 -0.28449672, %v5958_v43 }
 0x2ab   :  { %v5960_v47 = vmul.f32 %v5959_v45, %v5952_v29 }
 0x2ad   :  { %v5961_v51 = vadd.f32 0.2548296, %v5960_v47  ;;  %v6017_v47 = vld [vmem:[%s10980_s7 + $0x20] sm:$0xff] }
 0x2ae   :  { %v5801_v9 = vpop.f32.mrf.mxu2 }
 0x2af   :  { %v5814_v10 = vpop.f32.mrf.mxu3  ;;  %v5962_v54 = vmul.f32 %v5961_v51, %v5952_v29 }
 0x2b1   :  { %v5967_v55 = vmul.f32 %v8971_v52, %v5962_v54 }
 0x2b3   :  { %v5968_v59 = vsub.f32 1.0, %v5967_v55 }
 0x2b5   :  { %v5969_v63 = vmul.f32 %v5968_v59, %v5935_v58 }
 0x2b7   :  { %v5970_v2 = vadd.f32 1.0, %v5969_v63 }
 0x2b9   :  { %v5971_v5 = vmul.f32 %v5970_v2, %v5932_v62 }
 0x2bb   :  { %8384 = vmatmul.msk.f32.vlgmr.msra.gmra.mxu1 %vm6021_vm6, %v5971_v5 }
 0x2be   :  { %v5825_v24 = vpop.f32.mrf.mxu0 }
 0x2bf   :  { %v5838_v25 = vpop.f32.mrf.mxu1  ;;  %v5826_v28 = vadd.f32 %v5825_v24, %v5813_v23 }
 0x2c1   :  { %v5839_v33 = vadd.f32 %v5838_v25, %v5826_v28 }
 0x2c6   :  { %v5851_v35 = vpop.f32.mrf.mxu2  ;;  %v5827_v39 = vpop.f32.mrf.mxu0 }
 0x2c7   :  { %v5864_v36 = vpop.f32.mrf.mxu3  ;;  %v5852_v38 = vadd.f32 %v5851_v35, %v5839_v33  ;;  %v5840_v40 = vpop.f32.mrf.mxu1 }
 0x2c8   :  { %v6020_v40 = vld [vmem:[%s10980_s7 + $0x38] sm:$0xff] }
 0x2c9   :  { %v10927_v42 = vadd.f32 %v5864_v36, %v5852_v38  ;;  %6037 = vmatpush.msra.mxu0 %v6020_v40 }
 0x2cb   :  { %v10930_v44 = vmul.f32 0.70710677, %v10927_v42  ;;  %v5868_v31 = vmul.f32 0.5, %v10927_v42  ;;  %v6019_v42 = vld [vmem:[%s10980_s7 + $0x30] sm:$0xff] }
 0x2cc   :  { %6038 = vmatpush.msra.mxu0 %v6019_v42 }
 0x2cd   :  { %v5872_v46 = vand.u32 2147483647, %v10930_v44  ;;  %vm5870_vm10 = vcmp.lt.f32.partialorder %v10930_v44, 0.0 }
 0x2ce   :  { %v5853_v48 = vpop.f32.mrf.mxu2  ;;  %v5871_v29 = vsel %vm5870_vm10, -1.0, %v8981_v57 }
 0x2cf   :  { %v5866_v49 = vpop.f32.mrf.mxu3  ;;  %v5873_v50 = vmul.f32 0.3275911, %v5872_v46  ;;  %v5899_v14 = vsub.f32 0.0, %v5872_v46 }
 0x2d1   :  { %v5874_v53 = vadd.f32 1.0, %v5873_v50  ;;  %v5900_v17 = vmul.f32 %v5899_v14, %v5872_v46 }
 0x2d3   :  { %8972 = vrcp.f32 %v5874_v53  ;;  %v5886_v7 = vand.u32 2147483648, %v5874_v53  ;;  %v5884_v9 = vand.u32 2147483647, %v5874_v53  ;;  %vm5880_vm7 = vweird.f32 %v5874_v53 }
 0x2d4   :  { %v5901_v20 = vmul.f32 1.442695, %v5900_v17 }
 0x2d5   :  { %v5887_v11 = vor.u32 1.1754944e-38, %v5886_v7  ;;  %vm5885_vm9 = vcmp.eq.f32.partialorder %v5884_v9, 8.507059e+37 }
 0x2d6   :  { %8974 = vpow2.f32 %v5901_v20 }
 0x2d9   :  { %v8973_v0 = vpop.eup %8972 }
 0x2da   :  { %v5876_v3 = vmul.f32 %v8973_v0, %v5874_v53  ;;  %vm5881_vm5 = vweird.f32 %v8973_v0 }
 0x2db   :  { %vm5882_vm8 = vmor %vm5880_vm7, %vm5881_vm5 }
 0x2dc   :  { %v5877_v6 = vsub.f32 1.0, %v5876_v3  ;;  %v8975_v26 = vpop.eup %8974 }
 0x2de   :  { %v5878_v8 = vmul.f32 %v8973_v0, %v5877_v6 }
 0x2e0   :  { %v5879_v10 = vadd.f32 %v8973_v0, %v5878_v8 }
 0x2e2   :  { %v5883_v12 = vsel %vm5882_vm8, %v8973_v0, %v5879_v10  ;;  %v8967_v10 = vld [vmem:[%s10981_s8] ss:$0 sm:$0xff] }
 0x2e3   :  { %v5888_v13 = vsel %vm5885_vm9, %v5887_v11, %v5883_v12 }
 0x2e4   :  { %v5890_v15 = vmul.f32 1.0614054, %v5888_v13 }
 0x2e6   :  { %v5891_v16 = vadd.f32 -1.4531521, %v5890_v15 }
 0x2e8   :  { %v5892_v18 = vmul.f32 %v5891_v16, %v5888_v13 }
 0x2ea   :  { %v5893_v19 = vadd.f32 1.4214138, %v5892_v18 }
 0x2ec   :  { %v5894_v21 = vmul.f32 %v5893_v19, %v5888_v13 }
 0x2ee   :  { %v5895_v22 = vadd.f32 -0.28449672, %v5894_v21 }
 0x2f0   :  { %v5896_v23 = vmul.f32 %v5895_v22, %v5888_v13 }
 0x2f2   :  { %v5897_v24 = vadd.f32 0.2548296, %v5896_v23 }
 0x2f4   :  { %v5898_v25 = vmul.f32 %v5897_v24, %v5888_v13 }
 0x2f6   :  { %v5903_v27 = vmul.f32 %v8975_v26, %v5898_v25 }
 0x2f8   :  { %v5904_v28 = vsub.f32 1.0, %v5903_v27 }
 0x2fa   :  { %v5905_v30 = vmul.f32 %v5904_v28, %v5871_v29 }
 0x2fc   :  { %v5906_v32 = vadd.f32 1.0, %v5905_v30 }
 0x2fe   :  { %v5907_v33 = vmul.f32 %v5906_v32, %v5868_v31 }
 0x300   :  { %v5972_v34 = vadd.f32 %v10919_v56, %v5907_v33  ;;  %v6018_v56 = vld [vmem:[%s10980_s7 + $0x28] sm:$0xff] }
 0x301   :  { %6039 = vmatpush.msra.mxu0 %v6018_v56 }
 0x302   :  { %v5974_v35 = vmul.f32 0.70710677, %v5972_v34  ;;  %v5973_v61 = vmul.f32 0.5, %v5972_v34 }
 0x303   :  { %6040 = vmatpush.msra.mxu0 %v6017_v47 }
 0x304   :  { %v5977_v36 = vand.u32 2147483647, %v5974_v35  ;;  %vm5975_vm15 = vcmp.lt.f32.partialorder %v5974_v35, 0.0 }
 0x305   :  { %v5976_v6 = vsel %vm5975_vm15, -1.0, %v8981_v57 }
 0x306   :  { %v5978_v37 = vmul.f32 0.3275911, %v5977_v36  ;;  %v6004_v52 = vsub.f32 0.0, %v5977_v36 }
 0x308   :  { %v5979_v38 = vadd.f32 1.0, %v5978_v37  ;;  %v6005_v55 = vmul.f32 %v6004_v52, %v5977_v36 }
 0x30a   :  { %8976 = vrcp.f32 %v5979_v38  ;;  %v5991_v44 = vand.u32 2147483648, %v5979_v38  ;;  %v5989_v46 = vand.u32 2147483647, %v5979_v38  ;;  %vm5985_vm12 = vweird.f32 %v5979_v38 }
 0x30b   :  { %v6006_v60 = vmul.f32 1.442695, %v6005_v55 }
 0x30c   :  { %v5992_v49 = vor.u32 1.1754944e-38, %v5991_v44  ;;  %vm5990_vm14 = vcmp.eq.f32.partialorder %v5989_v46, 8.507059e+37 }
 0x30d   :  { %8978 = vpow2.f32 %v6006_v60 }
 0x310   :  { %v8977_v39 = vpop.eup %8976 }
 0x311   :  { %v5981_v41 = vmul.f32 %v8977_v39, %v5979_v38  ;;  %vm5986_vm11 = vweird.f32 %v8977_v39 }
 0x312   :  { %vm5987_vm13 = vmor %vm5985_vm12, %vm5986_vm11 }
 0x313   :  { %v5982_v43 = vsub.f32 1.0, %v5981_v41  ;;  %v8979_v3 = vpop.eup %8978 }
 0x315   :  { %v5983_v45 = vmul.f32 %v8977_v39, %v5982_v43 }
 0x317   :  { %v5984_v48 = vadd.f32 %v8977_v39, %v5983_v45 }
 0x319   :  { %v5988_v50 = vsel %vm5987_vm13, %v8977_v39, %v5984_v48 }
 0x31a   :  { %v5993_v51 = vsel %vm5990_vm14, %v5992_v49, %v5988_v50 }
 0x31b   :  { %v5995_v53 = vmul.f32 1.0614054, %v5993_v51 }
 0x31d   :  { %v5996_v54 = vadd.f32 -1.4531521, %v5995_v53 }
 0x31f   :  { %v5997_v58 = vmul.f32 %v5996_v54, %v5993_v51 }
 0x321   :  { %v5998_v59 = vadd.f32 1.4214138, %v5997_v58 }
 0x323   :  { %v5999_v62 = vmul.f32 %v5998_v59, %v5993_v51 }
 0x325   :  { %v6000_v63 = vadd.f32 -0.28449672, %v5999_v62 }
 0x327   :  { %v6001_v0 = vmul.f32 %v6000_v63, %v5993_v51 }
 0x329   :  { %v6002_v1 = vadd.f32 0.2548296, %v6001_v0 }
 0x32b   :  { %v6003_v2 = vmul.f32 %v6002_v1, %v5993_v51 }
 0x32d   :  { %v6008_v4 = vmul.f32 %v8979_v3, %v6003_v2 }
 0x32f   :  { %v6009_v5 = vsub.f32 1.0, %v6008_v4 }
 0x331   :  { %v6010_v7 = vmul.f32 %v6009_v5, %v5976_v6 }
 0x333   :  { %v6011_v8 = vadd.f32 1.0, %v6010_v7 }
 0x335   :  { %v6012_v9 = vmul.f32 %v6011_v8, %v5973_v61 }
 0x337   :  { %8383 = vmatmul.msk.f32.vlgmr.msra.gmra.mxu0 %vm6021_vm6, %v6012_v9 }
 0x338   :  { %v6065_v11 = vpop.f32.mrf.mxu1 }
 0x3b4   :  { %v6042_v12 = vpop.f32.mrf.mxu0 }
 0x3b5   :  { %v6066_v13 = vadd.f32 %v6065_v11, %v6042_v12 }
 0x3b7   :  { %v6072_v14 = vadd.f32 %v8967_v10, %v6066_v13 }
 0x3b9   :  { %6074 = vst.msk [vmem:[%s10982_s9] sm:$0xff] %vm6073_vm0, %v6072_v14 }

</bundles_post_ra>
